<compile_context>
chip_gen: v7x
topology: tpu7x:2x2x1
jax: 0.10.0
libtpu: 0.0.40
codegen_flags: <defaults>
</compile_context>

<pallas_src>
import numpy as np

import jax
import jax.numpy as jnp
from jax.experimental import pallas as pl
from jax.experimental.pallas import tpu as pltpu


# ---------------------------------------------------------------------------
# Fused kernel.
#
# Layouts inside the kernel (fp32):
#   activations:  (N*H, W*C)          lane-dense, row index = (n, i)
#   padded bufs:  (N, H+2, (W+2)*C)   VMEM scratch with zero borders
#   conv weights: (3, (W+2)*Cin, W*Cout)  banded matrices, one per kernel row
#   fc1 weight:   (H, W*64, 128)      NCHW-flatten permutation pre-folded
#   head weight:  (64, 1 + A)         value and advantage fused
# ---------------------------------------------------------------------------
def _dueling_fused_kernel(x_ref, c1w, c1b, c2w, c2b, c3w, c3b,
                          f1w, f1b, f2w, f2b, f3w, f3b, hw_ref, hb_ref,
                          q_ref, p1, p2):
    n, h, wc = x_ref.shape
    w = wc // 4                       # conv1 input channels are fixed at 4

    def conv3x3_relu(pad_ref, w_ref, b_ref):
        # out[(n,i), j*Cout+co] = sum_kh  P[n, i+kh, :] @ B[kh]
        k = pad_ref.shape[-1]
        acc = jnp.dot(pad_ref[:, 0:h, :].reshape(n * h, k), w_ref[0],
                      preferred_element_type=jnp.float32)
        acc = acc + jnp.dot(pad_ref[:, 1:1 + h, :].reshape(n * h, k), w_ref[1],
                            preferred_element_type=jnp.float32)
        acc = acc + jnp.dot(pad_ref[:, 2:2 + h, :].reshape(n * h, k), w_ref[2],
                            preferred_element_type=jnp.float32)
        return jnp.maximum(acc + b_ref[...], 0.0)      # (n*h, w*cout)

    # ---- conv1 (in-kernel zero padding into VMEM scratch) ----
    p1[...] = jnp.zeros_like(p1)
    p1[:, 1:1 + h, 4:4 + w * 4] = x_ref[...]
    a1 = conv3x3_relu(p1, c1w, c1b)                    # (n*h, w*32)

    # ---- conv2 ----
    p2[...] = jnp.zeros_like(p2)
    p2[:, 1:1 + h, 32:32 + w * 32] = a1.reshape(n, h, w * 32)
    a2 = conv3x3_relu(p2, c2w, c2b)                    # (n*h, w*32)

    # ---- conv3 (reuse p2; its borders are still zero) ----
    p2[:, 1:1 + h, 32:32 + w * 32] = a2.reshape(n, h, w * 32)
    a3 = conv3x3_relu(p2, c3w, c3b)                    # (n*h, w*64)

    # ---- fc1: flatten expressed as a sum of per-image-row matmuls ----
    # (the torch NCHW flatten permutation is already folded into f1w)
    a3v = a3.reshape(n, h, w * 64)                     # (n, h, w*64)
    acc = jnp.dot(a3v[:, 0, :], f1w[0], preferred_element_type=jnp.float32)
    for i in range(1, h):
        acc = acc + jnp.dot(a3v[:, i, :], f1w[i],
                            preferred_element_type=jnp.float32)
    hid = jnp.maximum(acc + f1b[...], 0.0)             # (n, 128)

    # ---- fc2, fc3 ----
    hid = jnp.maximum(
        jnp.dot(hid, f2w[...], preferred_element_type=jnp.float32) + f2b[...],
        0.0)                                           # (n, 64)
    hid = jnp.maximum(
        jnp.dot(hid, f3w[...], preferred_element_type=jnp.float32) + f3b[...],
        0.0)                                           # (n, 64)

    # ---- fused dueling head: single matmul for [V | A] ----
    va = jnp.dot(hid, hw_ref[...], preferred_element_type=jnp.float32) + hb_ref[...]
    v = va[:, 0:1]
    adv = va[:, 1:]
    q_ref[...] = v + adv - jnp.mean(adv, axis=-1, keepdims=True)


@jax.jit
def dueling_forward(kp, x_nchw):
    n, c, h, w = x_nchw.shape
    # NCHW -> (N, H, W*C) channel-minor rows (tiny one-off XLA relayout).
    x = jnp.transpose(x_nchw.astype(jnp.float32), (0, 2, 3, 1)).reshape(n, h, w * c)
    out_dim = kp["hw"].shape[-1] - 1
    vmem = pl.BlockSpec(memory_space=pltpu.MemorySpace.VMEM)
    args = (x,
            kp["c1w"], kp["c1b"], kp["c2w"], kp["c2b"], kp["c3w"], kp["c3b"],
            kp["f1w"], kp["f1b"], kp["f2w"], kp["f2b"], kp["f3w"], kp["f3b"],
            kp["hw"], kp["hb"])
    return pl.pallas_call(
        _dueling_fused_kernel,
        out_shape=jax.ShapeDtypeStruct((n, out_dim), jnp.float32),
        in_specs=[vmem] * len(args),
        out_specs=vmem,
        scratch_shapes=[
            pltpu.VMEM((n, h + 2, (w + 2) * 4), jnp.float32),   # padded conv1 input
            pltpu.VMEM((n, h + 2, (w + 2) * 32), jnp.float32),  # padded conv2/3 input
        ],
        compiler_params=pltpu.CompilerParams(vmem_limit_bytes=32 * 1024 * 1024),
    )(*args)


# ---------------------------------------------------------------------------
# Parameter construction (PyTorch layouts) and conversion to kernel layouts.
# ---------------------------------------------------------------------------
def init_torch_params(key, input_dim, output_dim):
    """Parameters in PyTorch layouts (Conv2d: OIHW, Linear: (out, in))."""
    _, _, h, w = input_dim
    conv_out = 64 * h * w                   # == DuelingNetWork.get_conv_out_dim
    layer_defs = [
        ("conv1", (32, 4, 3, 3)), ("conv2", (32, 32, 3, 3)), ("conv3", (64, 32, 3, 3)),
        ("fc1", (128, conv_out)), ("fc2", (64, 128)), ("fc3", (64, 64)),
        ("value", (1, 64)), ("advantage", (output_dim, 64)),
    ]
    params = {}
    for name, shape in layer_defs:
        key, kw_, kb_ = jax.random.split(key, 3)
        bound = 1.0 / float(np.sqrt(np.prod(shape[1:])))   # torch default-ish init
        params[name + "_w"] = jax.random.uniform(kw_, shape, jnp.float32, -bound, bound)
        params[name + "_b"] = jax.random.uniform(kb_, shape[:1], jnp.float32, -bound, bound)
    return params


def _banded_conv_weight(w_oihw, width):
    """(Cout, Cin, 3, 3) torch conv weight -> (3, (W+2)*Cin, W*Cout) banded mats.

    B[kh, (j+kw)*Cin + ci, j*Cout + co] = w[co, ci, kh, kw], so that one matmul
    per kernel row on the channel-minor padded rows reproduces
    Conv2d(kernel=3, stride=1, padding=1).
    """
    w = np.asarray(w_oihw, np.float32)
    cout, cin = w.shape[0], w.shape[1]
    wt = np.transpose(w, (2, 3, 1, 0))                 # (kh, kw, ci, co)
    b = np.zeros((3, (width + 2) * cin, width * cout), np.float32)
    for kh in range(3):
        for kw in range(3):
            for j in range(width):
                b[kh, (j + kw) * cin:(j + kw + 1) * cin,
                  j * cout:(j + 1) * cout] = wt[kh, kw]
    return jnp.asarray(b)


def _tiled_bias(bias, width):
    return jnp.asarray(np.tile(np.asarray(bias, np.float32), width)[None, :])


def prepare_kernel_params(tp, h, w):
    """Convert PyTorch-layout parameters to the fused-kernel layouts."""
    kp = {
        "c1w": _banded_conv_weight(tp["conv1_w"], w), "c1b": _tiled_bias(tp["conv1_b"], w),
        "c2w": _banded_conv_weight(tp["conv2_w"], w), "c2b": _tiled_bias(tp["conv2_b"], w),
        "c3w": _banded_conv_weight(tp["conv3_w"], w), "c3b": _tiled_bias(tp["conv3_b"], w),
    }
    # fc1: fold the torch NCHW flatten (c, i, j) -> kernel (i, j, c) ordering
    # into the weight and split rows per image-row i for the in-kernel sum.
    f1 = jnp.transpose(tp["fc1_w"]).reshape(64, h, w, 128)          # [c, i, j, o]
    f1 = jnp.transpose(f1, (1, 2, 0, 3)).reshape(h, w * 64, 128)    # [i][j*64+c, o]
    kp["f1w"] = f1
    kp["f1b"] = tp["fc1_b"][None, :]
    kp["f2w"] = jnp.transpose(tp["fc2_w"]); kp["f2b"] = tp["fc2_b"][None, :]
    kp["f3w"] = jnp.transpose(tp["fc3_w"]); kp["f3b"] = tp["fc3_b"][None, :]
    # fused dueling head: [value | advantage]
    kp["hw"] = jnp.transpose(jnp.concatenate([tp["value_w"], tp["advantage_w"]], axis=0))
    kp["hb"] = jnp.concatenate([tp["value_b"], tp["advantage_b"]])[None, :]
    return kp


# ---------------------------------------------------------------------------
# Pure-JAX fp32 reference (mirrors the PyTorch module exactly).
# ---------------------------------------------------------------------------
def reference_forward(tp, x_nchw):
    hp = jax.lax.Precision.HIGHEST
    x = x_nchw.astype(jnp.float32)

    def conv(x, wgt, b):
        y = jax.lax.conv_general_dilated(
            x, wgt, window_strides=(1, 1), padding=((1, 1), (1, 1)),
            dimension_numbers=("NCHW", "OIHW", "NCHW"), precision=hp)
        return jax.nn.relu(y + b[None, :, None, None])

    x = conv(x, tp["conv1_w"], tp["conv1_b"])
    x = conv(x, tp["conv2_w"], tp["conv2_b"])
    x = conv(x, tp["conv3_w"], tp["conv3_b"])
    xf = x.reshape(x.shape[0], -1)

    def lin(hid, wgt, b):
        return jnp.dot(hid, wgt.T, precision=hp) + b

    hid = jax.nn.relu(lin(xf, tp["fc1_w"], tp["fc1_b"]))
    hid = jax.nn.relu(lin(hid, tp["fc2_w"], tp["fc2_b"]))
    hid = jax.nn.relu(lin(hid, tp["fc3_w"], tp["fc3_b"]))
    v = lin(hid, tp["value_w"], tp["value_b"])
    a = lin(hid, tp["advantage_w"], tp["advantage_b"])
    return v + a - jnp.mean(a, axis=-1, keepdims=True)


if __name__ == "__main__":
    # Module config: DuelingNetWork(input_dim=(1, 4, 8, 8), output_dim=6, noisy=False)
    N, C, H, W = 2, 4, 8, 8
    OUTPUT_DIM = 6

    key = jax.random.PRNGKey(0)
    pkey, xkey = jax.random.split(key)
    torch_params = init_torch_params(pkey, (1, C, H, W), OUTPUT_DIM)
    kparams = prepare_kernel_params(torch_params, H, W)
    x = jax.random.normal(xkey, (N, C, H, W), dtype=jnp.float32)

    q = jax.block_until_ready(dueling_forward(kparams, x))
    assert q.shape == (N, OUTPUT_DIM), q.shape
    assert bool(jnp.all(jnp.isfinite(q)))

    # Check against the pure-JAX fp32 reference of the torch module.
    q_ref = jax.block_until_ready(reference_forward(torch_params, x))
    np.testing.assert_allclose(np.asarray(q), np.asarray(q_ref),
                               atol=5e-3, rtol=5e-2)
    print("KERNEL_OK")
</pallas_src>

<mosaic_0001>
module attributes {stable_mosaic.version = 11 : i64} {
  func.func @_dueling_fused_kernel(%arg0: memref<2x8x32xf32, #tpu.memory_space<vmem>>, %arg1: memref<3x40x256xf32, #tpu.memory_space<vmem>>, %arg2: memref<1x256xf32, #tpu.memory_space<vmem>>, %arg3: memref<3x320x256xf32, #tpu.memory_space<vmem>>, %arg4: memref<1x256xf32, #tpu.memory_space<vmem>>, %arg5: memref<3x320x512xf32, #tpu.memory_space<vmem>>, %arg6: memref<1x512xf32, #tpu.memory_space<vmem>>, %arg7: memref<8x512x128xf32, #tpu.memory_space<vmem>>, %arg8: memref<1x128xf32, #tpu.memory_space<vmem>>, %arg9: memref<128x64xf32, #tpu.memory_space<vmem>>, %arg10: memref<1x64xf32, #tpu.memory_space<vmem>>, %arg11: memref<64x64xf32, #tpu.memory_space<vmem>>, %arg12: memref<1x64xf32, #tpu.memory_space<vmem>>, %arg13: memref<64x7xf32, #tpu.memory_space<vmem>>, %arg14: memref<1x7xf32, #tpu.memory_space<vmem>>, %arg15: memref<2x6xf32, #tpu.memory_space<vmem>>, %arg16: memref<2x10x40xf32, #tpu.memory_space<vmem>>, %arg17: memref<2x10x320xf32, #tpu.memory_space<vmem>>) attributes {dimension_semantics = [], scalar_prefetch = 0 : i64, scratch_operands = 2 : i64, tpu.core_type = #tpu.core_type<tc>} {
    %cst = arith.constant 0.000000e+00 : f32
    %0 = vector.broadcast %cst : f32 to vector<2x10x40xf32>
    %c0 = arith.constant 0 : index
    %c0_0 = arith.constant 0 : index
    %c0_1 = arith.constant 0 : index
    %1 = vector.load %arg16[%c0, %c0_0, %c0_1] : memref<2x10x40xf32, #tpu.memory_space<vmem>>, vector<2x10x40xf32>
    tpu.vector_store %arg16[%c0, %c0_0, %c0_1], %0 {strides = array<i32>} : memref<2x10x40xf32, #tpu.memory_space<vmem>>, vector<2x10x40xf32>,
    %c0_2 = arith.constant 0 : index
    %c0_3 = arith.constant 0 : index
    %c0_4 = arith.constant 0 : index
    %2 = vector.load %arg0[%c0_2, %c0_3, %c0_4] : memref<2x8x32xf32, #tpu.memory_space<vmem>>, vector<2x8x32xf32>
    %c0_5 = arith.constant 0 : index
    %c1 = arith.constant 1 : index
    %c4 = arith.constant 4 : index
    %3 = vector.load %arg16[%c0_5, %c1, %c4] : memref<2x10x40xf32, #tpu.memory_space<vmem>>, vector<2x8x32xf32>
    tpu.vector_store %arg16[%c0_5, %c1, %c4], %2 {strides = array<i32>} : memref<2x10x40xf32, #tpu.memory_space<vmem>>, vector<2x8x32xf32>,
    %c0_6 = arith.constant 0 : index
    %c0_7 = arith.constant 0 : index
    %c0_8 = arith.constant 0 : index
    %4 = vector.load %arg16[%c0_6, %c0_7, %c0_8] : memref<2x10x40xf32, #tpu.memory_space<vmem>>, vector<2x8x40xf32>
    %5 = vector.shape_cast %4 : vector<2x8x40xf32> to vector<16x40xf32>
    %c0_9 = arith.constant 0 : index
    %c0_10 = arith.constant 0 : index
    %c0_11 = arith.constant 0 : index
    %6 = vector.load %arg1[%c0_9, %c0_10, %c0_11] : memref<3x40x256xf32, #tpu.memory_space<vmem>>, vector<1x40x256xf32>
    %7 = vector.shape_cast %6 : vector<1x40x256xf32> to vector<40x256xf32>
    %cst_12 = arith.constant dense<0.000000e+00> : vector<16x256xf32>
    %8 = tpu.matmul %5, %7, %cst_12 {dimension_numbers = #tpu.dot_dimension_numbers<[1], [0], [0], [1], [0, 0, 1, 1], [], []>} : vector<16x40xf32>, vector<40x256xf32>, vector<16x256xf32> -> vector<16x256xf32>
    %c0_13 = arith.constant 0 : index
    %c1_14 = arith.constant 1 : index
    %c0_15 = arith.constant 0 : index
    %9 = vector.load %arg16[%c0_13, %c1_14, %c0_15] : memref<2x10x40xf32, #tpu.memory_space<vmem>>, vector<2x8x40xf32>
    %10 = vector.shape_cast %9 : vector<2x8x40xf32> to vector<16x40xf32>
    %c1_16 = arith.constant 1 : index
    %c0_17 = arith.constant 0 : index
    %c0_18 = arith.constant 0 : index
    %11 = vector.load %arg1[%c1_16, %c0_17, %c0_18] : memref<3x40x256xf32, #tpu.memory_space<vmem>>, vector<1x40x256xf32>
    %12 = vector.shape_cast %11 : vector<1x40x256xf32> to vector<40x256xf32>
    %cst_19 = arith.constant dense<0.000000e+00> : vector<16x256xf32>
    %13 = tpu.matmul %10, %12, %cst_19 {dimension_numbers = #tpu.dot_dimension_numbers<[1], [0], [0], [1], [0, 0, 1, 1], [], []>} : vector<16x40xf32>, vector<40x256xf32>, vector<16x256xf32> -> vector<16x256xf32>
    %14 = arith.addf %8, %13 : vector<16x256xf32>
    %c0_20 = arith.constant 0 : index
    %c2 = arith.constant 2 : index
    %c0_21 = arith.constant 0 : index
    %15 = vector.load %arg16[%c0_20, %c2, %c0_21] : memref<2x10x40xf32, #tpu.memory_space<vmem>>, vector<2x8x40xf32>
    %16 = vector.shape_cast %15 : vector<2x8x40xf32> to vector<16x40xf32>
    %c2_22 = arith.constant 2 : index
    %c0_23 = arith.constant 0 : index
    %c0_24 = arith.constant 0 : index
    %17 = vector.load %arg1[%c2_22, %c0_23, %c0_24] : memref<3x40x256xf32, #tpu.memory_space<vmem>>, vector<1x40x256xf32>
    %18 = vector.shape_cast %17 : vector<1x40x256xf32> to vector<40x256xf32>
    %cst_25 = arith.constant dense<0.000000e+00> : vector<16x256xf32>
    %19 = tpu.matmul %16, %18, %cst_25 {dimension_numbers = #tpu.dot_dimension_numbers<[1], [0], [0], [1], [0, 0, 1, 1], [], []>} : vector<16x40xf32>, vector<40x256xf32>, vector<16x256xf32> -> vector<16x256xf32>
    %20 = arith.addf %14, %19 : vector<16x256xf32>
    %c0_26 = arith.constant 0 : index
    %c0_27 = arith.constant 0 : index
    %21 = vector.load %arg2[%c0_26, %c0_27] : memref<1x256xf32, #tpu.memory_space<vmem>>, vector<1x256xf32>
    %22 = vector.broadcast %21 : vector<1x256xf32> to vector<16x256xf32>
    %23 = arith.addf %20, %22 : vector<16x256xf32>
    %cst_28 = arith.constant 0.000000e+00 : f32
    %24 = vector.broadcast %cst_28 : f32 to vector<16x256xf32>
    %25 = arith.maximumf %23, %24 : vector<16x256xf32>
    %cst_29 = arith.constant 0.000000e+00 : f32
    %26 = vector.broadcast %cst_29 : f32 to vector<2x10x320xf32>
    %c0_30 = arith.constant 0 : index
    %c0_31 = arith.constant 0 : index
    %c0_32 = arith.constant 0 : index
    %27 = vector.load %arg17[%c0_30, %c0_31, %c0_32] : memref<2x10x320xf32, #tpu.memory_space<vmem>>, vector<2x10x320xf32>
    tpu.vector_store %arg17[%c0_30, %c0_31, %c0_32], %26 {strides = array<i32>} : memref<2x10x320xf32, #tpu.memory_space<vmem>>, vector<2x10x320xf32>,
    %28 = vector.shape_cast %25 : vector<16x256xf32> to vector<2x8x256xf32>
    %c0_33 = arith.constant 0 : index
    %c1_34 = arith.constant 1 : index
    %c32 = arith.constant 32 : index
    %29 = vector.load %arg17[%c0_33, %c1_34, %c32] : memref<2x10x320xf32, #tpu.memory_space<vmem>>, vector<2x8x256xf32>
    tpu.vector_store %arg17[%c0_33, %c1_34, %c32], %28 {strides = array<i32>} : memref<2x10x320xf32, #tpu.memory_space<vmem>>, vector<2x8x256xf32>,
    %c0_35 = arith.constant 0 : index
    %c0_36 = arith.constant 0 : index
    %c0_37 = arith.constant 0 : index
    %30 = vector.load %arg17[%c0_35, %c0_36, %c0_37] : memref<2x10x320xf32, #tpu.memory_space<vmem>>, vector<2x8x320xf32>
    %31 = vector.shape_cast %30 : vector<2x8x320xf32> to vector<16x320xf32>
    %c0_38 = arith.constant 0 : index
    %c0_39 = arith.constant 0 : index
    %c0_40 = arith.constant 0 : index
    %32 = vector.load %arg3[%c0_38, %c0_39, %c0_40] : memref<3x320x256xf32, #tpu.memory_space<vmem>>, vector<1x320x256xf32>
    %33 = vector.shape_cast %32 : vector<1x320x256xf32> to vector<320x256xf32>
    %cst_41 = arith.constant dense<0.000000e+00> : vector<16x256xf32>
    %34 = tpu.matmul %31, %33, %cst_41 {dimension_numbers = #tpu.dot_dimension_numbers<[1], [0], [0], [1], [0, 0, 1, 1], [], []>} : vector<16x320xf32>, vector<320x256xf32>, vector<16x256xf32> -> vector<16x256xf32>
    %c0_42 = arith.constant 0 : index
    %c1_43 = arith.constant 1 : index
    %c0_44 = arith.constant 0 : index
    %35 = vector.load %arg17[%c0_42, %c1_43, %c0_44] : memref<2x10x320xf32, #tpu.memory_space<vmem>>, vector<2x8x320xf32>
    %36 = vector.shape_cast %35 : vector<2x8x320xf32> to vector<16x320xf32>
    %c1_45 = arith.constant 1 : index
    %c0_46 = arith.constant 0 : index
    %c0_47 = arith.constant 0 : index
    %37 = vector.load %arg3[%c1_45, %c0_46, %c0_47] : memref<3x320x256xf32, #tpu.memory_space<vmem>>, vector<1x320x256xf32>
    %38 = vector.shape_cast %37 : vector<1x320x256xf32> to vector<320x256xf32>
    %cst_48 = arith.constant dense<0.000000e+00> : vector<16x256xf32>
    %39 = tpu.matmul %36, %38, %cst_48 {dimension_numbers = #tpu.dot_dimension_numbers<[1], [0], [0], [1], [0, 0, 1, 1], [], []>} : vector<16x320xf32>, vector<320x256xf32>, vector<16x256xf32> -> vector<16x256xf32>
    %40 = arith.addf %34, %39 : vector<16x256xf32>
    %c0_49 = arith.constant 0 : index
    %c2_50 = arith.constant 2 : index
    %c0_51 = arith.constant 0 : index
    %41 = vector.load %arg17[%c0_49, %c2_50, %c0_51] : memref<2x10x320xf32, #tpu.memory_space<vmem>>, vector<2x8x320xf32>
    %42 = vector.shape_cast %41 : vector<2x8x320xf32> to vector<16x320xf32>
    %c2_52 = arith.constant 2 : index
    %c0_53 = arith.constant 0 : index
    %c0_54 = arith.constant 0 : index
    %43 = vector.load %arg3[%c2_52, %c0_53, %c0_54] : memref<3x320x256xf32, #tpu.memory_space<vmem>>, vector<1x320x256xf32>
    %44 = vector.shape_cast %43 : vector<1x320x256xf32> to vector<320x256xf32>
    %cst_55 = arith.constant dense<0.000000e+00> : vector<16x256xf32>
    %45 = tpu.matmul %42, %44, %cst_55 {dimension_numbers = #tpu.dot_dimension_numbers<[1], [0], [0], [1], [0, 0, 1, 1], [], []>} : vector<16x320xf32>, vector<320x256xf32>, vector<16x256xf32> -> vector<16x256xf32>
    %46 = arith.addf %40, %45 : vector<16x256xf32>
    %c0_56 = arith.constant 0 : index
    %c0_57 = arith.constant 0 : index
    %47 = vector.load %arg4[%c0_56, %c0_57] : memref<1x256xf32, #tpu.memory_space<vmem>>, vector<1x256xf32>
    %48 = vector.broadcast %47 : vector<1x256xf32> to vector<16x256xf32>
    %49 = arith.addf %46, %48 : vector<16x256xf32>
    %cst_58 = arith.constant 0.000000e+00 : f32
    %50 = vector.broadcast %cst_58 : f32 to vector<16x256xf32>
    %51 = arith.maximumf %49, %50 : vector<16x256xf32>
    %52 = vector.shape_cast %51 : vector<16x256xf32> to vector<2x8x256xf32>
    %c0_59 = arith.constant 0 : index
    %c1_60 = arith.constant 1 : index
    %c32_61 = arith.constant 32 : index
    %53 = vector.load %arg17[%c0_59, %c1_60, %c32_61] : memref<2x10x320xf32, #tpu.memory_space<vmem>>, vector<2x8x256xf32>
    tpu.vector_store %arg17[%c0_59, %c1_60, %c32_61], %52 {strides = array<i32>} : memref<2x10x320xf32, #tpu.memory_space<vmem>>, vector<2x8x256xf32>,
    %c0_62 = arith.constant 0 : index
    %c0_63 = arith.constant 0 : index
    %c0_64 = arith.constant 0 : index
    %54 = vector.load %arg17[%c0_62, %c0_63, %c0_64] : memref<2x10x320xf32, #tpu.memory_space<vmem>>, vector<2x8x320xf32>
    %55 = vector.shape_cast %54 : vector<2x8x320xf32> to vector<16x320xf32>
    %c0_65 = arith.constant 0 : index
    %c0_66 = arith.constant 0 : index
    %c0_67 = arith.constant 0 : index
    %56 = vector.load %arg5[%c0_65, %c0_66, %c0_67] : memref<3x320x512xf32, #tpu.memory_space<vmem>>, vector<1x320x512xf32>
    %57 = vector.shape_cast %56 : vector<1x320x512xf32> to vector<320x512xf32>
    %cst_68 = arith.constant dense<0.000000e+00> : vector<16x512xf32>
    %58 = tpu.matmul %55, %57, %cst_68 {dimension_numbers = #tpu.dot_dimension_numbers<[1], [0], [0], [1], [0, 0, 1, 1], [], []>} : vector<16x320xf32>, vector<320x512xf32>, vector<16x512xf32> -> vector<16x512xf32>
    %c0_69 = arith.constant 0 : index
    %c1_70 = arith.constant 1 : index
    %c0_71 = arith.constant 0 : index
    %59 = vector.load %arg17[%c0_69, %c1_70, %c0_71] : memref<2x10x320xf32, #tpu.memory_space<vmem>>, vector<2x8x320xf32>
    %60 = vector.shape_cast %59 : vector<2x8x320xf32> to vector<16x320xf32>
    %c1_72 = arith.constant 1 : index
    %c0_73 = arith.constant 0 : index
    %c0_74 = arith.constant 0 : index
    %61 = vector.load %arg5[%c1_72, %c0_73, %c0_74] : memref<3x320x512xf32, #tpu.memory_space<vmem>>, vector<1x320x512xf32>
    %62 = vector.shape_cast %61 : vector<1x320x512xf32> to vector<320x512xf32>
    %cst_75 = arith.constant dense<0.000000e+00> : vector<16x512xf32>
    %63 = tpu.matmul %60, %62, %cst_75 {dimension_numbers = #tpu.dot_dimension_numbers<[1], [0], [0], [1], [0, 0, 1, 1], [], []>} : vector<16x320xf32>, vector<320x512xf32>, vector<16x512xf32> -> vector<16x512xf32>
    %64 = arith.addf %58, %63 : vector<16x512xf32>
    %c0_76 = arith.constant 0 : index
    %c2_77 = arith.constant 2 : index
    %c0_78 = arith.constant 0 : index
    %65 = vector.load %arg17[%c0_76, %c2_77, %c0_78] : memref<2x10x320xf32, #tpu.memory_space<vmem>>, vector<2x8x320xf32>
    %66 = vector.shape_cast %65 : vector<2x8x320xf32> to vector<16x320xf32>
    %c2_79 = arith.constant 2 : index
    %c0_80 = arith.constant 0 : index
    %c0_81 = arith.constant 0 : index
    %67 = vector.load %arg5[%c2_79, %c0_80, %c0_81] : memref<3x320x512xf32, #tpu.memory_space<vmem>>, vector<1x320x512xf32>
    %68 = vector.shape_cast %67 : vector<1x320x512xf32> to vector<320x512xf32>
    %cst_82 = arith.constant dense<0.000000e+00> : vector<16x512xf32>
    %69 = tpu.matmul %66, %68, %cst_82 {dimension_numbers = #tpu.dot_dimension_numbers<[1], [0], [0], [1], [0, 0, 1, 1], [], []>} : vector<16x320xf32>, vector<320x512xf32>, vector<16x512xf32> -> vector<16x512xf32>
    %70 = arith.addf %64, %69 : vector<16x512xf32>
    %c0_83 = arith.constant 0 : index
    %c0_84 = arith.constant 0 : index
    %71 = vector.load %arg6[%c0_83, %c0_84] : memref<1x512xf32, #tpu.memory_space<vmem>>, vector<1x512xf32>
    %72 = vector.broadcast %71 : vector<1x512xf32> to vector<16x512xf32>
    %73 = arith.addf %70, %72 : vector<16x512xf32>
    %cst_85 = arith.constant 0.000000e+00 : f32
    %74 = vector.broadcast %cst_85 : f32 to vector<16x512xf32>
    %75 = arith.maximumf %73, %74 : vector<16x512xf32>
    %76 = vector.shape_cast %75 : vector<16x512xf32> to vector<2x8x512xf32>
    %77 = vector.extract_strided_slice %76 {offsets = [0, 0, 0], sizes = [2, 1, 512], strides = [1, 1, 1]} : vector<2x8x512xf32> to vector<2x1x512xf32>
    %78 = vector.shape_cast %77 : vector<2x1x512xf32> to vector<2x512xf32>
    %c0_86 = arith.constant 0 : index
    %c0_87 = arith.constant 0 : index
    %c0_88 = arith.constant 0 : index
    %79 = vector.load %arg7[%c0_86, %c0_87, %c0_88] : memref<8x512x128xf32, #tpu.memory_space<vmem>>, vector<1x512x128xf32>
    %80 = vector.shape_cast %79 : vector<1x512x128xf32> to vector<512x128xf32>
    %cst_89 = arith.constant dense<0.000000e+00> : vector<2x128xf32>
    %81 = tpu.matmul %78, %80, %cst_89 {dimension_numbers = #tpu.dot_dimension_numbers<[1], [0], [0], [1], [0, 0, 1, 1], [], []>} : vector<2x512xf32>, vector<512x128xf32>, vector<2x128xf32> -> vector<2x128xf32>
    %82 = vector.extract_strided_slice %76 {offsets = [0, 1, 0], sizes = [2, 1, 512], strides = [1, 1, 1]} : vector<2x8x512xf32> to vector<2x1x512xf32>
    %83 = vector.shape_cast %82 : vector<2x1x512xf32> to vector<2x512xf32>
    %c1_90 = arith.constant 1 : index
    %c0_91 = arith.constant 0 : index
    %c0_92 = arith.constant 0 : index
    %84 = vector.load %arg7[%c1_90, %c0_91, %c0_92] : memref<8x512x128xf32, #tpu.memory_space<vmem>>, vector<1x512x128xf32>
    %85 = vector.shape_cast %84 : vector<1x512x128xf32> to vector<512x128xf32>
    %cst_93 = arith.constant dense<0.000000e+00> : vector<2x128xf32>
    %86 = tpu.matmul %83, %85, %cst_93 {dimension_numbers = #tpu.dot_dimension_numbers<[1], [0], [0], [1], [0, 0, 1, 1], [], []>} : vector<2x512xf32>, vector<512x128xf32>, vector<2x128xf32> -> vector<2x128xf32>
    %87 = arith.addf %81, %86 : vector<2x128xf32>
    %88 = vector.extract_strided_slice %76 {offsets = [0, 2, 0], sizes = [2, 1, 512], strides = [1, 1, 1]} : vector<2x8x512xf32> to vector<2x1x512xf32>
    %89 = vector.shape_cast %88 : vector<2x1x512xf32> to vector<2x512xf32>
    %c2_94 = arith.constant 2 : index
    %c0_95 = arith.constant 0 : index
    %c0_96 = arith.constant 0 : index
    %90 = vector.load %arg7[%c2_94, %c0_95, %c0_96] : memref<8x512x128xf32, #tpu.memory_space<vmem>>, vector<1x512x128xf32>
    %91 = vector.shape_cast %90 : vector<1x512x128xf32> to vector<512x128xf32>
    %cst_97 = arith.constant dense<0.000000e+00> : vector<2x128xf32>
    %92 = tpu.matmul %89, %91, %cst_97 {dimension_numbers = #tpu.dot_dimension_numbers<[1], [0], [0], [1], [0, 0, 1, 1], [], []>} : vector<2x512xf32>, vector<512x128xf32>, vector<2x128xf32> -> vector<2x128xf32>
    %93 = arith.addf %87, %92 : vector<2x128xf32>
    %94 = vector.extract_strided_slice %76 {offsets = [0, 3, 0], sizes = [2, 1, 512], strides = [1, 1, 1]} : vector<2x8x512xf32> to vector<2x1x512xf32>
    %95 = vector.shape_cast %94 : vector<2x1x512xf32> to vector<2x512xf32>
    %c3 = arith.constant 3 : index
    %c0_98 = arith.constant 0 : index
    %c0_99 = arith.constant 0 : index
    %96 = vector.load %arg7[%c3, %c0_98, %c0_99] : memref<8x512x128xf32, #tpu.memory_space<vmem>>, vector<1x512x128xf32>
    %97 = vector.shape_cast %96 : vector<1x512x128xf32> to vector<512x128xf32>
    %cst_100 = arith.constant dense<0.000000e+00> : vector<2x128xf32>
    %98 = tpu.matmul %95, %97, %cst_100 {dimension_numbers = #tpu.dot_dimension_numbers<[1], [0], [0], [1], [0, 0, 1, 1], [], []>} : vector<2x512xf32>, vector<512x128xf32>, vector<2x128xf32> -> vector<2x128xf32>
    %99 = arith.addf %93, %98 : vector<2x128xf32>
    %100 = vector.extract_strided_slice %76 {offsets = [0, 4, 0], sizes = [2, 1, 512], strides = [1, 1, 1]} : vector<2x8x512xf32> to vector<2x1x512xf32>
    %101 = vector.shape_cast %100 : vector<2x1x512xf32> to vector<2x512xf32>
    %c4_101 = arith.constant 4 : index
    %c0_102 = arith.constant 0 : index
    %c0_103 = arith.constant 0 : index
    %102 = vector.load %arg7[%c4_101, %c0_102, %c0_103] : memref<8x512x128xf32, #tpu.memory_space<vmem>>, vector<1x512x128xf32>
    %103 = vector.shape_cast %102 : vector<1x512x128xf32> to vector<512x128xf32>
    %cst_104 = arith.constant dense<0.000000e+00> : vector<2x128xf32>
    %104 = tpu.matmul %101, %103, %cst_104 {dimension_numbers = #tpu.dot_dimension_numbers<[1], [0], [0], [1], [0, 0, 1, 1], [], []>} : vector<2x512xf32>, vector<512x128xf32>, vector<2x128xf32> -> vector<2x128xf32>
    %105 = arith.addf %99, %104 : vector<2x128xf32>
    %106 = vector.extract_strided_slice %76 {offsets = [0, 5, 0], sizes = [2, 1, 512], strides = [1, 1, 1]} : vector<2x8x512xf32> to vector<2x1x512xf32>
    %107 = vector.shape_cast %106 : vector<2x1x512xf32> to vector<2x512xf32>
    %c5 = arith.constant 5 : index
    %c0_105 = arith.constant 0 : index
    %c0_106 = arith.constant 0 : index
    %108 = vector.load %arg7[%c5, %c0_105, %c0_106] : memref<8x512x128xf32, #tpu.memory_space<vmem>>, vector<1x512x128xf32>
    %109 = vector.shape_cast %108 : vector<1x512x128xf32> to vector<512x128xf32>
    %cst_107 = arith.constant dense<0.000000e+00> : vector<2x128xf32>
    %110 = tpu.matmul %107, %109, %cst_107 {dimension_numbers = #tpu.dot_dimension_numbers<[1], [0], [0], [1], [0, 0, 1, 1], [], []>} : vector<2x512xf32>, vector<512x128xf32>, vector<2x128xf32> -> vector<2x128xf32>
    %111 = arith.addf %105, %110 : vector<2x128xf32>
    %112 = vector.extract_strided_slice %76 {offsets = [0, 6, 0], sizes = [2, 1, 512], strides = [1, 1, 1]} : vector<2x8x512xf32> to vector<2x1x512xf32>
    %113 = vector.shape_cast %112 : vector<2x1x512xf32> to vector<2x512xf32>
    %c6 = arith.constant 6 : index
    %c0_108 = arith.constant 0 : index
    %c0_109 = arith.constant 0 : index
    %114 = vector.load %arg7[%c6, %c0_108, %c0_109] : memref<8x512x128xf32, #tpu.memory_space<vmem>>, vector<1x512x128xf32>
    %115 = vector.shape_cast %114 : vector<1x512x128xf32> to vector<512x128xf32>
    %cst_110 = arith.constant dense<0.000000e+00> : vector<2x128xf32>
    %116 = tpu.matmul %113, %115, %cst_110 {dimension_numbers = #tpu.dot_dimension_numbers<[1], [0], [0], [1], [0, 0, 1, 1], [], []>} : vector<2x512xf32>, vector<512x128xf32>, vector<2x128xf32> -> vector<2x128xf32>
    %117 = arith.addf %111, %116 : vector<2x128xf32>
    %118 = vector.extract_strided_slice %76 {offsets = [0, 7, 0], sizes = [2, 1, 512], strides = [1, 1, 1]} : vector<2x8x512xf32> to vector<2x1x512xf32>
    %119 = vector.shape_cast %118 : vector<2x1x512xf32> to vector<2x512xf32>
    %c7 = arith.constant 7 : index
    %c0_111 = arith.constant 0 : index
    %c0_112 = arith.constant 0 : index
    %120 = vector.load %arg7[%c7, %c0_111, %c0_112] : memref<8x512x128xf32, #tpu.memory_space<vmem>>, vector<1x512x128xf32>
    %121 = vector.shape_cast %120 : vector<1x512x128xf32> to vector<512x128xf32>
    %cst_113 = arith.constant dense<0.000000e+00> : vector<2x128xf32>
    %122 = tpu.matmul %119, %121, %cst_113 {dimension_numbers = #tpu.dot_dimension_numbers<[1], [0], [0], [1], [0, 0, 1, 1], [], []>} : vector<2x512xf32>, vector<512x128xf32>, vector<2x128xf32> -> vector<2x128xf32>
    %123 = arith.addf %117, %122 : vector<2x128xf32>
    %c0_114 = arith.constant 0 : index
    %c0_115 = arith.constant 0 : index
    %124 = vector.load %arg8[%c0_114, %c0_115] : memref<1x128xf32, #tpu.memory_space<vmem>>, vector<1x128xf32>
    %125 = vector.broadcast %124 : vector<1x128xf32> to vector<2x128xf32>
    %126 = arith.addf %123, %125 : vector<2x128xf32>
    %cst_116 = arith.constant 0.000000e+00 : f32
    %127 = vector.broadcast %cst_116 : f32 to vector<2x128xf32>
    %128 = arith.maximumf %126, %127 : vector<2x128xf32>
    %c0_117 = arith.constant 0 : index
    %c0_118 = arith.constant 0 : index
    %129 = vector.load %arg9[%c0_117, %c0_118] : memref<128x64xf32, #tpu.memory_space<vmem>>, vector<128x64xf32>
    %cst_119 = arith.constant dense<0.000000e+00> : vector<2x64xf32>
    %130 = tpu.matmul %128, %129, %cst_119 {dimension_numbers = #tpu.dot_dimension_numbers<[1], [0], [0], [1], [0, 0, 1, 1], [], []>} : vector<2x128xf32>, vector<128x64xf32>, vector<2x64xf32> -> vector<2x64xf32>
    %c0_120 = arith.constant 0 : index
    %c0_121 = arith.constant 0 : index
    %131 = vector.load %arg10[%c0_120, %c0_121] : memref<1x64xf32, #tpu.memory_space<vmem>>, vector<1x64xf32>
    %132 = vector.broadcast %131 : vector<1x64xf32> to vector<2x64xf32>
    %133 = arith.addf %130, %132 : vector<2x64xf32>
    %cst_122 = arith.constant 0.000000e+00 : f32
    %134 = vector.broadcast %cst_122 : f32 to vector<2x64xf32>
    %135 = arith.maximumf %133, %134 : vector<2x64xf32>
    %c0_123 = arith.constant 0 : index
    %c0_124 = arith.constant 0 : index
    %136 = vector.load %arg11[%c0_123, %c0_124] : memref<64x64xf32, #tpu.memory_space<vmem>>, vector<64x64xf32>
    %cst_125 = arith.constant dense<0.000000e+00> : vector<2x64xf32>
    %137 = tpu.matmul %135, %136, %cst_125 {dimension_numbers = #tpu.dot_dimension_numbers<[1], [0], [0], [1], [0, 0, 1, 1], [], []>} : vector<2x64xf32>, vector<64x64xf32>, vector<2x64xf32> -> vector<2x64xf32>
    %c0_126 = arith.constant 0 : index
    %c0_127 = arith.constant 0 : index
    %138 = vector.load %arg12[%c0_126, %c0_127] : memref<1x64xf32, #tpu.memory_space<vmem>>, vector<1x64xf32>
    %139 = vector.broadcast %138 : vector<1x64xf32> to vector<2x64xf32>
    %140 = arith.addf %137, %139 : vector<2x64xf32>
    %cst_128 = arith.constant 0.000000e+00 : f32
    %141 = vector.broadcast %cst_128 : f32 to vector<2x64xf32>
    %142 = arith.maximumf %140, %141 : vector<2x64xf32>
    %c0_129 = arith.constant 0 : index
    %c0_130 = arith.constant 0 : index
    %143 = vector.load %arg13[%c0_129, %c0_130] : memref<64x7xf32, #tpu.memory_space<vmem>>, vector<64x7xf32>
    %cst_131 = arith.constant dense<0.000000e+00> : vector<2x7xf32>
    %144 = tpu.matmul %142, %143, %cst_131 {dimension_numbers = #tpu.dot_dimension_numbers<[1], [0], [0], [1], [0, 0, 1, 1], [], []>} : vector<2x64xf32>, vector<64x7xf32>, vector<2x7xf32> -> vector<2x7xf32>
    %c0_132 = arith.constant 0 : index
    %c0_133 = arith.constant 0 : index
    %145 = vector.load %arg14[%c0_132, %c0_133] : memref<1x7xf32, #tpu.memory_space<vmem>>, vector<1x7xf32>
    %146 = vector.broadcast %145 : vector<1x7xf32> to vector<2x7xf32>
    %147 = arith.addf %144, %146 : vector<2x7xf32>
    %148 = vector.extract_strided_slice %147 {offsets = [0, 0], sizes = [2, 1], strides = [1, 1]} : vector<2x7xf32> to vector<2x1xf32>
    %149 = vector.extract_strided_slice %147 {offsets = [0, 1], sizes = [2, 6], strides = [1, 1]} : vector<2x7xf32> to vector<2x6xf32>
    %150 = vector.broadcast %148 : vector<2x1xf32> to vector<2x6xf32>
    %151 = arith.addf %150, %149 : vector<2x6xf32>
    %cst_134 = arith.constant dense<0.000000e+00> : vector<2xf32>
    %152 = vector.multi_reduction <add>, %149, %cst_134 [1] : vector<2x6xf32> to vector<2xf32>
    %153 = vector.shape_cast %152 : vector<2xf32> to vector<2x1xf32>
    %cst_135 = arith.constant 6.000000e+00 : f32
    %154 = vector.broadcast %cst_135 : f32 to vector<2x1xf32>
    %155 = arith.divf %153, %154 : vector<2x1xf32>
    %156 = vector.broadcast %155 : vector<2x1xf32> to vector<2x6xf32>
    %157 = arith.subf %151, %156 : vector<2x6xf32>
    %c0_136 = arith.constant 0 : index
    %c0_137 = arith.constant 0 : index
    %158 = vector.load %arg15[%c0_136, %c0_137] : memref<2x6xf32, #tpu.memory_space<vmem>>, vector<2x6xf32>
    tpu.vector_store %arg15[%c0_136, %c0_137], %157 {strides = array<i32>} : memref<2x6xf32, #tpu.memory_space<vmem>>, vector<2x6xf32>,
    return
  }
}

</mosaic_0001>

<bundles_post_ra>
// kernel: dueling_forward.1
= control target key start
LH: loop header
LB: loop body
LE: loop exit
PB: predicated region body
PF: predicated region fallthrough
CT: control target
= control target key end

     0   :  { %20 = vsyncpa [#allocation5], 0  ;;  %s8363_s0 = inlined_call_operand.vmem [shape: f32[2,8,32], index: 0, kind: input, shape index: {}]   ;;  %s8364_s1 = inlined_call_operand.hbm [shape: f32[3,40,256], index: 1, kind: input, shape index: {}]   ;;  %s8365_s2 = inlined_call_operand.hbm [shape: f32[1,256], index: 2, kind: input, shape index: {}]   ;;  %s8366_s3 = inlined_call_operand.hbm [shape: f32[3,320,256], index: 3, kind: input, shape index: {}]   ;;  %s8367_s4 = inlined_call_operand.hbm [shape: f32[1,256], index: 4, kind: input, shape index: {}]   ;;  %s8368_s5 = inlined_call_operand.hbm [shape: f32[3,320,512], index: 5, kind: input, shape index: {}]   ;;  %s8369_s6 = inlined_call_operand.hbm [shape: f32[1,512], index: 6, kind: input, shape index: {}]   ;;  %s8370_s7 = inlined_call_operand.hbm [shape: f32[8,512,128], index: 7, kind: input, shape index: {}]   ;;  %s8371_s8 = inlined_call_operand.hbm [shape: f32[1,128], index: 8, kind: input, shape index: {}]   ;;  %s8372_s9 = inlined_call_operand.vmem [shape: f32[128,64], index: 9, kind: input, shape index: {}]   ;;  %s8373_s10 = inlined_call_operand.hbm [shape: f32[1,64], index: 10, kind: input, shape index: {}]   ;;  %s8374_s11 = inlined_call_operand.hbm [shape: f32[64,64], index: 11, kind: input, shape index: {}]   ;;  %s8375_s12 = inlined_call_operand.hbm [shape: f32[1,64], index: 12, kind: input, shape index: {}]   ;;  %s8376_s13 = inlined_call_operand.vmem [shape: f32[64,7], index: 13, kind: input, shape index: {}]   ;;  %s8377_s14 = inlined_call_operand.hbm [shape: f32[1,7], index: 14, kind: input, shape index: {}]   ;;  %s8378_s15 = inlined_call_operand.hbm [shape: f32[2,6], index: 15, kind: output, shape index: {}]  }
   0x1   :  { %21 = vsyncpa [#allocation8], 0 }
   0x2   :  { %22 = vsyncpa [#allocation11], 0 }
   0x3   :  { %23 = vsyncpa [#allocation14], 0 }
   0x4   :  { %24 = vsyncpa [#allocation17], 0 }
   0x5   :  { %25 = vsyncpa [#allocation20], 0 }
   0x6   :  { %26 = vsyncpa [#allocation23], 0 }
   0x7   :  { %27 = vsyncpa [#allocation6], 0  ;;  %s7521_s18 = smov [#allocation7]   ;;  %s7522_s20 = smov [#allocation10]  }
   0x8   :  { %s48_s19 = sshll.u32 %s7521_s18, 4  ;;  %s70_s21 = sshll.u32 %s7522_s20, 4  ;;  %s49_s19 = int_to_ptr.vmem [resolvable:$true] %s48_s19  ;;  %s71_s21 = int_to_ptr.vmem [resolvable:$true] %s70_s21 }
   0x9   :  { %s7219_s24 = scalar_lea.hbm %s8365_s2, 32 }
   0xa   :  { %p7220_p0 = scmp.ne.s32.totalorder %s8365_s2, %s7219_s24  ;;  %p7223_p1 = scmp.lt.u32.totalorder %s7219_s24, %s8365_s2 }
   0xc   :  { %p7225_p2 = pnand %p7223_p1, %p7220_p0 }
   0xe   :  { %7228 = shalt.err (!%p7225_p2)
}
   0xf   :  { %s7229_s29 = scalar_lea.vmem %s49_s19, 32  ;;  %p7234_p4 = scmp.lt.s32.totalorder %s49_s19, %s49_s19 }
  0x10   :  { %p7230_p3 = scmp.ne.s32.totalorder %s49_s19, %s7229_s29  ;;  %p7235_p5 = scmp.lt.s32.totalorder %s7229_s29, %s7229_s29 }
  0x12   :  { %p7236_p6 = por %p7235_p5, %p7234_p4 }
  0x14   :  { %p7237_p7 = pnand %p7236_p6, %p7230_p3 }
  0x16   :  { %7240 = shalt.err (!%p7237_p7)
}
  0x17   :  { %51 = dma.hbm_to_vmem [thread:$0]  %s8365_s2, 32, %s49_s19, [#allocation8]  }
  0x18   :  { %s7241_s20 = scalar_lea.hbm %s8367_s4, 32 }
  0x19   :  { %p7242_p8 = scmp.ne.s32.totalorder %s8367_s4, %s7241_s20  ;;  %p7245_p9 = scmp.lt.u32.totalorder %s7241_s20, %s8367_s4 }
  0x1b   :  { %p7247_p10 = pnand %p7245_p9, %p7242_p8 }
  0x1d   :  { %7250 = shalt.err (!%p7247_p10)
}
  0x1e   :  { %s7251_s26 = scalar_lea.vmem %s71_s21, 32  ;;  %p7256_p12 = scmp.lt.s32.totalorder %s71_s21, %s71_s21 }
  0x1f   :  { %p7252_p11 = scmp.ne.s32.totalorder %s71_s21, %s7251_s26  ;;  %p7257_p13 = scmp.lt.s32.totalorder %s7251_s26, %s7251_s26 }
  0x21   :  { %p7258_p0 = por %p7257_p13, %p7256_p12 }
  0x23   :  { %p7259_p1 = pnand %p7258_p0, %p7252_p11 }
  0x25   :  { %7262 = shalt.err (!%p7259_p1)
}
  0x26   :  { %73 = dma.hbm_to_vmem [thread:$0]  %s8367_s4, 32, %s71_s21, [#allocation11]  }
  0x27   :  { %s7523_s27 = smov [#allocation13]   ;;  %s7524_s29 = smov [#allocation16]  }
  0x28   :  { %s92_s28 = sshll.u32 %s7523_s27, 4  ;;  %s114_s30 = sshll.u32 %s7524_s29, 4  ;;  %s93_s28 = int_to_ptr.vmem [resolvable:$true] %s92_s28  ;;  %s115_s30 = int_to_ptr.vmem [resolvable:$true] %s114_s30 }
  0x29   :  { %s7263_s18 = scalar_lea.hbm %s8369_s6, 64 }
  0x2a   :  { %p7264_p2 = scmp.ne.s32.totalorder %s8369_s6, %s7263_s18  ;;  %p7267_p3 = scmp.lt.u32.totalorder %s7263_s18, %s8369_s6 }
  0x2c   :  { %p7269_p4 = pnand %p7267_p3, %p7264_p2 }
  0x2e   :  { %7272 = shalt.err (!%p7269_p4)
}
  0x2f   :  { %s7273_s4 = scalar_lea.vmem %s93_s28, 64  ;;  %p7278_p6 = scmp.lt.s32.totalorder %s93_s28, %s93_s28 }
  0x30   :  { %p7274_p5 = scmp.ne.s32.totalorder %s93_s28, %s7273_s4  ;;  %p7279_p7 = scmp.lt.s32.totalorder %s7273_s4, %s7273_s4 }
  0x32   :  { %p7280_p8 = por %p7279_p7, %p7278_p6 }
  0x34   :  { %p7281_p9 = pnand %p7280_p8, %p7274_p5 }
  0x36   :  { %7284 = shalt.err (!%p7281_p9)
}
  0x37   :  { %95 = dma.hbm_to_vmem [thread:$0]  %s8369_s6, 64, %s93_s28, [#allocation14]  }
  0x38   :  { %s7285_s19 = scalar_lea.hbm %s8371_s8, 16 }
  0x39   :  { %p7286_p10 = scmp.ne.s32.totalorder %s8371_s8, %s7285_s19  ;;  %p7289_p11 = scmp.lt.u32.totalorder %s7285_s19, %s8371_s8 }
  0x3b   :  { %p7291_p12 = pnand %p7289_p11, %p7286_p10 }
  0x3d   :  { %7294 = shalt.err (!%p7291_p12)
}
  0x3e   :  { %s7295_s18 = scalar_lea.vmem %s115_s30, 16  ;;  %s7299_s20 = scalar_lea.vmem %s115_s30, 32 }
  0x3f   :  { %p7296_p13 = scmp.ne.s32.totalorder %s115_s30, %s7295_s18  ;;  %p7300_p0 = scmp.lt.s32.totalorder %s115_s30, %s115_s30 }
  0x40   :  { %p7301_p1 = scmp.lt.s32.totalorder %s7299_s20, %s7295_s18 }
  0x42   :  { %p7302_p2 = por %p7301_p1, %p7300_p0 }
  0x44   :  { %p7303_p3 = pnand %p7302_p2, %p7296_p13 }
  0x46   :  { %7306 = shalt.err (!%p7303_p3)
}
  0x47   :  { %117 = dma.hbm_to_vmem [thread:$0]  %s8371_s8, 16, %s115_s30, [#allocation17]  }
  0x48   :  { %s7525_s22 = smov [#allocation19]   ;;  %s7526_s24 = smov [#allocation4]  }
  0x49   :  { %s135_s23 = sshll.u32 %s7525_s22, 4  ;;  %s35_s4 = sshll.u32 %s7526_s24, 4  ;;  %s136_s23 = int_to_ptr.vmem [resolvable:$true] %s135_s23  ;;  %s7674_s4 = int_to_ptr.vmem [resolvable:$true] %s35_s4 }
  0x4a   :  { %s7307_s26 = scalar_lea.hbm %s8374_s11, 1024 }
  0x4b   :  { %p7308_p4 = scmp.ne.s32.totalorder %s8374_s11, %s7307_s26  ;;  %p7311_p5 = scmp.lt.u32.totalorder %s7307_s26, %s8374_s11 }
  0x4d   :  { %p7313_p6 = pnand %p7311_p5, %p7308_p4 }
  0x4f   :  { %7316 = shalt.err (!%p7313_p6)
}
  0x50   :  { %s7317_s8 = scalar_lea.vmem %s136_s23, 1024  ;;  %p7322_p8 = scmp.lt.s32.totalorder %s136_s23, %s136_s23 }
  0x51   :  { %p7318_p7 = scmp.ne.s32.totalorder %s136_s23, %s7317_s8  ;;  %p7323_p9 = scmp.lt.s32.totalorder %s7317_s8, %s7317_s8 }
  0x53   :  { %p7324_p10 = por %p7323_p9, %p7322_p8 }
  0x55   :  { %p7325_p11 = pnand %p7324_p10, %p7318_p7 }
  0x57   :  { %7328 = shalt.err (!%p7325_p11)
}
  0x58   :  { %s7527_s30 = smov 128   ;;  %s7528_s16 = smov 8  }
  0x59   :  { %141 = dma.hbm_to_vmem [thread:$0]  %s8374_s11, 1024, %s136_s23, [#allocation20], %s7527_s30, %s7527_s30, %s7528_s16  }
  0x5a   :  { %s7329_s28 = scalar_lea.hbm %s8364_s1, 3840 }
  0x5b   :  { %p7330_p12 = scmp.ne.s32.totalorder %s8364_s1, %s7329_s28  ;;  %p7333_p13 = scmp.lt.u32.totalorder %s7329_s28, %s8364_s1 }
  0x5d   :  { %p7335_p0 = pnand %p7333_p13, %p7330_p12 }
  0x5f   :  { %7338 = shalt.err (!%p7335_p0)
}
  0x60   :  { %s7339_s26 = scalar_lea.vmem %s7674_s4, 3840  ;;  %p7344_p2 = scmp.lt.s32.totalorder %s7674_s4, %s7674_s4 }
  0x61   :  { %p7340_p1 = scmp.ne.s32.totalorder %s7674_s4, %s7339_s26  ;;  %p7345_p3 = scmp.lt.s32.totalorder %s7339_s26, %s7339_s26 }
  0x63   :  { %p7346_p4 = por %p7345_p3, %p7344_p2 }
  0x65   :  { %p7347_p5 = pnand %p7346_p4, %p7340_p1 }
  0x67   :  { %7350 = shalt.err (!%p7347_p5)
}
  0x68   :  { %s7529_s11 = smov 256   ;;  %s7530_s23 = smov 16  }
  0x69   :  { %41 = dma.hbm_to_vmem [thread:$0]  %s8364_s1, 3840, %s7674_s4, [#allocation5], %s7529_s11, %s7529_s11, %s7530_s23  }
  0x6a   :  { %s7531_s27 = smov [#allocation9]   ;;  %s7532_s8 = smov [#allocation12]  }
  0x6b   :  { %s57_s29 = sshll.u32 %s7531_s27, 4  ;;  %s79_s17 = sshll.u32 %s7532_s8, 4  ;;  %s58_s29 = int_to_ptr.vmem [resolvable:$true] %s57_s29  ;;  %s7708_s17 = int_to_ptr.vmem [resolvable:$true] %s79_s17 }
  0x6c   :  { %s7351_s6 = scalar_lea.hbm %s8366_s3, 30720 }
  0x6d   :  { %p7352_p6 = scmp.ne.s32.totalorder %s8366_s3, %s7351_s6  ;;  %p7355_p7 = scmp.lt.u32.totalorder %s7351_s6, %s8366_s3 }
  0x6f   :  { %p7357_p8 = pnand %p7355_p7, %p7352_p6 }
  0x71   :  { %7360 = shalt.err (!%p7357_p8)
}
  0x72   :  { %s7361_s1 = scalar_lea.vmem %s58_s29, 30720  ;;  %p7366_p10 = scmp.lt.s32.totalorder %s58_s29, %s58_s29 }
  0x73   :  { %p7362_p9 = scmp.ne.s32.totalorder %s58_s29, %s7361_s1  ;;  %p7367_p11 = scmp.lt.s32.totalorder %s7361_s1, %s7361_s1 }
  0x75   :  { %p7368_p12 = por %p7367_p11, %p7366_p10 }
  0x77   :  { %p7369_p13 = pnand %p7368_p12, %p7362_p9 }
  0x79   :  { %7372 = shalt.err (!%p7369_p13)
}
  0x7a   :  { %63 = dma.hbm_to_vmem [thread:$0]  %s8366_s3, 30720, %s58_s29, [#allocation8], %s7529_s11, %s7529_s11, %s7530_s23  }
  0x7b   :  { %s7373_s19 = scalar_lea.hbm %s8368_s5, 61440 }
  0x7c   :  { %p7374_p0 = scmp.ne.s32.totalorder %s8368_s5, %s7373_s19  ;;  %p7377_p1 = scmp.lt.u32.totalorder %s7373_s19, %s8368_s5 }
  0x7e   :  { %p7379_p2 = pnand %p7377_p1, %p7374_p0 }
  0x80   :  { %7382 = shalt.err (!%p7379_p2)
}
  0x81   :  { %s7383_s6 = scalar_lea.vmem %s7708_s17, 61440  ;;  %p7388_p4 = scmp.lt.s32.totalorder %s7708_s17, %s7708_s17 }
  0x82   :  { %p7384_p3 = scmp.ne.s32.totalorder %s7708_s17, %s7383_s6  ;;  %p7389_p5 = scmp.lt.s32.totalorder %s7383_s6, %s7383_s6 }
  0x84   :  { %p7390_p6 = por %p7389_p5, %p7388_p4 }
  0x86   :  { %p7391_p7 = pnand %p7390_p6, %p7384_p3 }
  0x88   :  { %7394 = shalt.err (!%p7391_p7)
}
  0x89   :  { %s7533_s3 = smov 512   ;;  %s7534_s11 = smov 32  }
  0x8a   :  { %85 = dma.hbm_to_vmem [thread:$0]  %s8368_s5, 61440, %s7708_s17, [#allocation11], %s7533_s3, %s7533_s3, %s7534_s11  }
  0x8b   :  { %s7535_s28 = smov [#allocation15]   ;;  %s7536_s24 = smov [#allocation18]  }
  0x8c   :  { %s101_s22 = sshll.u32 %s7535_s28, 4  ;;  %s126_s21 = sshll.u32 %s7536_s24, 4  ;;  %s102_s22 = int_to_ptr.vmem [resolvable:$true] %s101_s22  ;;  %s127_s21 = int_to_ptr.vmem [resolvable:$true] %s126_s21 }
  0x8d   :  { %s7395_s25 = scalar_lea.hbm %s8370_s7, 65536 }
  0x8e   :  { %p7396_p8 = scmp.ne.s32.totalorder %s8370_s7, %s7395_s25  ;;  %p7399_p9 = scmp.lt.u32.totalorder %s7395_s25, %s8370_s7 }
  0x90   :  { %p7401_p10 = pnand %p7399_p9, %p7396_p8 }
  0x92   :  { %7404 = shalt.err (!%p7401_p10)
}
  0x93   :  { %s7405_s5 = scalar_lea.vmem %s102_s22, 65536  ;;  %p7410_p12 = scmp.lt.s32.totalorder %s102_s22, %s102_s22 }
  0x94   :  { %p7406_p11 = scmp.ne.s32.totalorder %s102_s22, %s7405_s5  ;;  %p7411_p13 = scmp.lt.s32.totalorder %s7405_s5, %s7405_s5 }
  0x96   :  { %p7412_p0 = por %p7411_p13, %p7410_p12 }
  0x98   :  { %p7413_p1 = pnand %p7412_p0, %p7406_p11 }
  0x9a   :  { %7416 = shalt.err (!%p7413_p1)
}
  0x9b   :  { %107 = dma.hbm_to_vmem [thread:$0]  %s8370_s7, 65536, %s102_s22, [#allocation14], %s7527_s30, %s7527_s30, %s7528_s16  }
  0x9c   :  { %s7417_s6 = scalar_lea.hbm %s8373_s10, 16 }
  0x9d   :  { %p7418_p2 = scmp.ne.s32.totalorder %s8373_s10, %s7417_s6  ;;  %p7421_p3 = scmp.lt.u32.totalorder %s7417_s6, %s8373_s10 }
  0x9f   :  { %p7423_p4 = pnand %p7421_p3, %p7418_p2 }
  0xa1   :  { %7426 = shalt.err (!%p7423_p4)
}
  0xa2   :  { %s7427_s24 = scalar_lea.vmem %s127_s21, 16  ;;  %s7431_s1 = scalar_lea.vmem %s127_s21, 32 }
  0xa3   :  { %p7428_p5 = scmp.ne.s32.totalorder %s127_s21, %s7427_s24  ;;  %p7432_p6 = scmp.lt.s32.totalorder %s127_s21, %s127_s21 }
  0xa4   :  { %p7433_p7 = scmp.lt.s32.totalorder %s7431_s1, %s7427_s24 }
  0xa6   :  { %p7434_p8 = por %p7433_p7, %p7432_p6 }
  0xa8   :  { %p7435_p9 = pnand %p7434_p8, %p7428_p5 }
  0xaa   :  { %7438 = shalt.err (!%p7435_p9)
}
  0xab   :  { %129 = dma.hbm_to_vmem [thread:$0]  %s8373_s10, 16, %s127_s21, [#allocation17]  }
  0xac   :  { %s7537_s16 = smov [#allocation21]   ;;  %s7538_s4 = smov [#allocation22]  }
  0xad   :  { %s148_s22 = sshll.u32 %s7537_s16, 4  ;;  %s160_s25 = sshll.u32 %s7538_s4, 4  ;;  %s149_s22 = int_to_ptr.vmem [resolvable:$true] %s148_s22  ;;  %s161_s25 = int_to_ptr.vmem [resolvable:$true] %s160_s25 }
  0xae   :  { %s7439_s19 = scalar_lea.hbm %s8375_s12, 16 }
  0xaf   :  { %p7440_p10 = scmp.ne.s32.totalorder %s8375_s12, %s7439_s19  ;;  %p7443_p11 = scmp.lt.u32.totalorder %s7439_s19, %s8375_s12 }
  0xb1   :  { %p7445_p12 = pnand %p7443_p11, %p7440_p10 }
  0xb3   :  { %7448 = shalt.err (!%p7445_p12)
}
  0xb4   :  { %s7449_s10 = scalar_lea.vmem %s149_s22, 16  ;;  %s7453_s21 = scalar_lea.vmem %s149_s22, 32 }
  0xb5   :  { %p7450_p13 = scmp.ne.s32.totalorder %s149_s22, %s7449_s10  ;;  %p7454_p0 = scmp.lt.s32.totalorder %s149_s22, %s149_s22 }
  0xb6   :  { %p7455_p1 = scmp.lt.s32.totalorder %s7453_s21, %s7449_s10 }
  0xb8   :  { %p7456_p2 = por %p7455_p1, %p7454_p0 }
  0xba   :  { %p7457_p3 = pnand %p7456_p2, %p7450_p13 }
  0xbc   :  { %7460 = shalt.err (!%p7457_p3)
}
  0xbd   :  { %151 = dma.hbm_to_vmem [thread:$0]  %s8375_s12, 16, %s149_s22, [#allocation20]  }
  0xbe   :  { %s7461_s23 = scalar_lea.hbm %s8377_s14, 16 }
  0xbf   :  { %p7462_p4 = scmp.ne.s32.totalorder %s8377_s14, %s7461_s23  ;;  %p7465_p5 = scmp.lt.u32.totalorder %s7461_s23, %s8377_s14 }
  0xc1   :  { %p7467_p6 = pnand %p7465_p5, %p7462_p4 }
  0xc3   :  { %7470 = shalt.err (!%p7467_p6)
}
  0xc4   :  { %s7471_s7 = scalar_lea.vmem %s161_s25, 16  ;;  %s7475_s30 = scalar_lea.vmem %s161_s25, 32 }
  0xc5   :  { %p7472_p7 = scmp.ne.s32.totalorder %s161_s25, %s7471_s7  ;;  %p7476_p8 = scmp.lt.s32.totalorder %s161_s25, %s161_s25 }
  0xc6   :  { %p7477_p9 = scmp.lt.s32.totalorder %s7475_s30, %s7471_s7 }
  0xc8   :  { %p7478_p10 = por %p7477_p9, %p7476_p8 }
  0xca   :  { %p7479_p11 = pnand %p7478_p10, %p7472_p7 }
  0xcc   :  { %7482 = shalt.err (!%p7479_p11)
}
  0xcd   :  { %163 = dma.hbm_to_vmem [thread:$0]  %s8377_s14, 16, %s161_s25, [#allocation23]  }
  0xce   :  { %7505 = dma.done.wait [#allocation5], 3840  }
  0xcf   :  { %7506 = vsyncadd [#allocation5], 4294963456 }
  0xd0   :  { %7507 = dma.done.wait [#allocation8], 30752  }
  0xd1   :  { %7508 = vsyncadd [#allocation8], 4294936544 }
  0xd2   :  { %7509 = dma.done.wait [#allocation11], 61472  }
  0xd3   :  { %7510 = vsyncadd [#allocation11], 4294905824 }
  0xd4   :  { %7511 = dma.done.wait [#allocation14], 65600  }
  0xd5   :  { %7512 = vsyncadd [#allocation14], 4294901696 }
  0xd6   :  { %7513 = dma.done.wait [#allocation17], 32  }
  0xd7   :  { %7514 = vsyncadd [#allocation17], 4294967264 }
  0xd8   :  { %7515 = dma.done.wait [#allocation20], 1040  }
  0xd9   :  { %7516 = vsyncadd [#allocation20], 4294966256 }
  0xda   :  { %7517 = dma.done.wait [#allocation23], 16  }
  0xdb   :  { %7518 = vsyncadd [#allocation23], 4294967280  ;;  %vm200_vm0 = vcmask 326656   ;;  %vm202_vm1 = vcmask 320512   ;;  %v7539_v0 = vmov 0.0   ;;  %v206_v1 = vld [vmem:[%s8363_s0] sm:$0xff] }
  0xdc   :  { %201 = vst.msk [vmem:[#allocation2] sm:$0xff] %vm200_vm0, %v7539_v0  ;;  %204 = vst.msk [vmem:[#allocation2 + $0x10] sm:$0xff] %vm200_vm0, %v7539_v0  ;;  %314 = vmatprep.mubr.f32.mxu1 %v7539_v0  ;;  %397 = vmatprep.mubr.f32.mxu0 %v7539_v0  ;;  %v207_v2 = vld [vmem:[%s8363_s0 + $0x8] sm:$0xff]  ;;  %s7540_s26 = smov 4   ;;  %v224_v4 = vld [vmem:[#allocation4 + $0x18] sm:$0xff]  ;;  %vm216_vm2 = vcmask 293920  }
  0xdd   :  { %203 = vst.msk [vmem:[#allocation2 + $0x8] sm:$0x3] %vm202_vm1, %v7539_v0  ;;  %205 = vst.msk [vmem:[#allocation2 + $0x18] sm:$0x3] %vm202_vm1, %v7539_v0  ;;  %v222_v3 = vld [vmem:[#allocation4 + $0x8] sm:$0xff]  ;;  %210 = vrot.lane.b32.xlu0 %v206_v1, %s7540_s26  ;;  %v235_v5 = vld [vmem:[#allocation4 + $0x58] sm:$0xff] }
  0xde   :  { %530 = vst [vmem:[#allocation3] sm:$0xff] %v7539_v0  ;;  %531 = vst [vmem:[#allocation3 + $0x8] sm:$0xff] %v7539_v0  ;;  %v237_v6 = vld [vmem:[#allocation4 + $0x68] sm:$0xff]  ;;  %v5829_v7 = vpack.c.bf16 %v224_v4, %v222_v3  ;;  %v221_v9 = vld [vmem:[#allocation4] sm:$0xff]  ;;  %vm532_vm3 = vcmask 523264   ;;  %vm536_vm4 = vcmask 517120  }
  0xdf   :  { %534 = vst [vmem:[#allocation3 + $0x18] sm:$0x3] %v7539_v0  ;;  %535 = vst [vmem:[#allocation3 + $0x20] sm:$0x3] %v7539_v0  ;;  %v5821_v8 = vpack.c.bf16 %v237_v6, %v235_v5  ;;  %v223_v10 = vld [vmem:[#allocation4 + $0x10] sm:$0xff]  ;;  %v236_v13 = vld [vmem:[#allocation4 + $0x60] sm:$0xff] }
  0xe0   :  { %538 = vst [vmem:[#allocation3 + $0x30] sm:$0xff] %v7539_v0  ;;  %539 = vst [vmem:[#allocation3 + $0x38] sm:$0xff] %v7539_v0  ;;  %v234_v11 = vld [vmem:[#allocation4 + $0x50] sm:$0xff]  ;;  %v5831_v12 = vpack.c.bf16 %v223_v10, %v221_v9  ;;  %v226_v14 = vld [vmem:[#allocation4 + $0x28] sm:$0xff]  ;;  %5830 = vmatprep.subr.bf16.mxu0 %v5829_v7  ;;  %vm569_vm5 = vcmask 1047809   ;;  %vm574_vm6 = vcmask 1040640  }
  0xe1   :  { %541 = vst [vmem:[#allocation3 + $0x48] sm:$0x3] %v7539_v0  ;;  %542 = vst [vmem:[#allocation3 + $0x50] sm:$0x3] %v7539_v0  ;;  %v228_v15 = vld [vmem:[#allocation4 + $0x38] sm:$0xff]  ;;  %5822 = vmatprep.subr.bf16.mxu1 %v5821_v8  ;;  %v5823_v16 = vpack.c.bf16 %v236_v13, %v234_v11  ;;  %v241_v19 = vld [vmem:[#allocation4 + $0x88] sm:$0xff]  ;;  %212 = vrot.lane.b32.xlu0 %v207_v2, %s7540_s26 }
  0xe2   :  { %v5833_v17 = vpack.c.bf16 %v228_v15, %v226_v14  ;;  %v239_v18 = vld [vmem:[#allocation4 + $0x78] sm:$0xff]  ;;  %v225_v20 = vld [vmem:[#allocation4 + $0x20] sm:$0xff]  ;;  %5832 = vmatpush1.bf16.msra.mxu0 %v5831_v12  ;;  %v227_v22 = vld [vmem:[#allocation4 + $0x30] sm:$0xff]  ;;  %533 = vst.msk [vmem:[#allocation3 + $0x10] sm:$0xff] %vm532_vm3, %v7539_v0  ;;  %vm560_vm7 = vcmask 261120   ;;  %vm572_vm8 = vcmask 261121  }
  0xe3   :  { %v5825_v21 = vpack.c.bf16 %v241_v19, %v239_v18  ;;  %v238_v23 = vld [vmem:[#allocation4 + $0x70] sm:$0xff]  ;;  %v240_v24 = vld [vmem:[#allocation4 + $0x80] sm:$0xff]  ;;  %5824 = vmatpush1.bf16.msra.mxu1 %v5823_v16  ;;  %v5835_v25 = vpack.c.bf16 %v227_v22, %v225_v20  ;;  %v230_v27 = vld [vmem:[#allocation4 + $0x48] sm:$0xff]  ;;  %537 = vst.msk [vmem:[#allocation3 + $0x28] sm:$0x3] %vm536_vm4, %v7539_v0  ;;  %vm577_vm9 = vcmask 253952  }
  0xe4   :  { %5834 = vmatprep.subr.bf16.mxu0 %v5833_v17  ;;  %v5827_v26 = vpack.c.bf16 %v240_v24, %v238_v23  ;;  %v414_v28 = vld [vmem:[#allocation4 + $0xa8] sm:$0xff]  ;;  %v416_v29 = vld [vmem:[#allocation4 + $0xb8] sm:$0xff]  ;;  %v229_v31 = vld [vmem:[#allocation4 + $0x40] sm:$0xff]  ;;  %540 = vst.msk [vmem:[#allocation3 + $0x40] sm:$0xff] %vm532_vm3, %v7539_v0  ;;  %vm695_vm10 = vcmask 1046528   ;;  %vm1141_vm11 = vcmask 1045504  }
  0xe5   :  { %5826 = vmatprep.subr.bf16.mxu1 %v5825_v21  ;;  %v243_v30 = vld [vmem:[#allocation4 + $0x98] sm:$0xff]  ;;  %v5837_v32 = vpack.c.bf16 %v416_v29, %v414_v28  ;;  %v242_v33 = vld [vmem:[#allocation4 + $0x90] sm:$0xff]  ;;  %v413_v35 = vld [vmem:[#allocation4 + $0xa0] sm:$0xff]  ;;  %543 = vst.msk [vmem:[#allocation3 + $0x58] sm:$0x3] %vm536_vm4, %v7539_v0  ;;  %vm3165_vm12 = vcmask 1041409  }
  0xe6   :  { %5836 = vmatpush1.bf16.msra.mxu0 %v5835_v25  ;;  %v415_v36 = vld [vmem:[#allocation4 + $0xb0] sm:$0xff]  ;;  %v418_v38 = vld [vmem:[#allocation4 + $0xc8] sm:$0xff]  ;;  %v420_v39 = vld [vmem:[#allocation4 + $0xd8] sm:$0xff]  ;;  %vm7542_vm13 = vmmov 0   ;;  %s7544_s7 = smov 127   ;;  %vm5090_vm14 = vcmask 41984  }
  0xe7   :  { %5828 = vmatpush1.bf16.msra.mxu1 %v5827_v26  ;;  %341 = vmatprep.subr.mxu0 %v230_v27  ;;  %v5839_v40 = vpack.c.bf16 %v415_v36, %v413_v35  ;;  %v5841_v41 = vpack.c.bf16 %v420_v39, %v418_v38  ;;  %v417_v42 = vld [vmem:[#allocation4 + $0xc0] sm:$0xff]  ;;  %v419_v43 = vld [vmem:[#allocation4 + $0xd0] sm:$0xff]  ;;  %v422_v49 = vld [vmem:[#allocation4 + $0xe8] sm:$0xff] }
  0xe8   :  { %258 = vmatprep.subr.mxu1 %v243_v30  ;;  %v5843_v46 = vpack.c.bf16 %v419_v43, %v417_v42  ;;  %v421_v50 = vld [vmem:[#allocation4 + $0xe0] sm:$0xff]  ;;  %v722_v54 = vld [vmem:[#allocation9 + $0x298] sm:$0xff]  ;;  %v719_v55 = vld [vmem:[#allocation9 + $0x280] sm:$0xff] }
  0xe9   :  { %v720_v53 = vld [vmem:[#allocation9 + $0x288] sm:$0xff]  ;;  %v721_v57 = vld [vmem:[#allocation9 + $0x290] sm:$0xff]  ;;  %v726_v59 = vld [vmem:[#allocation9 + $0x2b8] sm:$0xff] }
  0xea   :  { %342 = vmatpush1.msra.mxu0 %v229_v31  ;;  %v5845_v56 = vpack.c.bf16 %v722_v54, %v720_v53  ;;  %v724_v58 = vld [vmem:[#allocation9 + $0x2a8] sm:$0xff]  ;;  %v5847_v60 = vpack.c.bf16 %v721_v57, %v719_v55  ;;  %v723_v62 = vld [vmem:[#allocation9 + $0x2a0] sm:$0xff]  ;;  %v725_v63 = vld [vmem:[#allocation9 + $0x2b0] sm:$0xff] }
  0xeb   :  { %259 = vmatpush1.msra.mxu1 %v242_v33  ;;  %5838 = vmatprep.subr.bf16.mxu0 %v5837_v32  ;;  %v5849_v61 = vpack.c.bf16 %v726_v59, %v724_v58  ;;  %v728_v1 = vld [vmem:[#allocation9 + $0x2c8] sm:$0xff]  ;;  %v730_v2 = vld [vmem:[#allocation9 + $0x2d8] sm:$0xff]  ;;  %v5851_v3 = vpack.c.bf16 %v725_v63, %v723_v62  ;;  %v727_v5 = vld [vmem:[#allocation9 + $0x2c0] sm:$0xff]  ;;  %v512_v62 = vlaneseq }
  0xec   :  { %5846 = vmatprep.subr.bf16.mxu1 %v5845_v56  ;;  %v5853_v4 = vpack.c.bf16 %v730_v2, %v728_v1  ;;  %v729_v6 = vld [vmem:[#allocation9 + $0x2d0] sm:$0xff]  ;;  %v732_v7 = vld [vmem:[#allocation9 + $0x2e8] sm:$0xff]  ;;  %v734_v8 = vld [vmem:[#allocation9 + $0x2f8] sm:$0xff] }
  0xed   :  { %v5855_v9 = vpack.c.bf16 %v729_v6, %v727_v5  ;;  %v5857_v10 = vpack.c.bf16 %v734_v8, %v732_v7  ;;  %v731_v11 = vld [vmem:[#allocation9 + $0x2e0] sm:$0xff]  ;;  %v733_v12 = vld [vmem:[#allocation9 + $0x2f0] sm:$0xff]  ;;  %v736_v13 = vld [vmem:[#allocation9 + $0x308] sm:$0xff]  ;;  %v7823_v2 = vshrl.u32 %v512_v62, 7 }
  0xee   :  { %v738_v14 = vld [vmem:[#allocation9 + $0x318] sm:$0xff]  ;;  %v5859_v15 = vpack.c.bf16 %v733_v12, %v731_v11  ;;  %v735_v17 = vld [vmem:[#allocation9 + $0x300] sm:$0xff]  ;;  %v737_v18 = vld [vmem:[#allocation9 + $0x310] sm:$0xff] }
  0xef   :  { %v5861_v16 = vpack.c.bf16 %v738_v14, %v736_v13  ;;  %v740_v19 = vld [vmem:[#allocation9 + $0x328] sm:$0xff]  ;;  %v742_v20 = vld [vmem:[#allocation9 + $0x338] sm:$0xff]  ;;  %v5863_v21 = vpack.c.bf16 %v737_v18, %v735_v17  ;;  %v739_v23 = vld [vmem:[#allocation9 + $0x320] sm:$0xff]  ;;  %v7829_v13 = vsub.s32 1, %v7823_v2 }
  0xf0   :  { %v5865_v22 = vpack.c.bf16 %v742_v20, %v740_v19  ;;  %v741_v24 = vld [vmem:[#allocation9 + $0x330] sm:$0xff]  ;;  %v744_v25 = vld [vmem:[#allocation9 + $0x348] sm:$0xff]  ;;  %v746_v26 = vld [vmem:[#allocation9 + $0x358] sm:$0xff] }
  0xf1   :  { %v5867_v27 = vpack.c.bf16 %v741_v24, %v739_v23  ;;  %v5869_v28 = vpack.c.bf16 %v746_v26, %v744_v25  ;;  %v743_v29 = vld [vmem:[#allocation9 + $0x340] sm:$0xff]  ;;  %v745_v30 = vld [vmem:[#allocation9 + $0x350] sm:$0xff]  ;;  %v748_v31 = vld [vmem:[#allocation9 + $0x368] sm:$0xff] }
  0xf2   :  { %v750_v32 = vld [vmem:[#allocation9 + $0x378] sm:$0xff]  ;;  %v5871_v33 = vpack.c.bf16 %v745_v30, %v743_v29  ;;  %v747_v35 = vld [vmem:[#allocation9 + $0x360] sm:$0xff]  ;;  %v749_v36 = vld [vmem:[#allocation9 + $0x370] sm:$0xff] }
  0xf3   :  { %v754_v38 = vld [vmem:[#allocation9 + $0x398] sm:$0xff]  ;;  %v5875_v39 = vpack.c.bf16 %v749_v36, %v747_v35  ;;  %v753_v42 = vld [vmem:[#allocation9 + $0x390] sm:$0xff]  ;;  %v756_v43 = vld [vmem:[#allocation9 + $0x3a8] sm:$0xff] }
  0xf4   :  { %v759_v53 = vld [vmem:[#allocation9 + $0x3c0] sm:$0xff]  ;;  %v761_v54 = vld [vmem:[#allocation9 + $0x3d0] sm:$0xff]  ;;  %v764_v55 = vld [vmem:[#allocation9 + $0x3e8] sm:$0xff] }
  0xf5   :  { %v766_v56 = vld [vmem:[#allocation9 + $0x3f8] sm:$0xff]  ;;  %v5887_v57 = vpack.c.bf16 %v761_v54, %v759_v53  ;;  %v763_v59 = vld [vmem:[#allocation9 + $0x3e0] sm:$0xff]  ;;  %v769_v8 = vld [vmem:[#allocation9 + $0x410] sm:$0xff] }
  0xf6   :  { %v5889_v58 = vpack.c.bf16 %v766_v56, %v764_v55  ;;  %v767_v7 = vld [vmem:[#allocation9 + $0x400] sm:$0xff]  ;;  %v510_v12 = vld [vmem:[#allocation7] sm:$0x3]  ;;  %v772_v14 = vld [vmem:[#allocation9 + $0x428] sm:$0xff] }
  0xf7   :  { %v5895_v11 = vpack.c.bf16 %v769_v8, %v767_v7  ;;  %v771_v17 = vld [vmem:[#allocation9 + $0x420] sm:$0xff]  ;;  %v773_v18 = vld [vmem:[#allocation9 + $0x430] sm:$0xff]  ;;  %v776_v25 = vld [vmem:[#allocation9 + $0x448] sm:$0xff] }
  0xf8   :  { %v5899_v20 = vpack.c.bf16 %v773_v18, %v771_v17  ;;  %v778_v26 = vld [vmem:[#allocation9 + $0x458] sm:$0xff]  ;;  %v775_v29 = vld [vmem:[#allocation9 + $0x440] sm:$0xff]  ;;  %v777_v30 = vld [vmem:[#allocation9 + $0x450] sm:$0xff] }
  0xf9   :  { %v787_v18 = vld [vmem:[#allocation9 + $0x4a0] sm:$0xff] }
 0x14f   :  { %v211_v34 = vpop.permute.xlu0 %210 }
 0x150   :  { %217 = vst.msk [vmem:[#allocation2 + $0x1] sm:$0xff] %vm216_vm2, %v211_v34  ;;  %v5873_v34 = vpack.c.bf16 %v750_v32, %v748_v31  ;;  %v5903_v32 = vpack.c.bf16 %v777_v30, %v775_v29 }
 0x153   :  { %v213_v37 = vpop.permute.xlu0 %212 }
 0x154   :  { %218 = vst.msk [vmem:[#allocation2 + $0x11] sm:$0xff] %vm216_vm2, %v213_v37  ;;  %v752_v37 = vld [vmem:[#allocation9 + $0x388] sm:$0xff] }
 0x157   :  { %v231_v44 = vld [vmem:[#allocation2 + $0x1] sm:$0xff] }
 0x158   :  { %v219_v45 = vld [vmem:[#allocation2] sm:$0xff]  ;;  %5123 = vmatmul.mubr.msk.f32.vlgmr.msra.gmra.mrb[0].mxu1 %vm200_vm0, %v231_v44  ;;  %v758_v44 = vld [vmem:[#allocation9 + $0x3b8] sm:$0xff] }
 0x159   :  { %5125 = vmatmul.mubr.msk.f32.vlgmr.msra.gmra.mrb[0].mxu0 %vm200_vm0, %v219_v45  ;;  %320 = vmatprep.mubr.f32.mxu1 %v7539_v0  ;;  %v410_v51 = vld [vmem:[#allocation2 + $0x2] sm:$0xff] }
 0x15a   :  { %5840 = vmatpush1.bf16.msra.mxu0 %v5839_v40  ;;  %403 = vmatprep.mubr.f32.mxu0 %v7539_v0  ;;  %v5877_v40 = vpack.c.bf16 %v754_v38, %v752_v37  ;;  %v780_v38 = vld [vmem:[#allocation9 + $0x468] sm:$0xff] }
 0x15b   :  { %5842 = vmatprep.subr.bf16.mxu0 %v5841_v41  ;;  %v232_v47 = vld [vmem:[#allocation2 + $0x11] sm:$0xff]  ;;  %5848 = vmatpush1.bf16.msra.mxu1 %v5847_v60  ;;  %v765_v60 = vld [vmem:[#allocation9 + $0x3f0] sm:$0xff] }
 0x15c   :  { %v220_v48 = vld [vmem:[#allocation2 + $0x10] sm:$0xff]  ;;  %5124 = vmatmul.mubr.msk.f32.gmra.mrb[2].mxu1 %vm200_vm0, %v232_v47  ;;  %5850 = vmatprep.subr.bf16.mxu1 %v5849_v61  ;;  %v5891_v61 = vpack.c.bf16 %v765_v60, %v763_v59 }
 0x15d   :  { %5126 = vmatmul.mubr.msk.f32.gmra.mrb[2].mxu0 %vm200_vm0, %v220_v48  ;;  %v411_v52 = vld [vmem:[#allocation2 + $0x12] sm:$0xff]  ;;  %v757_v48 = vld [vmem:[#allocation9 + $0x3b0] sm:$0xff] }
 0x15e   :  { %5844 = vmatpush1.bf16.msra.mxu0 %v5843_v46  ;;  %493 = vmatprep.mubr.f32.mxu0 %v7539_v0  ;;  %v751_v41 = vld [vmem:[#allocation9 + $0x380] sm:$0xff]  ;;  %v5881_v46 = vpack.c.bf16 %v758_v44, %v756_v43  ;;  %v781_v43 = vld [vmem:[#allocation9 + $0x470] sm:$0xff] }
 0x15f   :  { %437 = vmatprep.subr.mxu0 %v422_v49  ;;  %5852 = vmatpush1.bf16.msra.mxu1 %v5851_v3  ;;  %v5879_v45 = vpack.c.bf16 %v753_v42, %v751_v41  ;;  %v755_v47 = vld [vmem:[#allocation9 + $0x3a0] sm:$0xff]  ;;  %v760_v49 = vld [vmem:[#allocation9 + $0x3c8] sm:$0xff] }
 0x160   :  { %5854 = vmatprep.subr.bf16.mxu1 %v5853_v4  ;;  %v768_v3 = vld [vmem:[#allocation9 + $0x408] sm:$0xff]  ;;  %v770_v4 = vld [vmem:[#allocation9 + $0x418] sm:$0xff] }
 0x161   :  { %v5893_v6 = vpack.c.bf16 %v770_v4, %v768_v3  ;;  %v783_v3 = vld [vmem:[#allocation9 + $0x480] sm:$0xff]  ;;  %v785_v4 = vld [vmem:[#allocation9 + $0x490] sm:$0xff] }
 0x162   :  { %438 = vmatpush1.msra.mxu0 %v421_v50  ;;  %v762_v50 = vld [vmem:[#allocation9 + $0x3d8] sm:$0xff]  ;;  %v5911_v17 = vpack.c.bf16 %v785_v4, %v783_v3 }
 0x163   :  { %5127 = vmatmul.mubr.msk.f32.vlgmr.msra.gmra.mrb[0].mxu0 %vm200_vm0, %v410_v51  ;;  %5856 = vmatpush1.bf16.msra.mxu1 %v5855_v9  ;;  %v5883_v51 = vpack.c.bf16 %v757_v48, %v755_v47  ;;  %v602_v3 = vld [vmem:[#allocation9 + $0x58] sm:$0xff] }
 0x164   :  { %499 = vmatprep.mubr.f32.mxu0 %v7539_v0  ;;  %5858 = vmatprep.subr.bf16.mxu1 %v5857_v10  ;;  %v7826_v10 = vsub.s32 0, %v7823_v2 }
 0x166   :  { %v515_v19 = vrot.slane %v510_v12, %v7826_v10 }
 0x167   :  { %5128 = vmatmul.mubr.msk.f32.gmra.mrb[2].mxu0 %vm200_vm0, %v411_v52  ;;  %5860 = vmatpush1.bf16.msra.mxu1 %v5859_v15  ;;  %v5885_v52 = vpack.c.bf16 %v762_v50, %v760_v49  ;;  %v774_v15 = vld [vmem:[#allocation9 + $0x438] sm:$0xff]  ;;  %v784_v50 = vld [vmem:[#allocation9 + $0x488] sm:$0xff] }
 0x168   :  { %5862 = vmatprep.subr.bf16.mxu1 %v5861_v16  ;;  %v5897_v16 = vpack.c.bf16 %v774_v15, %v772_v14 }
 0x16b   :  { %5864 = vmatpush1.bf16.msra.mxu1 %v5863_v21 }
 0x16c   :  { %5866 = vmatprep.subr.bf16.mxu1 %v5865_v22  ;;  %v519_v22 = vrot.slane %v510_v12, %v7829_v13 }
 0x16f   :  { %5868 = vmatpush1.bf16.msra.mxu1 %v5867_v27 }
 0x170   :  { %5870 = vmatprep.subr.bf16.mxu1 %v5869_v28  ;;  %v5901_v28 = vpack.c.bf16 %v778_v26, %v776_v25 }
 0x173   :  { %5872 = vmatpush1.bf16.msra.mxu1 %v5871_v33 }
 0x174   :  { %5874 = vmatprep.subr.bf16.mxu1 %v5873_v34 }
 0x177   :  { %5876 = vmatpush1.bf16.msra.mxu1 %v5875_v39  ;;  %v782_v39 = vld [vmem:[#allocation9 + $0x478] sm:$0xff] }
 0x178   :  { %5878 = vmatprep.subr.bf16.mxu1 %v5877_v40  ;;  %v779_v40 = vld [vmem:[#allocation9 + $0x460] sm:$0xff]  ;;  %v5905_v42 = vpack.c.bf16 %v782_v39, %v780_v38  ;;  %v798_v38 = vld [vmem:[#allocation9 + $0x4f8] sm:$0xff] }
 0x179   :  { %v5907_v47 = vpack.c.bf16 %v781_v43, %v779_v40  ;;  %v592_v43 = vld [vmem:[#allocation9 + $0x8] sm:$0xff] }
 0x17b   :  { %5880 = vmatpush1.bf16.msra.mxu1 %v5879_v45 }
 0x17c   :  { %5882 = vmatprep.subr.bf16.mxu1 %v5881_v46 }
 0x17f   :  { %5884 = vmatpush1.bf16.msra.mxu1 %v5883_v51  ;;  %v786_v51 = vld [vmem:[#allocation9 + $0x498] sm:$0xff] }
 0x180   :  { %5886 = vmatprep.subr.bf16.mxu1 %v5885_v52  ;;  %v5909_v52 = vpack.c.bf16 %v786_v51, %v784_v50  ;;  %v593_v50 = vld [vmem:[#allocation9 + $0x10] sm:$0xff] }
 0x183   :  { %5888 = vmatpush1.bf16.msra.mxu1 %v5887_v57 }
 0x184   :  { %5890 = vmatprep.subr.bf16.mxu1 %v5889_v58 }
 0x187   :  { %5892 = vmatpush1.bf16.msra.mxu1 %v5891_v61 }
 0x188   :  { %5894 = vmatprep.subr.bf16.mxu1 %v5893_v6  ;;  %v790_v6 = vld [vmem:[#allocation9 + $0x4b8] sm:$0xff] }
 0x18b   :  { %5896 = vmatpush1.bf16.msra.mxu1 %v5895_v11 }
 0x18c   :  { %5898 = vmatprep.subr.bf16.mxu1 %v5897_v16 }
 0x18f   :  { %5900 = vmatpush1.bf16.msra.mxu1 %v5899_v20 }
 0x190   :  { %5902 = vmatprep.subr.bf16.mxu1 %v5901_v28 }
 0x193   :  { %5904 = vmatpush1.bf16.msra.mxu1 %v5903_v32 }
 0x194   :  { %5906 = vmatprep.subr.bf16.mxu1 %v5905_v42  ;;  %v797_v42 = vld [vmem:[#allocation9 + $0x4f0] sm:$0xff] }
 0x197   :  { %5908 = vmatpush1.bf16.msra.mxu1 %v5907_v47 }
 0x198   :  { %5910 = vmatprep.subr.bf16.mxu1 %v5909_v52 }
 0x22b   :  { %v316_v63 = vpop.f32.mrb[0].mxu1 }
 0x22c   :  { %v318_v1 = vpop.f32.mrb[1].mxu1 }
 0x22f   :  { %v322_v5 = vpop.f32.mrb[2].mxu1 }
 0x230   :  { %v324_v9 = vpop.f32.mrb[3].mxu1 }
 0x236   :  { %v495_v21 = vpop.f32.mrb[0].mxu0 }
 0x237   :  { %v7125_v23 = vadd.f32 %v495_v21, %v316_v63  ;;  %v497_v24 = vpop.f32.mrb[1].mxu0  ;;  %v789_v21 = vld [vmem:[#allocation9 + $0x4b0] sm:$0xff] }
 0x238   :  { %v7126_v27 = vadd.f32 %v497_v24, %v318_v1 }
 0x239   :  { %v522_v31 = vadd.f32 %v7125_v23, %v515_v19  ;;  %v794_v23 = vld [vmem:[#allocation9 + $0x4d8] sm:$0xff] }
 0x23a   :  { %v501_v33 = vpop.f32.mrb[2].mxu0  ;;  %v523_v34 = vadd.f32 %v7126_v27, %v519_v22 }
 0x23b   :  { %v7127_v35 = vadd.f32 %v501_v33, %v322_v5  ;;  %v503_v36 = vpop.f32.mrb[3].mxu0  ;;  %v526_v37 = vmax.f32 %v522_v31, 0.0  ;;  %v788_v5 = vld [vmem:[#allocation9 + $0x4a8] sm:$0xff]  ;;  %v5915_v31 = vpack.c.bf16 %v789_v21, %v787_v18 }
 0x23c   :  { %v7128_v41 = vadd.f32 %v503_v36, %v324_v9  ;;  %v527_v45 = vmax.f32 %v523_v34, 0.0  ;;  %v5913_v20 = vpack.c.bf16 %v790_v6, %v788_v5  ;;  %v791_v34 = vld [vmem:[#allocation9 + $0x4c0] sm:$0xff]  ;;  %v608_v18 = vld [vmem:[#allocation9 + $0x88] sm:$0xff] }
 0x23d   :  { %v548_v44 = vrot.slane %v526_v37, 7  ;;  %v524_v46 = vadd.f32 %v7127_v35, %v515_v19  ;;  %v793_v35 = vld [vmem:[#allocation9 + $0x4d0] sm:$0xff]  ;;  %v796_v37 = vld [vmem:[#allocation9 + $0x4e8] sm:$0xff]  ;;  %v599_v6 = vld [vmem:[#allocation9 + $0x40] sm:$0xff] }
 0x23e   :  { %v525_v48 = vadd.f32 %v7128_v41, %v519_v22  ;;  %v549_v53 = vrot.slane %v527_v45, 7  ;;  %v792_v22 = vld [vmem:[#allocation9 + $0x4c8] sm:$0xff]  ;;  %v5919_v39 = vpack.c.bf16 %v793_v35, %v791_v34  ;;  %v5921_v40 = vpack.c.bf16 %v798_v38, %v796_v37  ;;  %v795_v41 = vld [vmem:[#allocation9 + $0x4e0] sm:$0xff]  ;;  %v617_v35 = vld [vmem:[#allocation9 + $0xd0] sm:$0xff] }
 0x23f   :  { %552 = vrot.lane.b32.xlu1 %v548_v44, %s7534_s11  ;;  %v528_v49 = vmax.f32 %v524_v46, 0.0  ;;  %v5917_v33 = vpack.c.bf16 %v794_v23, %v792_v22  ;;  %v594_v44 = vld [vmem:[#allocation9 + $0x18] sm:$0xff]  ;;  %v5923_v47 = vpack.c.bf16 %v797_v42, %v795_v41  ;;  %v607_v22 = vld [vmem:[#allocation9 + $0x80] sm:$0xff]  ;;  %v609_v23 = vld [vmem:[#allocation9 + $0x90] sm:$0xff] }
 0x240   :  { %v529_v55 = vmax.f32 %v525_v48, 0.0  ;;  %v5925_v48 = vpack.c.bf16 %v594_v44, %v592_v43  ;;  %v615_v34 = vld [vmem:[#allocation9 + $0xc0] sm:$0xff]  ;;  %v622_v37 = vld [vmem:[#allocation9 + $0xf8] sm:$0xff]  ;;  %v621_v41 = vld [vmem:[#allocation9 + $0xf0] sm:$0xff] }
 0x241   :  { %v550_v54 = vrot.slane %v528_v49, 7  ;;  %v591_v49 = vld [vmem:[#allocation9] sm:$0xff]  ;;  %v5951_v38 = vpack.c.bf16 %v617_v35, %v615_v34  ;;  %v624_v42 = vld [vmem:[#allocation9 + $0x108] sm:$0xff]  ;;  %v626_v43 = vld [vmem:[#allocation9 + $0x118] sm:$0xff] }
 0x242   :  { %v551_v56 = vrot.slane %v529_v55, 7  ;;  %v655_v34 = vld [vmem:[#allocation9 + $0x200] sm:$0xff]  ;;  %v657_v35 = vld [vmem:[#allocation9 + $0x210] sm:$0xff] }
 0x243   :  { %554 = vrot.lane.b32.xlu1 %v549_v53, %s7534_s11  ;;  %556 = vrot.lane.b32.xlu0 %v550_v54, %s7534_s11  ;;  %v596_v53 = vld [vmem:[#allocation9 + $0x28] sm:$0xff]  ;;  %v598_v54 = vld [vmem:[#allocation9 + $0x38] sm:$0xff] }
 0x247   :  { %558 = vrot.lane.b32.xlu1 %v551_v56, %s7534_s11 }
 0x2b1   :  { %v553_v57 = vpop.permute.xlu1 %552 }
 0x2b2   :  { %570 = vst.msk [vmem:[#allocation3] sm:$0xfe] %vm569_vm5, %v553_v57 }
 0x2b3   :  { %575 = vst.msk [vmem:[#allocation3 + $0x18] sm:$0x1] %vm574_vm6, %v553_v57 }
 0x2b5   :  { %v555_v58 = vpop.permute.xlu1 %554  ;;  %v557_v59 = vpop.permute.xlu0 %556 }
 0x2b6   :  { %v561_v60 = vsel %vm560_vm7, %v553_v57, %v555_v58  ;;  %573 = vst.msk [vmem:[#allocation3 + $0x10] sm:$0xfe] %vm572_vm8, %v555_v58  ;;  %v5927_v57 = vpack.c.bf16 %v593_v50, %v591_v49  ;;  %v630_v49 = vld [vmem:[#allocation9 + $0x138] sm:$0xff] }
 0x2b7   :  { %578 = vst.msk [vmem:[#allocation3 + $0x28] sm:$0x1] %vm577_vm9, %v555_v58  ;;  %571 = vst [vmem:[#allocation3 + $0x8] sm:$0xfe] %v561_v60  ;;  %v5929_v58 = vpack.c.bf16 %v598_v54, %v596_v53  ;;  %v629_v53 = vld [vmem:[#allocation9 + $0x130] sm:$0xff]  ;;  %v632_v54 = vld [vmem:[#allocation9 + $0x148] sm:$0xff] }
 0x2b8   :  { %579 = vst.msk [vmem:[#allocation3 + $0x30] sm:$0xfe] %vm569_vm5, %v557_v59  ;;  %576 = vst [vmem:[#allocation3 + $0x20] sm:$0x1] %v561_v60  ;;  %v597_v60 = vld [vmem:[#allocation9 + $0x30] sm:$0xff] }
 0x2b9   :  { %582 = vst.msk [vmem:[#allocation3 + $0x48] sm:$0x1] %vm574_vm6, %v557_v59  ;;  %v559_v61 = vpop.permute.xlu1 %558  ;;  %v671_v63 = vld [vmem:[#allocation3] sm:$0xfe] }
 0x2ba   :  { %v562_v62 = vsel %vm560_vm7, %v557_v59, %v559_v61  ;;  %581 = vst.msk [vmem:[#allocation3 + $0x40] sm:$0xfe] %vm572_vm8, %v559_v61  ;;  %v674_v1 = vld [vmem:[#allocation3 + $0x18] sm:$0x1]  ;;  %v696_v9 = vrot.slane %v671_v63, 1 }
 0x2bb   :  { %584 = vst.msk [vmem:[#allocation3 + $0x58] sm:$0x1] %vm577_vm9, %v559_v61  ;;  %580 = vst [vmem:[#allocation3 + $0x38] sm:$0xfe] %v562_v62  ;;  %v697_v11 = vrot.slane %v674_v1, 1  ;;  %v595_v59 = vld [vmem:[#allocation9 + $0x20] sm:$0xff] }
 0x2bc   :  { %583 = vst [vmem:[#allocation3 + $0x50] sm:$0x1] %v562_v62  ;;  %v600_v1 = vld [vmem:[#allocation9 + $0x48] sm:$0xff]  ;;  %v5931_v4 = vpack.c.bf16 %v597_v60, %v595_v59  ;;  %v633_v59 = vld [vmem:[#allocation9 + $0x150] sm:$0xff] }
 0x2bd   :  { %v698_v24 = vsel %vm695_vm10, %v696_v9, %v697_v11  ;;  %v673_v45 = vld [vmem:[#allocation3 + $0x10] sm:$0xfe]  ;;  %v5933_v5 = vpack.c.bf16 %v602_v3, %v600_v1  ;;  %v604_v9 = vld [vmem:[#allocation9 + $0x68] sm:$0xff]  ;;  %v637_v3 = vld [vmem:[#allocation9 + $0x170] sm:$0xff] }
 0x2be   :  { %v672_v7 = vld [vmem:[#allocation3 + $0x8] sm:$0xfe]  ;;  %v676_v46 = vld [vmem:[#allocation3 + $0x28] sm:$0x1]  ;;  %v702_v51 = vrot.slane %v673_v45, 1  ;;  %v5957_v45 = vpack.c.bf16 %v626_v43, %v624_v42  ;;  %v636_v60 = vld [vmem:[#allocation9 + $0x168] sm:$0xff] }
 0x2bf   :  { %v675_v8 = vld [vmem:[#allocation3 + $0x20] sm:$0x1]  ;;  %v699_v12 = vrot.slane %v672_v7, 1  ;;  %v677_v15 = vld [vmem:[#allocation3 + $0x30] sm:$0xfe]  ;;  %v703_v52 = vrot.slane %v676_v46, 1 }
 0x2c0   :  { %v700_v14 = vrot.slane %v675_v8, 1  ;;  %v680_v16 = vld [vmem:[#allocation3 + $0x48] sm:$0x1]  ;;  %v705_v27 = vrot.slane %v677_v15, 1  ;;  %v606_v11 = vld [vmem:[#allocation9 + $0x78] sm:$0xff]  ;;  %v623_v46 = vld [vmem:[#allocation9 + $0x100] sm:$0xff] }
 0x2c1   :  { %v706_v28 = vrot.slane %v680_v16, 1  ;;  %v679_v55 = vld [vmem:[#allocation3 + $0x40] sm:$0xfe]  ;;  %v704_v61 = vsel %vm695_vm10, %v702_v51, %v703_v52  ;;  %v5937_v15 = vpack.c.bf16 %v606_v11, %v604_v9  ;;  %v603_v16 = vld [vmem:[#allocation9 + $0x60] sm:$0xff] }
 0x2c2   :  { %v701_v19 = vsel %vm695_vm10, %v699_v12, %v700_v14  ;;  %v678_v25 = vld [vmem:[#allocation3 + $0x38] sm:$0xfe]  ;;  %v682_v56 = vld [vmem:[#allocation3 + $0x58] sm:$0x1]  ;;  %v711_v62 = vrot.slane %v679_v55, 1  ;;  %v601_v7 = vld [vmem:[#allocation9 + $0x50] sm:$0xff] }
 0x2c3   :  { %867 = vmatprep.mubr.f32.mxu1 %v701_v19  ;;  %v681_v26 = vld [vmem:[#allocation3 + $0x50] sm:$0x1]  ;;  %v708_v29 = vrot.slane %v678_v25, 1  ;;  %v707_v36 = vsel %vm695_vm10, %v705_v27, %v706_v28  ;;  %v712_v63 = vrot.slane %v682_v56, 1  ;;  %v586_v12 = vld [vmem:[#allocation3 + $0x8] sm:$0xff]  ;;  %v5935_v14 = vpack.c.bf16 %v601_v7, %v599_v6  ;;  %v611_v28 = vld [vmem:[#allocation9 + $0xa0] sm:$0xff] }
 0x2c4   :  { %868 = vmatmul.mubr.f32.vlgmr.msra.gmra.mrb[4].mxu1 %v698_v24  ;;  %v709_v30 = vrot.slane %v681_v26, 1  ;;  %v610_v19 = vld [vmem:[#allocation9 + $0x98] sm:$0xff]  ;;  %v612_v24 = vld [vmem:[#allocation9 + $0xa8] sm:$0xff]  ;;  %v5943_v26 = vpack.c.bf16 %v609_v23, %v607_v22  ;;  %v627_v52 = vld [vmem:[#allocation9 + $0x120] sm:$0xff] }
 0x2c5   :  { %5912 = vmatpush1.bf16.msra.mxu1 %v5911_v17  ;;  %v713_v8 = vsel %vm695_vm10, %v711_v62, %v712_v63  ;;  %v605_v17 = vld [vmem:[#allocation9 + $0x70] sm:$0xff]  ;;  %v5941_v21 = vpack.c.bf16 %v610_v19, %v608_v18  ;;  %v614_v25 = vld [vmem:[#allocation9 + $0xb8] sm:$0xff]  ;;  %v5963_v56 = vpack.c.bf16 %v629_v53, %v627_v52  ;;  %v635_v1 = vld [vmem:[#allocation9 + $0x160] sm:$0xff] }
 0x2c6   :  { %v710_v32 = vsel %vm695_vm10, %v708_v29, %v709_v30  ;;  %5914 = vmatprep.subr.bf16.mxu1 %v5913_v20  ;;  %v5939_v20 = vpack.c.bf16 %v605_v17, %v603_v16  ;;  %v5945_v27 = vpack.c.bf16 %v614_v25, %v612_v24  ;;  %v613_v29 = vld [vmem:[#allocation9 + $0xb0] sm:$0xff]  ;;  %v616_v30 = vld [vmem:[#allocation9 + $0xc8] sm:$0xff]  ;;  %v634_v55 = vld [vmem:[#allocation9 + $0x158] sm:$0xff]  ;;  %v5971_v6 = vpack.c.bf16 %v637_v3, %v635_v1 }
 0x2c7   :  { %873 = vmatprep.mubr.f32.mxu1 %v710_v32  ;;  %v5947_v32 = vpack.c.bf16 %v613_v29, %v611_v28  ;;  %v641_v9 = vld [vmem:[#allocation9 + $0x190] sm:$0xff]  ;;  %v644_v11 = vld [vmem:[#allocation9 + $0x1a8] sm:$0xff]  ;;  %v643_v16 = vld [vmem:[#allocation9 + $0x1a0] sm:$0xff] }
 0x2c8   :  { %874 = vmatmul.mubr.f32.gmra.mrb[6].mxu1 %v707_v36  ;;  %v620_v36 = vld [vmem:[#allocation9 + $0xe8] sm:$0xff]  ;;  %v645_v17 = vld [vmem:[#allocation9 + $0x1b0] sm:$0xff]  ;;  %v650_v19 = vld [vmem:[#allocation9 + $0x1d8] sm:$0xff] }
 0x2c9   :  { %5916 = vmatpush1.bf16.msra.mxu1 %v5915_v31  ;;  %944 = vmatprep.mubr.f32.mxu1 %v7539_v0  ;;  %v618_v31 = vld [vmem:[#allocation9 + $0xd8] sm:$0xff]  ;;  %v648_v18 = vld [vmem:[#allocation9 + $0x1c8] sm:$0xff]  ;;  %v647_v22 = vld [vmem:[#allocation9 + $0x1c0] sm:$0xff] }
 0x2ca   :  { %5918 = vmatprep.subr.bf16.mxu1 %v5917_v33  ;;  %v5949_v33 = vpack.c.bf16 %v618_v31, %v616_v30  ;;  %v649_v23 = vld [vmem:[#allocation9 + $0x1d0] sm:$0xff]  ;;  %v652_v24 = vld [vmem:[#allocation9 + $0x1e8] sm:$0xff]  ;;  %v654_v25 = vld [vmem:[#allocation9 + $0x1f8] sm:$0xff] }
 0x2cb   :  { %v651_v28 = vld [vmem:[#allocation9 + $0x1e0] sm:$0xff]  ;;  %v653_v29 = vld [vmem:[#allocation9 + $0x1f0] sm:$0xff]  ;;  %v656_v30 = vld [vmem:[#allocation9 + $0x208] sm:$0xff] }
 0x2cc   :  { %v658_v31 = vld [vmem:[#allocation9 + $0x218] sm:$0xff]  ;;  %v585_v42 = vld [vmem:[#allocation3] sm:$0xff] }
 0x2cd   :  { %5920 = vmatpush1.bf16.msra.mxu1 %v5919_v39  ;;  %v5953_v39 = vpack.c.bf16 %v622_v37, %v620_v36  ;;  %v660_v36 = vld [vmem:[#allocation9 + $0x228] sm:$0xff]  ;;  %v662_v37 = vld [vmem:[#allocation9 + $0x238] sm:$0xff] }
 0x2ce   :  { %5922 = vmatprep.subr.bf16.mxu1 %v5921_v40  ;;  %v619_v40 = vld [vmem:[#allocation9 + $0xe0] sm:$0xff]  ;;  %v664_v43 = vld [vmem:[#allocation9 + $0x248] sm:$0xff]  ;;  %v670_v52 = vld [vmem:[#allocation9 + $0x278] sm:$0xff] }
 0x2cf   :  { %v5955_v44 = vpack.c.bf16 %v621_v41, %v619_v40  ;;  %v659_v40 = vld [vmem:[#allocation9 + $0x220] sm:$0xff]  ;;  %v661_v41 = vld [vmem:[#allocation9 + $0x230] sm:$0xff]  ;;  %v1172_v1 = vld [vmem:[#allocation9 + $0x538] sm:$0xff] }
 0x2d1   :  { %5924 = vmatpush1.bf16.msra.mxu1 %v5923_v47  ;;  %v625_v47 = vld [vmem:[#allocation9 + $0x110] sm:$0xff] }
 0x2d2   :  { %5926 = vmatprep.subr.bf16.mxu1 %v5925_v48  ;;  %v628_v48 = vld [vmem:[#allocation9 + $0x128] sm:$0xff]  ;;  %v5959_v50 = vpack.c.bf16 %v625_v47, %v623_v46  ;;  %v5995_v46 = vpack.c.bf16 %v661_v41, %v659_v40  ;;  %v1192_v41 = vld [vmem:[#allocation9 + $0x5d8] sm:$0xff] }
 0x2d3   :  { %v5961_v51 = vpack.c.bf16 %v630_v49, %v628_v48  ;;  %v663_v48 = vld [vmem:[#allocation9 + $0x240] sm:$0xff]  ;;  %v665_v49 = vld [vmem:[#allocation9 + $0x250] sm:$0xff]  ;;  %v1190_v40 = vld [vmem:[#allocation9 + $0x5c8] sm:$0xff] }
 0x2d4   :  { %5129 = vmatmul.mubr.msk.f32.vlgmr.msra.gmra.mrb[4].mxu1 %vm532_vm3, %v704_v61  ;;  %v638_v61 = vld [vmem:[#allocation9 + $0x178] sm:$0xff]  ;;  %v5999_v53 = vpack.c.bf16 %v665_v49, %v663_v48 }
 0x2d5   :  { %5928 = vmatpush1.bf16.msra.mxu1 %v5927_v57  ;;  %950 = vmatprep.mubr.f32.mxu1 %v7539_v0  ;;  %v5965_v57 = vpack.c.bf16 %v634_v55, %v632_v54  ;;  %v5969_v63 = vpack.c.bf16 %v638_v61, %v636_v60  ;;  %v667_v55 = vld [vmem:[#allocation9 + $0x260] sm:$0xff] }
 0x2d6   :  { %5930 = vmatprep.subr.bf16.mxu1 %v5929_v58  ;;  %v631_v58 = vld [vmem:[#allocation9 + $0x140] sm:$0xff] }
 0x2d7   :  { %v5967_v62 = vpack.c.bf16 %v633_v59, %v631_v58  ;;  %v1168_v58 = vld [vmem:[#allocation9 + $0x518] sm:$0xff]  ;;  %v1165_v61 = vld [vmem:[#allocation9 + $0x500] sm:$0xff] }
 0x2d8   :  { %5130 = vmatmul.mubr.msk.f32.gmra.mrb[6].mxu1 %vm532_vm3, %v713_v8  ;;  %v639_v8 = vld [vmem:[#allocation9 + $0x180] sm:$0xff] }
 0x2d9   :  { %5932 = vmatpush1.bf16.msra.mxu1 %v5931_v4  ;;  %1027 = vmatprep.mubr.f32.mxu1 %v586_v12  ;;  %v640_v4 = vld [vmem:[#allocation9 + $0x188] sm:$0xff]  ;;  %v646_v12 = vld [vmem:[#allocation9 + $0x1b8] sm:$0xff] }
 0x2da   :  { %5934 = vmatprep.subr.bf16.mxu1 %v5933_v5  ;;  %v642_v5 = vld [vmem:[#allocation9 + $0x198] sm:$0xff] }
 0x2db   :  { %v5973_v7 = vpack.c.bf16 %v642_v5, %v640_v4  ;;  %v1118_v4 = vld [vmem:[#allocation3 + $0x8] sm:$0xfc]  ;;  %v1121_v5 = vld [vmem:[#allocation3 + $0x20] sm:$0x3] }
 0x2dd   :  { %5936 = vmatpush1.bf16.msra.mxu1 %v5935_v14  ;;  %v5975_v14 = vpack.c.bf16 %v641_v9, %v639_v8  ;;  %v1171_v8 = vld [vmem:[#allocation9 + $0x530] sm:$0xff]  ;;  %v587_v9 = vld [vmem:[#allocation3 + $0x10] sm:$0xff] }
 0x2de   :  { %5938 = vmatprep.subr.bf16.mxu1 %v5937_v15  ;;  %v5977_v15 = vpack.c.bf16 %v646_v12, %v644_v11  ;;  %v1174_v11 = vld [vmem:[#allocation9 + $0x548] sm:$0xff]  ;;  %v1176_v12 = vld [vmem:[#allocation9 + $0x558] sm:$0xff] }
 0x2e1   :  { %5940 = vmatpush1.bf16.msra.mxu1 %v5939_v20  ;;  %v5979_v20 = vpack.c.bf16 %v645_v17, %v643_v16  ;;  %v6013_v17 = vpack.c.bf16 %v1176_v12, %v1174_v11 }
 0x2e2   :  { %5942 = vmatprep.subr.bf16.mxu1 %v5941_v21  ;;  %v5981_v21 = vpack.c.bf16 %v650_v19, %v648_v18  ;;  %v1173_v18 = vld [vmem:[#allocation9 + $0x540] sm:$0xff]  ;;  %v1175_v19 = vld [vmem:[#allocation9 + $0x550] sm:$0xff] }
 0x2e5   :  { %5944 = vmatpush1.bf16.msra.mxu1 %v5943_v26  ;;  %v5983_v26 = vpack.c.bf16 %v649_v23, %v647_v22  ;;  %v1180_v22 = vld [vmem:[#allocation9 + $0x578] sm:$0xff] }
 0x2e6   :  { %5946 = vmatprep.subr.bf16.mxu1 %v5945_v27  ;;  %v5985_v27 = vpack.c.bf16 %v654_v25, %v652_v24  ;;  %v6015_v24 = vpack.c.bf16 %v1175_v19, %v1173_v18 }
 0x2e9   :  { %5948 = vmatpush1.bf16.msra.mxu1 %v5947_v32  ;;  %v5987_v32 = vpack.c.bf16 %v653_v29, %v651_v28  ;;  %v1182_v28 = vld [vmem:[#allocation9 + $0x588] sm:$0xff]  ;;  %v1184_v29 = vld [vmem:[#allocation9 + $0x598] sm:$0xff] }
 0x2ea   :  { %5950 = vmatprep.subr.bf16.mxu1 %v5949_v33  ;;  %v5989_v33 = vpack.c.bf16 %v658_v31, %v656_v30  ;;  %v6021_v31 = vpack.c.bf16 %v1184_v29, %v1182_v28  ;;  %v1222_v28 = vld [vmem:[#allocation9 + $0x6c8] sm:$0xff]  ;;  %v1224_v29 = vld [vmem:[#allocation9 + $0x6d8] sm:$0xff] }
 0x2ed   :  { %5952 = vmatpush1.bf16.msra.mxu1 %v5951_v38  ;;  %v5991_v38 = vpack.c.bf16 %v657_v35, %v655_v34  ;;  %v1186_v34 = vld [vmem:[#allocation9 + $0x5a8] sm:$0xff]  ;;  %v1188_v35 = vld [vmem:[#allocation9 + $0x5b8] sm:$0xff] }
 0x2ee   :  { %5954 = vmatprep.subr.bf16.mxu1 %v5953_v39  ;;  %v5993_v39 = vpack.c.bf16 %v662_v37, %v660_v36  ;;  %v6025_v37 = vpack.c.bf16 %v1188_v35, %v1186_v34  ;;  %v1226_v34 = vld [vmem:[#allocation9 + $0x6e8] sm:$0xff]  ;;  %v1228_v35 = vld [vmem:[#allocation9 + $0x6f8] sm:$0xff] }
 0x2f1   :  { %5956 = vmatpush1.bf16.msra.mxu1 %v5955_v44  ;;  %v666_v44 = vld [vmem:[#allocation9 + $0x258] sm:$0xff] }
 0x2f2   :  { %5958 = vmatprep.subr.bf16.mxu1 %v5957_v45  ;;  %v589_v45 = vld [vmem:[#allocation3 + $0x38] sm:$0xff]  ;;  %v5997_v47 = vpack.c.bf16 %v666_v44, %v664_v43  ;;  %v6029_v43 = vpack.c.bf16 %v1192_v41, %v1190_v40  ;;  %v1232_v41 = vld [vmem:[#allocation9 + $0x718] sm:$0xff] }
 0x2f3   :  { %v1189_v44 = vld [vmem:[#allocation9 + $0x5c0] sm:$0xff]  ;;  %v1230_v40 = vld [vmem:[#allocation9 + $0x708] sm:$0xff] }
 0x2f5   :  { %5960 = vmatpush1.bf16.msra.mxu1 %v5959_v50  ;;  %v588_v50 = vld [vmem:[#allocation3 + $0x30] sm:$0xff] }
 0x2f6   :  { %5962 = vmatprep.subr.bf16.mxu1 %v5961_v51  ;;  %v668_v51 = vld [vmem:[#allocation9 + $0x268] sm:$0xff] }
 0x2f7   :  { %v6001_v54 = vpack.c.bf16 %v670_v52, %v668_v51  ;;  %v1195_v51 = vld [vmem:[#allocation9 + $0x5f0] sm:$0xff]  ;;  %v1198_v52 = vld [vmem:[#allocation9 + $0x608] sm:$0xff] }
 0x2f9   :  { %5964 = vmatpush1.bf16.msra.mxu1 %v5963_v56  ;;  %v669_v56 = vld [vmem:[#allocation9 + $0x270] sm:$0xff] }
 0x2fa   :  { %5966 = vmatprep.subr.bf16.mxu1 %v5965_v57  ;;  %v1166_v57 = vld [vmem:[#allocation9 + $0x508] sm:$0xff]  ;;  %v6003_v59 = vpack.c.bf16 %v669_v56, %v667_v55  ;;  %v1197_v56 = vld [vmem:[#allocation9 + $0x600] sm:$0xff] }
 0x2fb   :  { %v6005_v60 = vpack.c.bf16 %v1168_v58, %v1166_v57  ;;  %v1199_v57 = vld [vmem:[#allocation9 + $0x610] sm:$0xff]  ;;  %v1202_v58 = vld [vmem:[#allocation9 + $0x628] sm:$0xff] }
 0x2fd   :  { %5968 = vmatpush1.bf16.msra.mxu1 %v5967_v62  ;;  %v1167_v62 = vld [vmem:[#allocation9 + $0x510] sm:$0xff] }
 0x2fe   :  { %5970 = vmatprep.subr.bf16.mxu1 %v5969_v63  ;;  %v1170_v63 = vld [vmem:[#allocation9 + $0x528] sm:$0xff]  ;;  %v6007_v3 = vpack.c.bf16 %v1167_v62, %v1165_v61  ;;  %v1201_v62 = vld [vmem:[#allocation9 + $0x620] sm:$0xff] }
 0x301   :  { %5972 = vmatpush1.bf16.msra.mxu1 %v5971_v6  ;;  %v6009_v6 = vpack.c.bf16 %v1172_v1, %v1170_v63  ;;  %v1203_v63 = vld [vmem:[#allocation9 + $0x630] sm:$0xff]  ;;  %v1206_v1 = vld [vmem:[#allocation9 + $0x648] sm:$0xff] }
 0x302   :  { %5974 = vmatprep.subr.bf16.mxu1 %v5973_v7  ;;  %v1169_v7 = vld [vmem:[#allocation9 + $0x520] sm:$0xff] }
 0x303   :  { %v6011_v16 = vpack.c.bf16 %v1171_v8, %v1169_v7  ;;  %v1207_v7 = vld [vmem:[#allocation9 + $0x650] sm:$0xff]  ;;  %v1210_v8 = vld [vmem:[#allocation9 + $0x668] sm:$0xff] }
 0x305   :  { %5976 = vmatpush1.bf16.msra.mxu1 %v5975_v14  ;;  %v1145_v14 = vrot.slane %v1118_v4, 2  ;;  %v6043_v4 = vpack.c.bf16 %v1203_v63, %v1201_v62 }
 0x306   :  { %5978 = vmatprep.subr.bf16.mxu1 %v5977_v15  ;;  %v1146_v15 = vrot.slane %v1121_v5, 2 }
 0x308   :  { %v1147_v23 = vsel %vm1141_vm11, %v1145_v14, %v1146_v15  ;;  %v1209_v14 = vld [vmem:[#allocation9 + $0x660] sm:$0xff]  ;;  %v1211_v15 = vld [vmem:[#allocation9 + $0x670] sm:$0xff] }
 0x309   :  { %5980 = vmatpush1.bf16.msra.mxu1 %v5979_v20  ;;  %v590_v20 = vld [vmem:[#allocation3 + $0x40] sm:$0xff]  ;;  %v6051_v18 = vpack.c.bf16 %v1211_v15, %v1209_v14  ;;  %v1244_v14 = vld [vmem:[#allocation9 + $0x778] sm:$0xff] }
 0x30a   :  { %5982 = vmatprep.subr.bf16.mxu1 %v5981_v21  ;;  %v1178_v21 = vld [vmem:[#allocation9 + $0x568] sm:$0xff] }
 0x30b   :  { %v6017_v25 = vpack.c.bf16 %v1180_v22, %v1178_v21  ;;  %v1215_v21 = vld [vmem:[#allocation9 + $0x690] sm:$0xff]  ;;  %v1218_v22 = vld [vmem:[#allocation9 + $0x6a8] sm:$0xff] }
 0x30d   :  { %5984 = vmatpush1.bf16.msra.mxu1 %v5983_v26  ;;  %v1177_v26 = vld [vmem:[#allocation9 + $0x560] sm:$0xff] }
 0x30e   :  { %5986 = vmatprep.subr.bf16.mxu1 %v5985_v27  ;;  %v1179_v27 = vld [vmem:[#allocation9 + $0x570] sm:$0xff] }
 0x30f   :  { %v6019_v30 = vpack.c.bf16 %v1179_v27, %v1177_v26  ;;  %v1217_v26 = vld [vmem:[#allocation9 + $0x6a0] sm:$0xff]  ;;  %v1219_v27 = vld [vmem:[#allocation9 + $0x6b0] sm:$0xff] }
 0x311   :  { %5988 = vmatpush1.bf16.msra.mxu1 %v5987_v32  ;;  %v1181_v32 = vld [vmem:[#allocation9 + $0x580] sm:$0xff] }
 0x312   :  { %5990 = vmatprep.subr.bf16.mxu1 %v5989_v33  ;;  %v1183_v33 = vld [vmem:[#allocation9 + $0x590] sm:$0xff] }
 0x313   :  { %v6023_v36 = vpack.c.bf16 %v1183_v33, %v1181_v32  ;;  %v1221_v32 = vld [vmem:[#allocation9 + $0x6c0] sm:$0xff]  ;;  %v1223_v33 = vld [vmem:[#allocation9 + $0x6d0] sm:$0xff] }
 0x314   :  { %1028 = vmatmul.mubr.f32.vlgmr.msra.gmra.mrb[4].mxu1 %v585_v42 }
 0x315   :  { %1033 = vmatprep.mubr.f32.mxu1 %v589_v45  ;;  %5992 = vmatpush1.bf16.msra.mxu1 %v5991_v38  ;;  %v1185_v38 = vld [vmem:[#allocation9 + $0x5a0] sm:$0xff]  ;;  %v1191_v45 = vld [vmem:[#allocation9 + $0x5d0] sm:$0xff] }
 0x316   :  { %5994 = vmatprep.subr.bf16.mxu1 %v5993_v39  ;;  %v1187_v39 = vld [vmem:[#allocation9 + $0x5b0] sm:$0xff]  ;;  %v6031_v48 = vpack.c.bf16 %v1191_v45, %v1189_v44  ;;  %v1124_v45 = vld [vmem:[#allocation3 + $0x38] sm:$0xfc] }
 0x317   :  { %v6027_v42 = vpack.c.bf16 %v1187_v39, %v1185_v38  ;;  %v1225_v38 = vld [vmem:[#allocation9 + $0x6e0] sm:$0xff]  ;;  %v1227_v39 = vld [vmem:[#allocation9 + $0x6f0] sm:$0xff] }
 0x318   :  { %1034 = vmatmul.mubr.f32.gmra.mrb[6].mxu1 %v588_v50  ;;  %v1193_v50 = vld [vmem:[#allocation9 + $0x5e0] sm:$0xff]  ;;  %v6067_v44 = vpack.c.bf16 %v1227_v39, %v1225_v38 }
 0x319   :  { %5996 = vmatpush1.bf16.msra.mxu1 %v5995_v46  ;;  %1104 = vmatprep.mubr.f32.mxu1 %v7539_v0  ;;  %v1194_v46 = vld [vmem:[#allocation9 + $0x5e8] sm:$0xff] }
 0x31a   :  { %5998 = vmatprep.subr.bf16.mxu1 %v5997_v47  ;;  %v1196_v47 = vld [vmem:[#allocation9 + $0x5f8] sm:$0xff]  ;;  %v1684_v39 = vld [vmem:[#allocation12 + $0x540] sm:$0xff] }
 0x31b   :  { %v6033_v49 = vpack.c.bf16 %v1196_v47, %v1194_v46  ;;  %v1127_v46 = vld [vmem:[#allocation3 + $0x50] sm:$0x3]  ;;  %v6069_v47 = vpack.c.bf16 %v1232_v41, %v1230_v40  ;;  %v1688_v40 = vld [vmem:[#allocation12 + $0x560] sm:$0xff]  ;;  %v1693_v41 = vld [vmem:[#allocation12 + $0x588] sm:$0xff] }
 0x31d   :  { %6000 = vmatpush1.bf16.msra.mxu1 %v5999_v53  ;;  %v1200_v53 = vld [vmem:[#allocation9 + $0x618] sm:$0xff] }
 0x31e   :  { %6002 = vmatprep.subr.bf16.mxu1 %v6001_v54  ;;  %v6035_v54 = vpack.c.bf16 %v1195_v51, %v1193_v50  ;;  %v6037_v55 = vpack.c.bf16 %v1200_v53, %v1198_v52  ;;  %v1234_v52 = vld [vmem:[#allocation9 + $0x728] sm:$0xff]  ;;  %v1236_v53 = vld [vmem:[#allocation9 + $0x738] sm:$0xff] }
 0x321   :  { %6004 = vmatpush1.bf16.msra.mxu1 %v6003_v59  ;;  %v1204_v59 = vld [vmem:[#allocation9 + $0x638] sm:$0xff] }
 0x322   :  { %6006 = vmatprep.subr.bf16.mxu1 %v6005_v60  ;;  %v6039_v60 = vpack.c.bf16 %v1199_v57, %v1197_v56  ;;  %v6041_v61 = vpack.c.bf16 %v1204_v59, %v1202_v58  ;;  %v1123_v56 = vld [vmem:[#allocation3 + $0x30] sm:$0xfc]  ;;  %v1126_v57 = vld [vmem:[#allocation3 + $0x48] sm:$0x3]  ;;  %v6073_v59 = vpack.c.bf16 %v1236_v53, %v1234_v52  ;;  %v1709_v53 = vld [vmem:[#allocation12 + $0x608] sm:$0xff] }
 0x323   :  { %v1151_v63 = vrot.slane %v1123_v56, 2  ;;  %v1704_v52 = vld [vmem:[#allocation12 + $0x5e0] sm:$0xff] }
 0x324   :  { %5131 = vmatmul.mubr.msk.f32.vlgmr.msra.gmra.mrb[4].mxu1 %vm532_vm3, %v587_v9  ;;  %v1212_v9 = vld [vmem:[#allocation9 + $0x678] sm:$0xff] }
 0x325   :  { %6008 = vmatpush1.bf16.msra.mxu1 %v6007_v3  ;;  %1110 = vmatprep.mubr.f32.mxu1 %v7539_v0  ;;  %v1208_v3 = vld [vmem:[#allocation9 + $0x658] sm:$0xff]  ;;  %v6049_v12 = vpack.c.bf16 %v1212_v9, %v1210_v8  ;;  %v1237_v8 = vld [vmem:[#allocation9 + $0x740] sm:$0xff]  ;;  %v1239_v9 = vld [vmem:[#allocation9 + $0x750] sm:$0xff] }
 0x326   :  { %6010 = vmatprep.subr.bf16.mxu1 %v6009_v6  ;;  %v6045_v5 = vpack.c.bf16 %v1208_v3, %v1206_v1  ;;  %v1205_v6 = vld [vmem:[#allocation9 + $0x640] sm:$0xff]  ;;  %v1152_v1 = vrot.slane %v1126_v57, 2  ;;  %v1238_v3 = vld [vmem:[#allocation9 + $0x748] sm:$0xff]  ;;  %v6079_v15 = vpack.c.bf16 %v1239_v9, %v1237_v8 }
 0x327   :  { %v6047_v11 = vpack.c.bf16 %v1207_v7, %v1205_v6  ;;  %v1708_v57 = vld [vmem:[#allocation12 + $0x600] sm:$0xff]  ;;  %v1733_v9 = vld [vmem:[#allocation12 + $0x6c8] sm:$0xff] }
 0x328   :  { %5132 = vmatmul.mubr.msk.f32.gmra.mrb[6].mxu1 %vm532_vm3, %v590_v20  ;;  %v1213_v20 = vld [vmem:[#allocation9 + $0x680] sm:$0xff] }
 0x329   :  { %6012 = vmatpush1.bf16.msra.mxu1 %v6011_v16  ;;  %1313 = vmatprep.mubr.f32.mxu1 %v1147_v23  ;;  %v1214_v16 = vld [vmem:[#allocation9 + $0x688] sm:$0xff]  ;;  %v1220_v23 = vld [vmem:[#allocation9 + $0x6b8] sm:$0xff] }
 0x32a   :  { %6014 = vmatprep.subr.bf16.mxu1 %v6013_v17  ;;  %v1216_v17 = vld [vmem:[#allocation9 + $0x698] sm:$0xff]  ;;  %v1728_v8 = vld [vmem:[#allocation12 + $0x6a0] sm:$0xff] }
 0x32b   :  { %v6053_v19 = vpack.c.bf16 %v1216_v17, %v1214_v16  ;;  %v1241_v17 = vld [vmem:[#allocation9 + $0x760] sm:$0xff] }
 0x32d   :  { %6016 = vmatpush1.bf16.msra.mxu1 %v6015_v24  ;;  %v6055_v24 = vpack.c.bf16 %v1215_v21, %v1213_v20  ;;  %v1122_v20 = vld [vmem:[#allocation3 + $0x28] sm:$0x3] }
 0x32e   :  { %6018 = vmatprep.subr.bf16.mxu1 %v6017_v25  ;;  %v6057_v25 = vpack.c.bf16 %v1220_v23, %v1218_v22  ;;  %v1149_v23 = vrot.slane %v1122_v20, 2 }
 0x331   :  { %6020 = vmatpush1.bf16.msra.mxu1 %v6019_v30  ;;  %v6059_v30 = vpack.c.bf16 %v1219_v27, %v1217_v26 }
 0x332   :  { %6022 = vmatprep.subr.bf16.mxu1 %v6021_v31  ;;  %v6061_v31 = vpack.c.bf16 %v1224_v29, %v1222_v28 }
 0x335   :  { %6024 = vmatpush1.bf16.msra.mxu1 %v6023_v36  ;;  %v6063_v36 = vpack.c.bf16 %v1223_v33, %v1221_v32  ;;  %v1676_v32 = vld [vmem:[#allocation12 + $0x500] sm:$0xff] }
 0x336   :  { %6026 = vmatprep.subr.bf16.mxu1 %v6025_v37  ;;  %v6065_v37 = vpack.c.bf16 %v1228_v35, %v1226_v34  ;;  %v1680_v34 = vld [vmem:[#allocation12 + $0x520] sm:$0xff]  ;;  %v1685_v35 = vld [vmem:[#allocation12 + $0x548] sm:$0xff] }
 0x339   :  { %6028 = vmatpush1.bf16.msra.mxu1 %v6027_v42  ;;  %v1117_v42 = vld [vmem:[#allocation3] sm:$0xfc] }
 0x33a   :  { %6030 = vmatprep.subr.bf16.mxu1 %v6029_v43  ;;  %v1120_v43 = vld [vmem:[#allocation3 + $0x18] sm:$0x3]  ;;  %v1142_v50 = vrot.slane %v1117_v42, 2  ;;  %v1697_v42 = vld [vmem:[#allocation12 + $0x5a8] sm:$0xff] }
 0x33b   :  { %v1143_v51 = vrot.slane %v1120_v43, 2  ;;  %v6091_v43 = vpack.c.bf16 %v1688_v40, %v1684_v39  ;;  %v1764_v39 = vld [vmem:[#allocation12 + $0x7c0] sm:$0xff] }
 0x33c   :  { %v1768_v40 = vld [vmem:[#allocation12 + $0x7e0] sm:$0xff] }
 0x33d   :  { %6032 = vmatpush1.bf16.msra.mxu1 %v6031_v48  ;;  %v1229_v48 = vld [vmem:[#allocation9 + $0x700] sm:$0xff]  ;;  %v1144_v62 = vsel %vm1141_vm11, %v1142_v50, %v1143_v51 }
 0x33e   :  { %6034 = vmatprep.subr.bf16.mxu1 %v6033_v49  ;;  %v1231_v49 = vld [vmem:[#allocation9 + $0x710] sm:$0xff]  ;;  %v1700_v51 = vld [vmem:[#allocation12 + $0x5c0] sm:$0xff] }
 0x33f   :  { %v6071_v58 = vpack.c.bf16 %v1231_v49, %v1229_v48  ;;  %v1705_v48 = vld [vmem:[#allocation12 + $0x5e8] sm:$0xff] }
 0x341   :  { %6036 = vmatpush1.bf16.msra.mxu1 %v6035_v54  ;;  %v1154_v54 = vrot.slane %v1124_v45, 2  ;;  %v1692_v45 = vld [vmem:[#allocation12 + $0x580] sm:$0xff] }
 0x342   :  { %6038 = vmatprep.subr.bf16.mxu1 %v6037_v55  ;;  %v1155_v55 = vrot.slane %v1127_v46, 2  ;;  %v1696_v46 = vld [vmem:[#allocation12 + $0x5a0] sm:$0xff] }
 0x343   :  { %v6095_v49 = vpack.c.bf16 %v1696_v46, %v1692_v45  ;;  %v1772_v45 = vld [vmem:[#allocation12 + $0x800] sm:$0xff] }
 0x344   :  { %v1776_v46 = vld [vmem:[#allocation12 + $0x820] sm:$0xff] }
 0x345   :  { %6040 = vmatpush1.bf16.msra.mxu1 %v6039_v60  ;;  %v1233_v60 = vld [vmem:[#allocation9 + $0x720] sm:$0xff] }
 0x346   :  { %6042 = vmatprep.subr.bf16.mxu1 %v6041_v61  ;;  %v1235_v61 = vld [vmem:[#allocation9 + $0x730] sm:$0xff] }
 0x347   :  { %v6075_v6 = vpack.c.bf16 %v1235_v61, %v1233_v60  ;;  %v1721_v60 = vld [vmem:[#allocation12 + $0x668] sm:$0xff] }
 0x349   :  { %6044 = vmatpush1.bf16.msra.mxu1 %v6043_v4  ;;  %v1240_v4 = vld [vmem:[#allocation9 + $0x758] sm:$0xff] }
 0x34a   :  { %6046 = vmatprep.subr.bf16.mxu1 %v6045_v5  ;;  %v1156_v5 = vsel %vm1141_vm11, %v1154_v54, %v1155_v55  ;;  %v6077_v7 = vpack.c.bf16 %v1240_v4, %v1238_v3  ;;  %v1713_v54 = vld [vmem:[#allocation12 + $0x628] sm:$0xff]  ;;  %v6099_v55 = vpack.c.bf16 %v1704_v52, %v1700_v51  ;;  %v1780_v51 = vld [vmem:[#allocation12 + $0x840] sm:$0xff] }
 0x34b   :  { %v6101_v56 = vpack.c.bf16 %v1713_v54, %v1709_v53  ;;  %v1725_v3 = vld [vmem:[#allocation12 + $0x688] sm:$0xff]  ;;  %v1784_v54 = vld [vmem:[#allocation12 + $0x860] sm:$0xff] }
 0x34c   :  { %v1729_v4 = vld [vmem:[#allocation12 + $0x6a8] sm:$0xff] }
 0x34d   :  { %6048 = vmatpush1.bf16.msra.mxu1 %v6047_v11  ;;  %v1153_v11 = vsel %vm1141_vm11, %v1151_v63, %v1152_v1  ;;  %v1716_v63 = vld [vmem:[#allocation12 + $0x640] sm:$0xff] }
 0x34e   :  { %6050 = vmatprep.subr.bf16.mxu1 %v6049_v12  ;;  %v1242_v12 = vld [vmem:[#allocation9 + $0x768] sm:$0xff] }
 0x34f   :  { %v6081_v16 = vpack.c.bf16 %v1244_v14, %v1242_v12  ;;  %v1720_v1 = vld [vmem:[#allocation12 + $0x660] sm:$0xff] }
 0x351   :  { %6052 = vmatpush1.bf16.msra.mxu1 %v6051_v18  ;;  %v1243_v18 = vld [vmem:[#allocation9 + $0x770] sm:$0xff] }
 0x352   :  { %6054 = vmatprep.subr.bf16.mxu1 %v6053_v19  ;;  %v1119_v19 = vld [vmem:[#allocation3 + $0x10] sm:$0xfc]  ;;  %v6083_v21 = vpack.c.bf16 %v1243_v18, %v1241_v17  ;;  %v1741_v17 = vld [vmem:[#allocation12 + $0x708] sm:$0xff] }
 0x353   :  { %v1148_v22 = vrot.slane %v1119_v19, 2  ;;  %v1745_v18 = vld [vmem:[#allocation12 + $0x728] sm:$0xff] }
 0x354   :  { %v6117_v20 = vpack.c.bf16 %v1745_v18, %v1741_v17 }
 0x355   :  { %6056 = vmatpush1.bf16.msra.mxu1 %v6055_v24  ;;  %v1125_v24 = vld [vmem:[#allocation3 + $0x40] sm:$0xfc]  ;;  %v1150_v26 = vsel %vm1141_vm11, %v1148_v22, %v1149_v23  ;;  %v1744_v22 = vld [vmem:[#allocation12 + $0x720] sm:$0xff] }
 0x356   :  { %6058 = vmatprep.subr.bf16.mxu1 %v6057_v25  ;;  %v1128_v25 = vld [vmem:[#allocation3 + $0x58] sm:$0x3]  ;;  %v1157_v27 = vrot.slane %v1125_v24, 2  ;;  %v1749_v23 = vld [vmem:[#allocation12 + $0x748] sm:$0xff] }
 0x357   :  { %v1158_v28 = vrot.slane %v1128_v25, 2  ;;  %v1753_v24 = vld [vmem:[#allocation12 + $0x768] sm:$0xff] }
 0x359   :  { %6060 = vmatpush1.bf16.msra.mxu1 %v6059_v30  ;;  %v1159_v29 = vsel %vm1141_vm11, %v1157_v27, %v1158_v28  ;;  %v1677_v30 = vld [vmem:[#allocation12 + $0x508] sm:$0xff]  ;;  %v1748_v27 = vld [vmem:[#allocation12 + $0x740] sm:$0xff] }
 0x35a   :  { %6062 = vmatprep.subr.bf16.mxu1 %v6061_v31  ;;  %v1681_v31 = vld [vmem:[#allocation12 + $0x528] sm:$0xff]  ;;  %v1752_v28 = vld [vmem:[#allocation12 + $0x760] sm:$0xff] }
 0x35b   :  { %v6085_v33 = vpack.c.bf16 %v1681_v31, %v1677_v30  ;;  %v1761_v30 = vld [vmem:[#allocation12 + $0x7a8] sm:$0xff]  ;;  %v6123_v31 = vpack.c.bf16 %v1752_v28, %v1748_v27 }
 0x35d   :  { %6064 = vmatpush1.bf16.msra.mxu1 %v6063_v36  ;;  %v1689_v36 = vld [vmem:[#allocation12 + $0x568] sm:$0xff]  ;;  %6086 = vmatprep.subr.bf16.mxu0 %v6085_v33  ;;  %v1756_v33 = vld [vmem:[#allocation12 + $0x780] sm:$0xff] }
 0x35e   :  { %6066 = vmatprep.subr.bf16.mxu1 %v6065_v37  ;;  %v6087_v37 = vpack.c.bf16 %v1680_v34, %v1676_v32  ;;  %v6089_v38 = vpack.c.bf16 %v1689_v36, %v1685_v35  ;;  %v1760_v34 = vld [vmem:[#allocation12 + $0x7a0] sm:$0xff]  ;;  %v1765_v35 = vld [vmem:[#allocation12 + $0x7c8] sm:$0xff] }
 0x35f   :  { %v1769_v36 = vld [vmem:[#allocation12 + $0x7e8] sm:$0xff] }
 0x360   :  { %6088 = vmatpush1.bf16.msra.mxu0 %v6087_v37  ;;  %v6127_v37 = vpack.c.bf16 %v1760_v34, %v1756_v33 }
 0x361   :  { %6068 = vmatpush1.bf16.msra.mxu1 %v6067_v44  ;;  %6090 = vmatprep.subr.bf16.mxu0 %v6089_v38  ;;  %v6093_v44 = vpack.c.bf16 %v1697_v42, %v1693_v41  ;;  %v6129_v38 = vpack.c.bf16 %v1769_v36, %v1765_v35  ;;  %v1773_v41 = vld [vmem:[#allocation12 + $0x808] sm:$0xff]  ;;  %v1804_v36 = vld [vmem:[#allocation12 + $0x900] sm:$0xff] }
 0x362   :  { %6070 = vmatprep.subr.bf16.mxu1 %v6069_v47  ;;  %v1701_v47 = vld [vmem:[#allocation12 + $0x5c8] sm:$0xff] }
 0x363   :  { %v6097_v50 = vpack.c.bf16 %v1705_v48, %v1701_v47  ;;  %v1777_v42 = vld [vmem:[#allocation12 + $0x828] sm:$0xff]  ;;  %v6135_v47 = vpack.c.bf16 %v1776_v46, %v1772_v45  ;;  %v1407_v48 = vld [vmem:[#allocation10] sm:$0x3] }
 0x364   :  { %1314 = vmatmul.mubr.f32.vlgmr.msra.gmra.mrb[4].mxu1 %v1144_v62  ;;  %6092 = vmatpush1.bf16.msra.mxu0 %v6091_v43  ;;  %v6131_v43 = vpack.c.bf16 %v1768_v40, %v1764_v39  ;;  %v1412_v52 = vrot.slane %v1407_v48, %v7826_v10  ;;  %v1817_v39 = vld [vmem:[#allocation12 + $0x968] sm:$0xff] }
 0x365   :  { %1319 = vmatprep.mubr.f32.mxu1 %v1156_v5  ;;  %6072 = vmatpush1.bf16.msra.mxu1 %v6071_v58  ;;  %v1712_v58 = vld [vmem:[#allocation12 + $0x620] sm:$0xff]  ;;  %v6107_v5 = vpack.c.bf16 %v1720_v1, %v1716_v63 }
 0x366   :  { %6074 = vmatprep.subr.bf16.mxu1 %v6073_v59  ;;  %6094 = vmatprep.subr.bf16.mxu0 %v6093_v44  ;;  %v1717_v59 = vld [vmem:[#allocation12 + $0x648] sm:$0xff]  ;;  %v6103_v61 = vpack.c.bf16 %v1712_v58, %v1708_v57  ;;  %v6133_v44 = vpack.c.bf16 %v1777_v42, %v1773_v41  ;;  %v1792_v1 = vld [vmem:[#allocation12 + $0x8a0] sm:$0xff] }
 0x367   :  { %v6105_v62 = vpack.c.bf16 %v1721_v60, %v1717_v59  ;;  %v1789_v58 = vld [vmem:[#allocation12 + $0x888] sm:$0xff]  ;;  %v1788_v60 = vld [vmem:[#allocation12 + $0x880] sm:$0xff] }
 0x368   :  { %1320 = vmatmul.mubr.f32.gmra.mrb[6].mxu1 %v1153_v11  ;;  %6096 = vmatpush1.bf16.msra.mxu0 %v6095_v49  ;;  %v1737_v11 = vld [vmem:[#allocation12 + $0x6e8] sm:$0xff] }
 0x369   :  { %6076 = vmatpush1.bf16.msra.mxu1 %v6075_v6  ;;  %1390 = vmatprep.mubr.f32.mxu1 %v7539_v0  ;;  %v6109_v6 = vpack.c.bf16 %v1729_v4, %v1725_v3  ;;  %v6113_v14 = vpack.c.bf16 %v1737_v11, %v1733_v9  ;;  %v1781_v49 = vld [vmem:[#allocation12 + $0x848] sm:$0xff]  ;;  %v1800_v9 = vld [vmem:[#allocation12 + $0x8e0] sm:$0xff] }
 0x36a   :  { %6078 = vmatprep.subr.bf16.mxu1 %v6077_v7  ;;  %6098 = vmatprep.subr.bf16.mxu0 %v6097_v50  ;;  %v1724_v7 = vld [vmem:[#allocation12 + $0x680] sm:$0xff]  ;;  %v1785_v50 = vld [vmem:[#allocation12 + $0x868] sm:$0xff] }
 0x36b   :  { %v6111_v12 = vpack.c.bf16 %v1728_v8, %v1724_v7  ;;  %v6137_v53 = vpack.c.bf16 %v1785_v50, %v1781_v49  ;;  %v1793_v59 = vld [vmem:[#allocation12 + $0x8a8] sm:$0xff]  ;;  %v1796_v8 = vld [vmem:[#allocation12 + $0x8c0] sm:$0xff] }
 0x36c   :  { %6100 = vmatpush1.bf16.msra.mxu0 %v6099_v55  ;;  %v1416_v55 = vrot.slane %v1407_v48, %v7829_v13  ;;  %v6141_v63 = vpack.c.bf16 %v1793_v59, %v1789_v58  ;;  %v1797_v3 = vld [vmem:[#allocation12 + $0x8c8] sm:$0xff]  ;;  %v1812_v49 = vld [vmem:[#allocation12 + $0x940] sm:$0xff] }
 0x36d   :  { %6080 = vmatpush1.bf16.msra.mxu1 %v6079_v15  ;;  %6102 = vmatprep.subr.bf16.mxu0 %v6101_v56  ;;  %v1732_v15 = vld [vmem:[#allocation12 + $0x6c0] sm:$0xff]  ;;  %v6139_v56 = vpack.c.bf16 %v1784_v54, %v1780_v51  ;;  %v1801_v4 = vld [vmem:[#allocation12 + $0x8e8] sm:$0xff] }
 0x36e   :  { %6082 = vmatprep.subr.bf16.mxu1 %v6081_v16  ;;  %v1736_v16 = vld [vmem:[#allocation12 + $0x6e0] sm:$0xff]  ;;  %v6145_v7 = vpack.c.bf16 %v1801_v4, %v1797_v3  ;;  %v1825_v54 = vld [vmem:[#allocation12 + $0x9a8] sm:$0xff] }
 0x36f   :  { %v6115_v19 = vpack.c.bf16 %v1736_v16, %v1732_v15  ;;  %v6147_v15 = vpack.c.bf16 %v1800_v9, %v1796_v8  ;;  %v1820_v3 = vld [vmem:[#allocation12 + $0x980] sm:$0xff] }
 0x370   :  { %6104 = vmatpush1.bf16.msra.mxu0 %v6103_v61  ;;  %v1824_v4 = vld [vmem:[#allocation12 + $0x9a0] sm:$0xff] }
 0x371   :  { %6084 = vmatpush1.bf16.msra.mxu1 %v6083_v21  ;;  %6106 = vmatprep.subr.bf16.mxu0 %v6105_v62  ;;  %v1740_v21 = vld [vmem:[#allocation12 + $0x700] sm:$0xff]  ;;  %v6159_v8 = vpack.c.bf16 %v1824_v4, %v1820_v3  ;;  %v1726_v4 = vld [vmem:[#allocation12 + $0x690] sm:$0xff] }
 0x372   :  { %v6119_v25 = vpack.c.bf16 %v1744_v22, %v1740_v21  ;;  %v1805_v22 = vld [vmem:[#allocation12 + $0x908] sm:$0xff] }
 0x374   :  { %5133 = vmatmul.mubr.msk.f32.vlgmr.msra.gmra.mrb[4].mxu1 %vm532_vm3, %v1150_v26  ;;  %6108 = vmatpush1.bf16.msra.mxu0 %v6107_v5  ;;  %v6121_v26 = vpack.c.bf16 %v1753_v24, %v1749_v23  ;;  %v1809_v23 = vld [vmem:[#allocation12 + $0x928] sm:$0xff] }
 0x375   :  { %1396 = vmatprep.mubr.f32.mxu1 %v7539_v0  ;;  %6110 = vmatprep.subr.bf16.mxu0 %v6109_v6  ;;  %v6143_v6 = vpack.c.bf16 %v1792_v1, %v1788_v60 }
 0x378   :  { %5134 = vmatmul.mubr.msk.f32.gmra.mrb[6].mxu1 %vm532_vm3, %v1159_v29  ;;  %6112 = vmatpush1.bf16.msra.mxu0 %v6111_v12  ;;  %v1757_v29 = vld [vmem:[#allocation12 + $0x788] sm:$0xff] }
 0x379   :  { %6114 = vmatprep.subr.bf16.mxu0 %v6113_v14  ;;  %v6125_v32 = vpack.c.bf16 %v1761_v30, %v1757_v29 }
 0x37c   :  { %6116 = vmatpush1.bf16.msra.mxu0 %v6115_v19 }
 0x37d   :  { %6118 = vmatprep.subr.bf16.mxu0 %v6117_v20 }
 0x380   :  { %6120 = vmatpush1.bf16.msra.mxu0 %v6119_v25  ;;  %v6149_v25 = vpack.c.bf16 %v1809_v23, %v1805_v22 }
 0x381   :  { %6122 = vmatprep.subr.bf16.mxu0 %v6121_v26 }
 0x384   :  { %6124 = vmatpush1.bf16.msra.mxu0 %v6123_v31 }
 0x385   :  { %6126 = vmatprep.subr.bf16.mxu0 %v6125_v32 }
 0x388   :  { %6128 = vmatpush1.bf16.msra.mxu0 %v6127_v37  ;;  %v1808_v37 = vld [vmem:[#allocation12 + $0x920] sm:$0xff] }
 0x389   :  { %6130 = vmatprep.subr.bf16.mxu0 %v6129_v38  ;;  %v1813_v38 = vld [vmem:[#allocation12 + $0x948] sm:$0xff]  ;;  %v6151_v46 = vpack.c.bf16 %v1808_v37, %v1804_v36  ;;  %v1699_v36 = vld [vmem:[#allocation12 + $0x5b8] sm:$0xff] }
 0x38a   :  { %v6153_v51 = vpack.c.bf16 %v1817_v39, %v1813_v38  ;;  %v1694_v39 = vld [vmem:[#allocation12 + $0x590] sm:$0xff] }
 0x38c   :  { %6132 = vmatpush1.bf16.msra.mxu0 %v6131_v43 }
 0x38d   :  { %6134 = vmatprep.subr.bf16.mxu0 %v6133_v44 }
 0x390   :  { %6136 = vmatpush1.bf16.msra.mxu0 %v6135_v47 }
 0x391   :  { %6138 = vmatprep.subr.bf16.mxu0 %v6137_v53  ;;  %v1821_v53 = vld [vmem:[#allocation12 + $0x988] sm:$0xff] }
 0x392   :  { %v6157_v1 = vpack.c.bf16 %v1825_v54, %v1821_v53  ;;  %v1710_v53 = vld [vmem:[#allocation12 + $0x610] sm:$0xff] }
 0x393   :  { %v1714_v54 = vld [vmem:[#allocation12 + $0x630] sm:$0xff] }
 0x394   :  { %6140 = vmatpush1.bf16.msra.mxu0 %v6139_v56 }
 0x395   :  { %6142 = vmatprep.subr.bf16.mxu0 %v6141_v63 }
 0x398   :  { %6144 = vmatpush1.bf16.msra.mxu0 %v6143_v6  ;;  %v1829_v6 = vld [vmem:[#allocation12 + $0x9c8] sm:$0xff] }
 0x399   :  { %6146 = vmatprep.subr.bf16.mxu0 %v6145_v7  ;;  %v1833_v7 = vld [vmem:[#allocation12 + $0x9e8] sm:$0xff] }
 0x39a   :  { %v6161_v9 = vpack.c.bf16 %v1833_v7, %v1829_v6  ;;  %v1730_v6 = vld [vmem:[#allocation12 + $0x6b0] sm:$0xff]  ;;  %v1735_v7 = vld [vmem:[#allocation12 + $0x6d8] sm:$0xff] }
 0x39c   :  { %6148 = vmatpush1.bf16.msra.mxu0 %v6147_v15  ;;  %v1683_v15 = vld [vmem:[#allocation12 + $0x538] sm:$0xff] }
 0x39d   :  { %6150 = vmatprep.subr.bf16.mxu0 %v6149_v25  ;;  %v1691_v25 = vld [vmem:[#allocation12 + $0x578] sm:$0xff] }
 0x447   :  { %v1392_v57 = vpop.f32.mrb[4].mxu1 }
 0x448   :  { %v1419_v61 = vadd.f32 %v1412_v52, %v1392_v57  ;;  %v1394_v62 = vpop.f32.mrb[5].mxu1 }
 0x449   :  { %v1420_v5 = vadd.f32 %v1416_v55, %v1394_v62 }
 0x44a   :  { %v1423_v11 = vmax.f32 %v1419_v61, 0.0 }
 0x44b   :  { %v1424_v12 = vmax.f32 %v1420_v5, 0.0  ;;  %v1398_v14 = vpop.f32.mrb[6].mxu1 }
 0x44c   :  { %v1421_v16 = vadd.f32 %v1412_v52, %v1398_v14  ;;  %v1400_v17 = vpop.f32.mrb[7].mxu1  ;;  %v1431_v18 = vrot.slane %v1423_v11, 7  ;;  %v1816_v52 = vld [vmem:[#allocation12 + $0x960] sm:$0xff]  ;;  %v1679_v14 = vld [vmem:[#allocation12 + $0x518] sm:$0xff] }
 0x44d   :  { %v1422_v19 = vadd.f32 %v1416_v55, %v1400_v17  ;;  %v1432_v20 = vrot.slane %v1424_v12, 7  ;;  %v6155_v62 = vpack.c.bf16 %v1816_v52, %v1812_v49  ;;  %v1828_v11 = vld [vmem:[#allocation12 + $0x9c0] sm:$0xff]  ;;  %v1715_v49 = vld [vmem:[#allocation12 + $0x638] sm:$0xff] }
 0x44e   :  { %v1425_v21 = vmax.f32 %v1421_v16, 0.0  ;;  %1435 = vrot.lane.b32.xlu0 %v1431_v18, %s7534_s11  ;;  %v1832_v12 = vld [vmem:[#allocation12 + $0x9e0] sm:$0xff] }
 0x44f   :  { %v1426_v24 = vmax.f32 %v1422_v19, 0.0  ;;  %1437 = vrot.lane.b32.xlu1 %v1432_v20, %s7534_s11  ;;  %v6163_v18 = vpack.c.bf16 %v1832_v12, %v1828_v11  ;;  %v6165_v19 = vpack.c.bf16 %v1683_v15, %v1679_v14  ;;  %v1678_v20 = vld [vmem:[#allocation12 + $0x510] sm:$0xff]  ;;  %v1743_v15 = vld [vmem:[#allocation12 + $0x718] sm:$0xff] }
 0x450   :  { %v1433_v26 = vrot.slane %v1425_v21, 7  ;;  %v1682_v21 = vld [vmem:[#allocation12 + $0x530] sm:$0xff] }
 0x451   :  { %v1434_v27 = vrot.slane %v1426_v24, 7  ;;  %v1687_v24 = vld [vmem:[#allocation12 + $0x558] sm:$0xff]  ;;  %v1734_v12 = vld [vmem:[#allocation12 + $0x6d0] sm:$0xff] }
 0x452   :  { %1439 = vrot.lane.b32.xlu0 %v1433_v26, %s7534_s11  ;;  %v1738_v14 = vld [vmem:[#allocation12 + $0x6f0] sm:$0xff] }
 0x453   :  { %1441 = vrot.lane.b32.xlu1 %v1434_v27, %s7534_s11 }
 0x4c0   :  { %v1436_v28 = vpop.permute.xlu0 %1435 }
 0x4c1   :  { %1451 = vst.msk [vmem:[#allocation3] sm:$0xfe] %vm569_vm5, %v1436_v28  ;;  %v1438_v29 = vpop.permute.xlu1 %1437 }
 0x4c2   :  { %1454 = vst.msk [vmem:[#allocation3 + $0x18] sm:$0x1] %vm574_vm6, %v1436_v28  ;;  %v1443_v30 = vsel %vm560_vm7, %v1436_v28, %v1438_v29  ;;  %v6167_v28 = vpack.c.bf16 %v1682_v21, %v1678_v20  ;;  %v1746_v20 = vld [vmem:[#allocation12 + $0x730] sm:$0xff]  ;;  %v1751_v21 = vld [vmem:[#allocation12 + $0x758] sm:$0xff] }
 0x4c3   :  { %1453 = vst.msk [vmem:[#allocation3 + $0x10] sm:$0xfe] %vm572_vm8, %v1438_v29  ;;  %1452 = vst [vmem:[#allocation3 + $0x8] sm:$0xfe] %v1443_v30 }
 0x4c4   :  { %1456 = vst.msk [vmem:[#allocation3 + $0x28] sm:$0x1] %vm577_vm9, %v1438_v29  ;;  %1455 = vst [vmem:[#allocation3 + $0x20] sm:$0x1] %v1443_v30  ;;  %v1440_v31 = vpop.permute.xlu0 %1439  ;;  %v6169_v29 = vpack.c.bf16 %v1691_v25, %v1687_v24  ;;  %v1686_v30 = vld [vmem:[#allocation12 + $0x550] sm:$0xff] }
 0x4c5   :  { %1457 = vst.msk [vmem:[#allocation3 + $0x30] sm:$0xfe] %vm569_vm5, %v1440_v31  ;;  %v1442_v32 = vpop.permute.xlu1 %1441  ;;  %v1750_v25 = vld [vmem:[#allocation12 + $0x750] sm:$0xff] }
 0x4c6   :  { %1460 = vst.msk [vmem:[#allocation3 + $0x48] sm:$0x1] %vm574_vm6, %v1440_v31  ;;  %v1444_v33 = vsel %vm560_vm7, %v1440_v31, %v1442_v32  ;;  %v1690_v31 = vld [vmem:[#allocation12 + $0x570] sm:$0xff] }
 0x4c7   :  { %1459 = vst.msk [vmem:[#allocation3 + $0x40] sm:$0xfe] %vm572_vm8, %v1442_v32  ;;  %1458 = vst [vmem:[#allocation3 + $0x38] sm:$0xfe] %v1444_v33  ;;  %v6171_v37 = vpack.c.bf16 %v1690_v31, %v1686_v30  ;;  %v1758_v31 = vld [vmem:[#allocation12 + $0x790] sm:$0xff] }
 0x4c8   :  { %1462 = vst.msk [vmem:[#allocation3 + $0x58] sm:$0x1] %vm577_vm9, %v1442_v32  ;;  %1461 = vst [vmem:[#allocation3 + $0x50] sm:$0x1] %v1444_v33  ;;  %v1629_v34 = vld [vmem:[#allocation3] sm:$0xfe] }
 0x4c9   :  { %v1632_v35 = vld [vmem:[#allocation3 + $0x18] sm:$0x1]  ;;  %v1653_v42 = vrot.slane %v1629_v34, 1 }
 0x4ca   :  { %v1630_v40 = vld [vmem:[#allocation3 + $0x8] sm:$0xfe]  ;;  %v1654_v43 = vrot.slane %v1632_v35, 1  ;;  %v1631_v16 = vld [vmem:[#allocation3 + $0x10] sm:$0xfe] }
 0x4cb   :  { %v1633_v41 = vld [vmem:[#allocation3 + $0x20] sm:$0x1]  ;;  %v1656_v44 = vrot.slane %v1630_v40, 1  ;;  %v1634_v17 = vld [vmem:[#allocation3 + $0x28] sm:$0x1]  ;;  %v1659_v22 = vrot.slane %v1631_v16, 1 }
 0x4cc   :  { %v1657_v45 = vrot.slane %v1633_v41, 1  ;;  %v1635_v47 = vld [vmem:[#allocation3 + $0x30] sm:$0xfe]  ;;  %v7898_v55 = vsel %vm695_vm10, %v1653_v42, %v1654_v43  ;;  %v1660_v23 = vrot.slane %v1634_v17, 1  ;;  %v1698_v40 = vld [vmem:[#allocation12 + $0x5b0] sm:$0xff]  ;;  %v6195_v17 = vpack.c.bf16 %v1738_v14, %v1734_v12 }
 0x4cd   :  { %v1638_v48 = vld [vmem:[#allocation3 + $0x48] sm:$0x1]  ;;  %v1662_v58 = vrot.slane %v1635_v47, 1  ;;  %v1695_v35 = vld [vmem:[#allocation12 + $0x598] sm:$0xff] }
 0x4ce   :  { %v7894_v50 = vsel %vm695_vm10, %v1656_v44, %v1657_v45  ;;  %v1636_v56 = vld [vmem:[#allocation3 + $0x38] sm:$0xfe]  ;;  %v1663_v59 = vrot.slane %v1638_v48, 1  ;;  %v1637_v26 = vld [vmem:[#allocation3 + $0x40] sm:$0xfe]  ;;  %v7911_v32 = vsel %vm695_vm10, %v1659_v22, %v1660_v23  ;;  %v6173_v38 = vpack.c.bf16 %v1699_v36, %v1695_v35  ;;  %v1703_v42 = vld [vmem:[#allocation12 + $0x5d8] sm:$0xff] }
 0x4cf   :  { %1904 = vmatprep.mubr.f32.mxu0 %v7894_v50  ;;  %v1639_v57 = vld [vmem:[#allocation3 + $0x50] sm:$0x1]  ;;  %v1665_v60 = vrot.slane %v1636_v56, 1  ;;  %v1640_v27 = vld [vmem:[#allocation3 + $0x58] sm:$0x1]  ;;  %v1668_v33 = vrot.slane %v1637_v26, 1  ;;  %v6175_v44 = vpack.c.bf16 %v1698_v40, %v1694_v39 }
 0x4d0   :  { %1905 = vmatmul.mubr.f32.vlgmr.msra.gmra.mrb[4].mxu0 %v7898_v55  ;;  %v1666_v61 = vrot.slane %v1639_v57, 1  ;;  %v7906_v5 = vsel %vm695_vm10, %v1662_v58, %v1663_v59  ;;  %v1669_v34 = vrot.slane %v1640_v27, 1  ;;  %v1707_v43 = vld [vmem:[#allocation12 + $0x5f8] sm:$0xff]  ;;  %v1706_v47 = vld [vmem:[#allocation12 + $0x5f0] sm:$0xff]  ;;  %v6183_v58 = vpack.c.bf16 %v1714_v54, %v1710_v53 }
 0x4d1   :  { %6152 = vmatpush1.bf16.msra.mxu0 %v6151_v46  ;;  %v6177_v45 = vpack.c.bf16 %v1707_v43, %v1703_v42  ;;  %v1702_v46 = vld [vmem:[#allocation12 + $0x5d0] sm:$0xff]  ;;  %v1711_v48 = vld [vmem:[#allocation12 + $0x618] sm:$0xff] }
 0x4d2   :  { %v7902_v63 = vsel %vm695_vm10, %v1665_v60, %v1666_v61  ;;  %6154 = vmatprep.subr.bf16.mxu0 %v6153_v51  ;;  %v7917_v41 = vsel %vm695_vm10, %v1668_v33, %v1669_v34  ;;  %v6179_v51 = vpack.c.bf16 %v1706_v47, %v1702_v46  ;;  %v6181_v52 = vpack.c.bf16 %v1715_v49, %v1711_v48  ;;  %v1719_v56 = vld [vmem:[#allocation12 + $0x658] sm:$0xff]  ;;  %v1722_v60 = vld [vmem:[#allocation12 + $0x670] sm:$0xff] }
 0x4d3   :  { %1910 = vmatprep.mubr.f32.mxu0 %v7902_v63  ;;  %v1723_v57 = vld [vmem:[#allocation12 + $0x678] sm:$0xff]  ;;  %v1754_v26 = vld [vmem:[#allocation12 + $0x770] sm:$0xff] }
 0x4d4   :  { %1911 = vmatmul.mubr.f32.gmra.mrb[6].mxu0 %v7906_v5  ;;  %v6185_v59 = vpack.c.bf16 %v1723_v57, %v1719_v56  ;;  %v1727_v61 = vld [vmem:[#allocation12 + $0x698] sm:$0xff]  ;;  %v1762_v33 = vld [vmem:[#allocation12 + $0x7b0] sm:$0xff] }
 0x4d5   :  { %6156 = vmatpush1.bf16.msra.mxu0 %v6155_v62  ;;  %1981 = vmatprep.mubr.f32.mxu0 %v7539_v0  ;;  %v1731_v62 = vld [vmem:[#allocation12 + $0x6b8] sm:$0xff]  ;;  %v6207_v36 = vpack.c.bf16 %v1762_v33, %v1758_v31  ;;  %v1770_v39 = vld [vmem:[#allocation12 + $0x7f0] sm:$0xff]  ;;  %v1470_v31 = vld [vmem:[#allocation12 + $0x8] sm:$0xff] }
 0x4d6   :  { %6158 = vmatprep.subr.bf16.mxu0 %v6157_v1  ;;  %v6189_v3 = vpack.c.bf16 %v1731_v62, %v1727_v61  ;;  %v1747_v16 = vld [vmem:[#allocation12 + $0x738] sm:$0xff]  ;;  %v1778_v46 = vld [vmem:[#allocation12 + $0x830] sm:$0xff] }
 0x4d7   :  { %v1755_v22 = vld [vmem:[#allocation12 + $0x778] sm:$0xff]  ;;  %v1786_v53 = vld [vmem:[#allocation12 + $0x870] sm:$0xff] }
 0x4d8   :  { %v6201_v24 = vpack.c.bf16 %v1755_v22, %v1751_v21  ;;  %v1759_v27 = vld [vmem:[#allocation12 + $0x798] sm:$0xff]  ;;  %v1810_v12 = vld [vmem:[#allocation12 + $0x930] sm:$0xff] }
 0x4d9   :  { %6160 = vmatpush1.bf16.msra.mxu0 %v6159_v8  ;;  %v1739_v8 = vld [vmem:[#allocation12 + $0x6f8] sm:$0xff] }
 0x4da   :  { %6162 = vmatprep.subr.bf16.mxu0 %v6161_v9  ;;  %v6191_v9 = vpack.c.bf16 %v1730_v6, %v1726_v4  ;;  %v6193_v11 = vpack.c.bf16 %v1739_v8, %v1735_v7  ;;  %v1767_v34 = vld [vmem:[#allocation12 + $0x7d8] sm:$0xff]  ;;  %v1802_v4 = vld [vmem:[#allocation12 + $0x8f0] sm:$0xff] }
 0x4db   :  { %v1771_v35 = vld [vmem:[#allocation12 + $0x7f8] sm:$0xff] }
 0x4dc   :  { %v1775_v40 = vld [vmem:[#allocation12 + $0x818] sm:$0xff] }
 0x4dd   :  { %6164 = vmatpush1.bf16.msra.mxu0 %v6163_v18  ;;  %v6197_v18 = vpack.c.bf16 %v1747_v16, %v1743_v15  ;;  %v1779_v42 = vld [vmem:[#allocation12 + $0x838] sm:$0xff] }
 0x4de   :  { %6166 = vmatprep.subr.bf16.mxu0 %v6165_v19  ;;  %v1742_v19 = vld [vmem:[#allocation12 + $0x710] sm:$0xff]  ;;  %v1783_v47 = vld [vmem:[#allocation12 + $0x858] sm:$0xff] }
 0x4df   :  { %v6199_v23 = vpack.c.bf16 %v1746_v20, %v1742_v19  ;;  %v1787_v48 = vld [vmem:[#allocation12 + $0x878] sm:$0xff]  ;;  %v1818_v19 = vld [vmem:[#allocation12 + $0x970] sm:$0xff] }
 0x4e0   :  { %5135 = vmatmul.mubr.msk.f32.vlgmr.msra.gmra.mrb[4].mxu0 %vm532_vm3, %v7911_v32  ;;  %v1791_v54 = vld [vmem:[#allocation12 + $0x898] sm:$0xff] }
 0x4e1   :  { %6168 = vmatpush1.bf16.msra.mxu0 %v6167_v28  ;;  %1987 = vmatprep.mubr.f32.mxu0 %v7539_v0  ;;  %v1763_v28 = vld [vmem:[#allocation12 + $0x7b8] sm:$0xff] }
 0x4e2   :  { %6170 = vmatprep.subr.bf16.mxu0 %v6169_v29  ;;  %v6203_v29 = vpack.c.bf16 %v1754_v26, %v1750_v25  ;;  %v6205_v30 = vpack.c.bf16 %v1763_v28, %v1759_v27  ;;  %v1795_v56 = vld [vmem:[#allocation12 + $0x8b8] sm:$0xff]  ;;  %v1826_v25 = vld [vmem:[#allocation12 + $0x9b0] sm:$0xff] }
 0x4e3   :  { %v1803_v61 = vld [vmem:[#allocation12 + $0x8f8] sm:$0xff] }
 0x4e4   :  { %5136 = vmatmul.mubr.msk.f32.gmra.mrb[6].mxu0 %vm532_vm3, %v7917_v41  ;;  %v1807_v6 = vld [vmem:[#allocation12 + $0x918] sm:$0xff] }
 0x4e5   :  { %6172 = vmatpush1.bf16.msra.mxu0 %v6171_v37  ;;  %2058 = vmatprep.mubr.f32.mxu0 %v7894_v50  ;;  %v1718_v50 = vld [vmem:[#allocation12 + $0x650] sm:$0xff]  ;;  %v6209_v37 = vpack.c.bf16 %v1771_v35, %v1767_v34  ;;  %v1811_v7 = vld [vmem:[#allocation12 + $0x938] sm:$0xff]  ;;  %v1469_v35 = vld [vmem:[#allocation12] sm:$0xff] }
 0x4e6   :  { %6174 = vmatprep.subr.bf16.mxu0 %v6173_v38  ;;  %v6187_v1 = vpack.c.bf16 %v1722_v60, %v1718_v50  ;;  %v1766_v38 = vld [vmem:[#allocation12 + $0x7d0] sm:$0xff]  ;;  %v1799_v60 = vld [vmem:[#allocation12 + $0x8d8] sm:$0xff] }
 0x4e7   :  { %v6211_v43 = vpack.c.bf16 %v1770_v39, %v1766_v38  ;;  %v1794_v50 = vld [vmem:[#allocation12 + $0x8b0] sm:$0xff]  ;;  %v1815_v14 = vld [vmem:[#allocation12 + $0x958] sm:$0xff]  ;;  %v1482_v38 = vld [vmem:[#allocation12 + $0x68] sm:$0xff] }
 0x4e8   :  { %v1819_v15 = vld [vmem:[#allocation12 + $0x978] sm:$0xff] }
 0x4e9   :  { %6176 = vmatpush1.bf16.msra.mxu0 %v6175_v44  ;;  %v6213_v44 = vpack.c.bf16 %v1779_v42, %v1775_v40  ;;  %v1823_v20 = vld [vmem:[#allocation12 + $0x998] sm:$0xff]  ;;  %v1477_v40 = vld [vmem:[#allocation12 + $0x40] sm:$0xff] }
 0x4ea   :  { %6178 = vmatprep.subr.bf16.mxu0 %v6177_v45  ;;  %v1774_v45 = vld [vmem:[#allocation12 + $0x810] sm:$0xff]  ;;  %v1827_v21 = vld [vmem:[#allocation12 + $0x9b8] sm:$0xff]  ;;  %v1481_v42 = vld [vmem:[#allocation12 + $0x60] sm:$0xff] }
 0x4eb   :  { %v6215_v49 = vpack.c.bf16 %v1778_v46, %v1774_v45  ;;  %v1831_v26 = vld [vmem:[#allocation12 + $0x9d8] sm:$0xff]  ;;  %v6251_v45 = vpack.c.bf16 %v1481_v42, %v1477_v40  ;;  %v1557_v42 = vld [vmem:[#allocation12 + $0x2c0] sm:$0xff] }
 0x4ec   :  { %v1835_v27 = vld [vmem:[#allocation12 + $0x9f8] sm:$0xff] }
 0x4ed   :  { %6180 = vmatpush1.bf16.msra.mxu0 %v6179_v51  ;;  %v6217_v51 = vpack.c.bf16 %v1787_v48, %v1783_v47  ;;  %v1485_v47 = vld [vmem:[#allocation12 + $0x80] sm:$0xff] }
 0x4ee   :  { %6182 = vmatprep.subr.bf16.mxu0 %v6181_v52  ;;  %v1782_v52 = vld [vmem:[#allocation12 + $0x850] sm:$0xff]  ;;  %v1489_v48 = vld [vmem:[#allocation12 + $0xa0] sm:$0xff] }
 0x4ef   :  { %v6219_v57 = vpack.c.bf16 %v1786_v53, %v1782_v52  ;;  %v7931_v52 = vld [vmem:[#allocation3 + $0x8] sm:$0xff]  ;;  %v6255_v53 = vpack.c.bf16 %v1489_v48, %v1485_v47  ;;  %v1565_v48 = vld [vmem:[#allocation12 + $0x300] sm:$0xff] }
 0x4f1   :  { %6184 = vmatpush1.bf16.msra.mxu0 %v6183_v58  ;;  %v6221_v58 = vpack.c.bf16 %v1795_v56, %v1791_v54  ;;  %v1493_v54 = vld [vmem:[#allocation12 + $0xc0] sm:$0xff] }
 0x4f2   :  { %6186 = vmatprep.subr.bf16.mxu0 %v6185_v59  ;;  %v1790_v59 = vld [vmem:[#allocation12 + $0x890] sm:$0xff]  ;;  %v1497_v56 = vld [vmem:[#allocation12 + $0xe0] sm:$0xff] }
 0x4f3   :  { %v6223_v62 = vpack.c.bf16 %v1794_v50, %v1790_v59  ;;  %v6259_v59 = vpack.c.bf16 %v1497_v56, %v1493_v54  ;;  %v1573_v56 = vld [vmem:[#allocation12 + $0x340] sm:$0xff] }
 0x4f5   :  { %6188 = vmatpush1.bf16.msra.mxu0 %v6187_v1  ;;  %v6225_v1 = vpack.c.bf16 %v1803_v61, %v1799_v60  ;;  %v1501_v60 = vld [vmem:[#allocation12 + $0x100] sm:$0xff] }
 0x4f6   :  { %6190 = vmatprep.subr.bf16.mxu0 %v6189_v3  ;;  %v1798_v3 = vld [vmem:[#allocation12 + $0x8d0] sm:$0xff]  ;;  %v1505_v61 = vld [vmem:[#allocation12 + $0x120] sm:$0xff] }
 0x4f7   :  { %v6227_v8 = vpack.c.bf16 %v1802_v4, %v1798_v3  ;;  %v1509_v4 = vld [vmem:[#allocation12 + $0x140] sm:$0xff] }
 0x4f9   :  { %6192 = vmatpush1.bf16.msra.mxu0 %v6191_v9  ;;  %v6229_v9 = vpack.c.bf16 %v1811_v7, %v1807_v6  ;;  %v1513_v6 = vld [vmem:[#allocation12 + $0x160] sm:$0xff]  ;;  %v1518_v7 = vld [vmem:[#allocation12 + $0x188] sm:$0xff] }
 0x4fa   :  { %6194 = vmatprep.subr.bf16.mxu0 %v6193_v11  ;;  %v1806_v11 = vld [vmem:[#allocation12 + $0x910] sm:$0xff] }
 0x4fb   :  { %v6231_v16 = vpack.c.bf16 %v1810_v12, %v1806_v11  ;;  %v1517_v12 = vld [vmem:[#allocation12 + $0x180] sm:$0xff] }
 0x4fd   :  { %6196 = vmatpush1.bf16.msra.mxu0 %v6195_v17  ;;  %v6233_v17 = vpack.c.bf16 %v1819_v15, %v1815_v14  ;;  %v1521_v14 = vld [vmem:[#allocation12 + $0x1a0] sm:$0xff]  ;;  %v1526_v15 = vld [vmem:[#allocation12 + $0x1c8] sm:$0xff] }
 0x4fe   :  { %6198 = vmatprep.subr.bf16.mxu0 %v6197_v18  ;;  %v1814_v18 = vld [vmem:[#allocation12 + $0x950] sm:$0xff] }
 0x4ff   :  { %v6235_v22 = vpack.c.bf16 %v1818_v19, %v1814_v18  ;;  %v1525_v19 = vld [vmem:[#allocation12 + $0x1c0] sm:$0xff] }
 0x501   :  { %6200 = vmatpush1.bf16.msra.mxu0 %v6199_v23  ;;  %v6237_v23 = vpack.c.bf16 %v1827_v21, %v1823_v20  ;;  %v1529_v20 = vld [vmem:[#allocation12 + $0x1e0] sm:$0xff]  ;;  %v1534_v21 = vld [vmem:[#allocation12 + $0x208] sm:$0xff] }
 0x502   :  { %6202 = vmatprep.subr.bf16.mxu0 %v6201_v24  ;;  %v1822_v24 = vld [vmem:[#allocation12 + $0x990] sm:$0xff] }
 0x503   :  { %v6239_v28 = vpack.c.bf16 %v1826_v25, %v1822_v24  ;;  %v1533_v25 = vld [vmem:[#allocation12 + $0x200] sm:$0xff] }
 0x505   :  { %6204 = vmatpush1.bf16.msra.mxu0 %v6203_v29  ;;  %v6241_v29 = vpack.c.bf16 %v1835_v27, %v1831_v26  ;;  %v1537_v26 = vld [vmem:[#allocation12 + $0x220] sm:$0xff]  ;;  %v1542_v27 = vld [vmem:[#allocation12 + $0x248] sm:$0xff] }
 0x506   :  { %6206 = vmatprep.subr.bf16.mxu0 %v6205_v30  ;;  %v1830_v30 = vld [vmem:[#allocation12 + $0x9d0] sm:$0xff] }
 0x509   :  { %6208 = vmatpush1.bf16.msra.mxu0 %v6207_v36  ;;  %v1473_v36 = vld [vmem:[#allocation12 + $0x20] sm:$0xff] }
 0x50a   :  { %6210 = vmatprep.subr.bf16.mxu0 %v6209_v37  ;;  %v1478_v37 = vld [vmem:[#allocation12 + $0x48] sm:$0xff] }
 0x50b   :  { %v6249_v39 = vpack.c.bf16 %v1482_v38, %v1478_v37  ;;  %v1553_v37 = vld [vmem:[#allocation12 + $0x2a0] sm:$0xff]  ;;  %v1558_v38 = vld [vmem:[#allocation12 + $0x2c8] sm:$0xff] }
 0x50d   :  { %6212 = vmatpush1.bf16.msra.mxu0 %v6211_v43  ;;  %v1486_v43 = vld [vmem:[#allocation12 + $0x88] sm:$0xff] }
 0x50e   :  { %6214 = vmatprep.subr.bf16.mxu0 %v6213_v44  ;;  %v1490_v44 = vld [vmem:[#allocation12 + $0xa8] sm:$0xff] }
 0x50f   :  { %v6253_v46 = vpack.c.bf16 %v1490_v44, %v1486_v43  ;;  %v1561_v43 = vld [vmem:[#allocation12 + $0x2e0] sm:$0xff]  ;;  %v1566_v44 = vld [vmem:[#allocation12 + $0x308] sm:$0xff] }
 0x511   :  { %6216 = vmatpush1.bf16.msra.mxu0 %v6215_v49  ;;  %v1494_v49 = vld [vmem:[#allocation12 + $0xc8] sm:$0xff] }
 0x512   :  { %6218 = vmatprep.subr.bf16.mxu0 %v6217_v51  ;;  %v1498_v51 = vld [vmem:[#allocation12 + $0xe8] sm:$0xff] }
 0x515   :  { %6220 = vmatpush1.bf16.msra.mxu0 %v6219_v57  ;;  %v1502_v57 = vld [vmem:[#allocation12 + $0x108] sm:$0xff] }
 0x516   :  { %6222 = vmatprep.subr.bf16.mxu0 %v6221_v58  ;;  %v1506_v58 = vld [vmem:[#allocation12 + $0x128] sm:$0xff] }
 0x517   :  { %v6261_v50 = vpack.c.bf16 %v1506_v58, %v1502_v57  ;;  %v1577_v57 = vld [vmem:[#allocation12 + $0x360] sm:$0xff]  ;;  %v1582_v58 = vld [vmem:[#allocation12 + $0x388] sm:$0xff] }
 0x519   :  { %6224 = vmatpush1.bf16.msra.mxu0 %v6223_v62  ;;  %v1510_v62 = vld [vmem:[#allocation12 + $0x148] sm:$0xff] }
 0x51a   :  { %6226 = vmatprep.subr.bf16.mxu0 %v6225_v1  ;;  %v6263_v1 = vpack.c.bf16 %v1505_v61, %v1501_v60  ;;  %v1581_v61 = vld [vmem:[#allocation12 + $0x380] sm:$0xff] }
 0x51d   :  { %6228 = vmatpush1.bf16.msra.mxu0 %v6227_v8  ;;  %v1522_v8 = vld [vmem:[#allocation12 + $0x1a8] sm:$0xff] }
 0x51e   :  { %6230 = vmatprep.subr.bf16.mxu0 %v6229_v9  ;;  %v6267_v9 = vpack.c.bf16 %v1513_v6, %v1509_v4  ;;  %v6269_v11 = vpack.c.bf16 %v1522_v8, %v1518_v7  ;;  %v1589_v6 = vld [vmem:[#allocation12 + $0x3c0] sm:$0xff]  ;;  %v1598_v8 = vld [vmem:[#allocation12 + $0x408] sm:$0xff] }
 0x51f   :  { %v1593_v7 = vld [vmem:[#allocation12 + $0x3e0] sm:$0xff] }
 0x520   :  { %2059 = vmatmul.mubr.f32.vlgmr.msra.gmra.mrb[8].mxu0 %v7898_v55  ;;  %v1834_v55 = vld [vmem:[#allocation12 + $0x9f0] sm:$0xff] }
 0x521   :  { %2064 = vmatprep.mubr.f32.mxu0 %v7902_v63  ;;  %6232 = vmatpush1.bf16.msra.mxu0 %v6231_v16  ;;  %v1474_v63 = vld [vmem:[#allocation12 + $0x28] sm:$0xff]  ;;  %v6243_v33 = vpack.c.bf16 %v1834_v55, %v1830_v30  ;;  %v1541_v55 = vld [vmem:[#allocation12 + $0x240] sm:$0xff] }
 0x522   :  { %6234 = vmatprep.subr.bf16.mxu0 %v6233_v17  ;;  %v6245_v34 = vpack.c.bf16 %v1474_v63, %v1470_v31  ;;  %v1530_v16 = vld [vmem:[#allocation12 + $0x1e8] sm:$0xff]  ;;  %v6271_v17 = vpack.c.bf16 %v1521_v14, %v1517_v12  ;;  %v1545_v31 = vld [vmem:[#allocation12 + $0x260] sm:$0xff] }
 0x523   :  { %v6273_v18 = vpack.c.bf16 %v1530_v16, %v1526_v15  ;;  %v1550_v63 = vld [vmem:[#allocation12 + $0x288] sm:$0xff]  ;;  %v1597_v14 = vld [vmem:[#allocation12 + $0x400] sm:$0xff] }
 0x524   :  { %2065 = vmatmul.mubr.f32.gmra.mrb[10].mxu0 %v7906_v5  ;;  %v6247_v5 = vpack.c.bf16 %v1473_v36, %v1469_v35  ;;  %v1549_v36 = vld [vmem:[#allocation12 + $0x280] sm:$0xff]  ;;  %v1606_v16 = vld [vmem:[#allocation12 + $0x448] sm:$0xff] }
 0x525   :  { %6236 = vmatpush1.bf16.msra.mxu0 %v6235_v22  ;;  %2135 = vmatprep.mubr.f32.mxu0 %v7539_v0  ;;  %v1538_v22 = vld [vmem:[#allocation12 + $0x228] sm:$0xff]  ;;  %v1601_v15 = vld [vmem:[#allocation12 + $0x420] sm:$0xff] }
 0x526   :  { %6238 = vmatprep.subr.bf16.mxu0 %v6237_v23  ;;  %v6275_v23 = vpack.c.bf16 %v1529_v20, %v1525_v19  ;;  %v6277_v24 = vpack.c.bf16 %v1538_v22, %v1534_v21  ;;  %v1605_v20 = vld [vmem:[#allocation12 + $0x440] sm:$0xff]  ;;  %v7934_v22 = vld [vmem:[#allocation3] sm:$0xff] }
 0x527   :  { %v1609_v21 = vld [vmem:[#allocation12 + $0x460] sm:$0xff] }
 0x529   :  { %6240 = vmatpush1.bf16.msra.mxu0 %v6239_v28  ;;  %v1546_v28 = vld [vmem:[#allocation12 + $0x268] sm:$0xff] }
 0x52a   :  { %6242 = vmatprep.subr.bf16.mxu0 %v6241_v29  ;;  %v6279_v29 = vpack.c.bf16 %v1537_v26, %v1533_v25  ;;  %v6281_v30 = vpack.c.bf16 %v1546_v28, %v1542_v27  ;;  %v7937_v25 = vld [vmem:[#allocation3 + $0x38] sm:$0xff]  ;;  %v6315_v26 = vpack.c.bf16 %v1609_v21, %v1605_v20  ;;  %v1523_v20 = vld [vmem:[#allocation12 + $0x1b0] sm:$0xff]  ;;  %v1528_v21 = vld [vmem:[#allocation12 + $0x1d8] sm:$0xff] }
 0x52b   :  { %v1613_v28 = vld [vmem:[#allocation12 + $0x480] sm:$0xff] }
 0x52d   :  { %6244 = vmatpush1.bf16.msra.mxu0 %v6243_v33  ;;  %v1554_v33 = vld [vmem:[#allocation12 + $0x2a8] sm:$0xff] }
 0x52e   :  { %6246 = vmatprep.subr.bf16.mxu0 %v6245_v34  ;;  %v6283_v34 = vpack.c.bf16 %v1545_v31, %v1541_v55  ;;  %v6285_v35 = vpack.c.bf16 %v1554_v33, %v1550_v63  ;;  %v1622_v55 = vld [vmem:[#allocation12 + $0x4c8] sm:$0xff] }
 0x52f   :  { %v1626_v31 = vld [vmem:[#allocation12 + $0x4e8] sm:$0xff] }
 0x530   :  { %5137 = vmatmul.mubr.msk.f32.vlgmr.msra.gmra.mrb[8].mxu0 %vm532_vm3, %v7911_v32  ;;  %v6257_v32 = vpack.c.bf16 %v1498_v51, %v1494_v49  ;;  %v1569_v49 = vld [vmem:[#allocation12 + $0x320] sm:$0xff]  ;;  %v1574_v51 = vld [vmem:[#allocation12 + $0x348] sm:$0xff]  ;;  %v6321_v33 = vpack.c.bf16 %v1626_v31, %v1622_v55  ;;  %v1540_v55 = vld [vmem:[#allocation12 + $0x238] sm:$0xff] }
 0x531   :  { %6248 = vmatpush1.bf16.msra.mxu0 %v6247_v5  ;;  %2141 = vmatprep.mubr.f32.mxu0 %v7539_v0  ;;  %v1562_v5 = vld [vmem:[#allocation12 + $0x2e8] sm:$0xff] }
 0x532   :  { %6250 = vmatprep.subr.bf16.mxu0 %v6249_v39  ;;  %v6287_v39 = vpack.c.bf16 %v1553_v37, %v1549_v36  ;;  %v6289_v40 = vpack.c.bf16 %v1562_v5, %v1558_v38  ;;  %v1472_v36 = vld [vmem:[#allocation12 + $0x18] sm:$0xff] }
 0x533   :  { %v1476_v37 = vld [vmem:[#allocation12 + $0x38] sm:$0xff] }
 0x534   :  { %5138 = vmatmul.mubr.msk.f32.gmra.mrb[10].mxu0 %vm532_vm3, %v7917_v41  ;;  %v1514_v41 = vld [vmem:[#allocation12 + $0x168] sm:$0xff]  ;;  %v6325_v5 = vpack.c.bf16 %v1476_v37, %v1472_v36  ;;  %v1548_v36 = vld [vmem:[#allocation12 + $0x278] sm:$0xff] }
 0x535   :  { %6252 = vmatpush1.bf16.msra.mxu0 %v6251_v45  ;;  %2218 = vmatprep.mubr.f32.mxu0 %v7931_v52  ;;  %v6265_v3 = vpack.c.bf16 %v1514_v41, %v1510_v62  ;;  %v1570_v45 = vld [vmem:[#allocation12 + $0x328] sm:$0xff]  ;;  %v1585_v62 = vld [vmem:[#allocation12 + $0x3a0] sm:$0xff] }
 0x536   :  { %6254 = vmatprep.subr.bf16.mxu0 %v6253_v46  ;;  %v6291_v46 = vpack.c.bf16 %v1561_v43, %v1557_v42  ;;  %v6293_v47 = vpack.c.bf16 %v1570_v45, %v1566_v44  ;;  %v1590_v41 = vld [vmem:[#allocation12 + $0x3c8] sm:$0xff]  ;;  %v1480_v42 = vld [vmem:[#allocation12 + $0x58] sm:$0xff] }
 0x537   :  { %v1484_v43 = vld [vmem:[#allocation12 + $0x78] sm:$0xff] }
 0x538   :  { %v6329_v45 = vpack.c.bf16 %v1484_v43, %v1480_v42  ;;  %v1556_v42 = vld [vmem:[#allocation12 + $0x2b8] sm:$0xff] }
 0x539   :  { %6256 = vmatpush1.bf16.msra.mxu0 %v6255_v53  ;;  %v1578_v53 = vld [vmem:[#allocation12 + $0x368] sm:$0xff] }
 0x53a   :  { %6258 = vmatprep.subr.bf16.mxu0 %v6257_v32  ;;  %v6295_v32 = vpack.c.bf16 %v1569_v49, %v1565_v48  ;;  %v6297_v54 = vpack.c.bf16 %v1578_v53, %v1574_v51  ;;  %v7944_v48 = vld [vmem:[#allocation3 + $0x10] sm:$0xff] }
 0x53b   :  { %v1488_v49 = vld [vmem:[#allocation12 + $0x98] sm:$0xff] }
 0x53c   :  { %v1492_v51 = vld [vmem:[#allocation12 + $0xb8] sm:$0xff] }
 0x53d   :  { %6260 = vmatpush1.bf16.msra.mxu0 %v6259_v59  ;;  %v1586_v59 = vld [vmem:[#allocation12 + $0x3a8] sm:$0xff] }
 0x53e   :  { %6262 = vmatprep.subr.bf16.mxu0 %v6261_v50  ;;  %v6299_v50 = vpack.c.bf16 %v1577_v57, %v1573_v56  ;;  %v6301_v60 = vpack.c.bf16 %v1586_v59, %v1582_v58  ;;  %v1491_v56 = vld [vmem:[#allocation12 + $0xb0] sm:$0xff]  ;;  %v1496_v58 = vld [vmem:[#allocation12 + $0xd8] sm:$0xff] }
 0x53f   :  { %v7949_v57 = vld [vmem:[#allocation3 + $0x40] sm:$0xff]  ;;  %v1500_v59 = vld [vmem:[#allocation12 + $0xf8] sm:$0xff] }
 0x541   :  { %6264 = vmatpush1.bf16.msra.mxu0 %v6263_v1  ;;  %v1594_v1 = vld [vmem:[#allocation12 + $0x3e8] sm:$0xff] }
 0x542   :  { %6266 = vmatprep.subr.bf16.mxu0 %v6265_v3  ;;  %v6303_v3 = vpack.c.bf16 %v1585_v62, %v1581_v61  ;;  %v6305_v4 = vpack.c.bf16 %v1594_v1, %v1590_v41  ;;  %v1495_v61 = vld [vmem:[#allocation12 + $0xd0] sm:$0xff]  ;;  %v1504_v41 = vld [vmem:[#allocation12 + $0x118] sm:$0xff] }
 0x543   :  { %v1499_v62 = vld [vmem:[#allocation12 + $0xf0] sm:$0xff]  ;;  %v1508_v1 = vld [vmem:[#allocation12 + $0x138] sm:$0xff] }
 0x545   :  { %6268 = vmatpush1.bf16.msra.mxu0 %v6267_v9  ;;  %v1602_v9 = vld [vmem:[#allocation12 + $0x428] sm:$0xff] }
 0x546   :  { %6270 = vmatprep.subr.bf16.mxu0 %v6269_v11  ;;  %v6307_v11 = vpack.c.bf16 %v1593_v7, %v1589_v6  ;;  %v6309_v12 = vpack.c.bf16 %v1602_v9, %v1598_v8  ;;  %v1503_v6 = vld [vmem:[#allocation12 + $0x110] sm:$0xff]  ;;  %v1512_v8 = vld [vmem:[#allocation12 + $0x158] sm:$0xff] }
 0x547   :  { %v1507_v7 = vld [vmem:[#allocation12 + $0x130] sm:$0xff]  ;;  %v1516_v9 = vld [vmem:[#allocation12 + $0x178] sm:$0xff] }
 0x549   :  { %6272 = vmatpush1.bf16.msra.mxu0 %v6271_v17  ;;  %v1610_v17 = vld [vmem:[#allocation12 + $0x468] sm:$0xff] }
 0x54a   :  { %6274 = vmatprep.subr.bf16.mxu0 %v6273_v18  ;;  %v6311_v18 = vpack.c.bf16 %v1601_v15, %v1597_v14  ;;  %v6313_v19 = vpack.c.bf16 %v1610_v17, %v1606_v16  ;;  %v1515_v14 = vld [vmem:[#allocation12 + $0x170] sm:$0xff]  ;;  %v1520_v15 = vld [vmem:[#allocation12 + $0x198] sm:$0xff] }
 0x54b   :  { %v1524_v16 = vld [vmem:[#allocation12 + $0x1b8] sm:$0xff] }
 0x54d   :  { %6276 = vmatpush1.bf16.msra.mxu0 %v6275_v23  ;;  %v1614_v23 = vld [vmem:[#allocation12 + $0x488] sm:$0xff] }
 0x54e   :  { %6278 = vmatprep.subr.bf16.mxu0 %v6277_v24  ;;  %v1618_v24 = vld [vmem:[#allocation12 + $0x4a8] sm:$0xff] }
 0x54f   :  { %v6317_v27 = vpack.c.bf16 %v1618_v24, %v1614_v23  ;;  %v1532_v23 = vld [vmem:[#allocation12 + $0x1f8] sm:$0xff] }
 0x551   :  { %6280 = vmatpush1.bf16.msra.mxu0 %v6279_v29  ;;  %v1617_v29 = vld [vmem:[#allocation12 + $0x4a0] sm:$0xff] }
 0x552   :  { %6282 = vmatprep.subr.bf16.mxu0 %v6281_v30  ;;  %v7940_v30 = vld [vmem:[#allocation3 + $0x30] sm:$0xff]  ;;  %v6319_v63 = vpack.c.bf16 %v1617_v29, %v1613_v28  ;;  %v1531_v28 = vld [vmem:[#allocation12 + $0x1f0] sm:$0xff] }
 0x553   :  { %v1536_v29 = vld [vmem:[#allocation12 + $0x218] sm:$0xff] }
 0x555   :  { %6284 = vmatpush1.bf16.msra.mxu0 %v6283_v34  ;;  %v1621_v34 = vld [vmem:[#allocation12 + $0x4c0] sm:$0xff] }
 0x556   :  { %6286 = vmatprep.subr.bf16.mxu0 %v6285_v35  ;;  %v1625_v35 = vld [vmem:[#allocation12 + $0x4e0] sm:$0xff] }
 0x557   :  { %v6323_v38 = vpack.c.bf16 %v1625_v35, %v1621_v34  ;;  %v1539_v34 = vld [vmem:[#allocation12 + $0x230] sm:$0xff]  ;;  %v1544_v35 = vld [vmem:[#allocation12 + $0x258] sm:$0xff] }
 0x559   :  { %6288 = vmatpush1.bf16.msra.mxu0 %v6287_v39  ;;  %v1471_v39 = vld [vmem:[#allocation12 + $0x10] sm:$0xff] }
 0x55a   :  { %6290 = vmatprep.subr.bf16.mxu0 %v6289_v40  ;;  %v1475_v40 = vld [vmem:[#allocation12 + $0x30] sm:$0xff] }
 0x55b   :  { %v6327_v44 = vpack.c.bf16 %v1475_v40, %v1471_v39  ;;  %v1547_v39 = vld [vmem:[#allocation12 + $0x270] sm:$0xff]  ;;  %v1552_v40 = vld [vmem:[#allocation12 + $0x298] sm:$0xff] }
 0x55d   :  { %6292 = vmatpush1.bf16.msra.mxu0 %v6291_v46  ;;  %v1479_v46 = vld [vmem:[#allocation12 + $0x50] sm:$0xff] }
 0x55e   :  { %6294 = vmatprep.subr.bf16.mxu0 %v6293_v47  ;;  %v1483_v47 = vld [vmem:[#allocation12 + $0x70] sm:$0xff] }
 0x55f   :  { %v6331_v53 = vpack.c.bf16 %v1483_v47, %v1479_v46  ;;  %v1555_v46 = vld [vmem:[#allocation12 + $0x2b0] sm:$0xff]  ;;  %v1560_v47 = vld [vmem:[#allocation12 + $0x2d8] sm:$0xff] }
 0x561   :  { %6296 = vmatpush1.bf16.msra.mxu0 %v6295_v32  ;;  %v6333_v32 = vpack.c.bf16 %v1492_v51, %v1488_v49  ;;  %v1564_v49 = vld [vmem:[#allocation12 + $0x2f8] sm:$0xff] }
 0x562   :  { %6298 = vmatprep.subr.bf16.mxu0 %v6297_v54  ;;  %v1487_v54 = vld [vmem:[#allocation12 + $0x90] sm:$0xff] }
 0x565   :  { %6300 = vmatpush1.bf16.msra.mxu0 %v6299_v50  ;;  %v6335_v50 = vpack.c.bf16 %v1491_v56, %v1487_v54  ;;  %v1563_v54 = vld [vmem:[#allocation12 + $0x2f0] sm:$0xff]  ;;  %v1568_v56 = vld [vmem:[#allocation12 + $0x318] sm:$0xff] }
 0x566   :  { %6302 = vmatprep.subr.bf16.mxu0 %v6301_v60  ;;  %v6337_v60 = vpack.c.bf16 %v1500_v59, %v1496_v58  ;;  %v1572_v58 = vld [vmem:[#allocation12 + $0x338] sm:$0xff] }
 0x569   :  { %6304 = vmatpush1.bf16.msra.mxu0 %v6303_v3  ;;  %v6339_v3 = vpack.c.bf16 %v1499_v62, %v1495_v61  ;;  %v1571_v61 = vld [vmem:[#allocation12 + $0x330] sm:$0xff]  ;;  %v1576_v62 = vld [vmem:[#allocation12 + $0x358] sm:$0xff] }
 0x56a   :  { %6306 = vmatprep.subr.bf16.mxu0 %v6305_v4  ;;  %v6341_v4 = vpack.c.bf16 %v1508_v1, %v1504_v41  ;;  %v1580_v41 = vld [vmem:[#allocation12 + $0x378] sm:$0xff] }
 0x56d   :  { %6308 = vmatpush1.bf16.msra.mxu0 %v6307_v11  ;;  %v6343_v11 = vpack.c.bf16 %v1507_v7, %v1503_v6  ;;  %v1579_v6 = vld [vmem:[#allocation12 + $0x370] sm:$0xff]  ;;  %v1584_v7 = vld [vmem:[#allocation12 + $0x398] sm:$0xff] }
 0x56e   :  { %6310 = vmatprep.subr.bf16.mxu0 %v6309_v12  ;;  %v6345_v12 = vpack.c.bf16 %v1516_v9, %v1512_v8  ;;  %v1588_v8 = vld [vmem:[#allocation12 + $0x3b8] sm:$0xff] }
 0x570   :  { %2219 = vmatmul.mubr.f32.vlgmr.msra.gmra.mrb[4].mxu0 %v7934_v22 }
 0x571   :  { %2224 = vmatprep.mubr.f32.mxu0 %v7937_v25  ;;  %6312 = vmatpush1.bf16.msra.mxu0 %v6311_v18  ;;  %v6349_v18 = vpack.c.bf16 %v1524_v16, %v1520_v15  ;;  %v1596_v15 = vld [vmem:[#allocation12 + $0x3f8] sm:$0xff] }
 0x572   :  { %6314 = vmatprep.subr.bf16.mxu0 %v6313_v19  ;;  %v1519_v19 = vld [vmem:[#allocation12 + $0x190] sm:$0xff] }
 0x573   :  { %v6351_v24 = vpack.c.bf16 %v1523_v20, %v1519_v19  ;;  %v1595_v19 = vld [vmem:[#allocation12 + $0x3f0] sm:$0xff]  ;;  %v1600_v20 = vld [vmem:[#allocation12 + $0x418] sm:$0xff] }
 0x574   :  { %2225 = vmatmul.mubr.f32.gmra.mrb[6].mxu0 %v7940_v30 }
 0x575   :  { %6316 = vmatpush1.bf16.msra.mxu0 %v6315_v26  ;;  %2295 = vmatprep.mubr.f32.mxu0 %v7539_v0  ;;  %v6353_v26 = vpack.c.bf16 %v1532_v23, %v1528_v21  ;;  %v1604_v21 = vld [vmem:[#allocation12 + $0x438] sm:$0xff] }
 0x576   :  { %6318 = vmatprep.subr.bf16.mxu0 %v6317_v27  ;;  %v1527_v27 = vld [vmem:[#allocation12 + $0x1d0] sm:$0xff] }
 0x577   :  { %v6355_v31 = vpack.c.bf16 %v1531_v28, %v1527_v27  ;;  %v1603_v27 = vld [vmem:[#allocation12 + $0x430] sm:$0xff]  ;;  %v1608_v28 = vld [vmem:[#allocation12 + $0x458] sm:$0xff] }
 0x579   :  { %6320 = vmatpush1.bf16.msra.mxu0 %v6319_v63  ;;  %v6357_v63 = vpack.c.bf16 %v1540_v55, %v1536_v29  ;;  %v1612_v29 = vld [vmem:[#allocation12 + $0x478] sm:$0xff] }
 0x57a   :  { %6322 = vmatprep.subr.bf16.mxu0 %v6321_v33  ;;  %v1535_v33 = vld [vmem:[#allocation12 + $0x210] sm:$0xff] }
 0x57b   :  { %v6359_v37 = vpack.c.bf16 %v1539_v34, %v1535_v33  ;;  %v1611_v33 = vld [vmem:[#allocation12 + $0x470] sm:$0xff]  ;;  %v1616_v34 = vld [vmem:[#allocation12 + $0x498] sm:$0xff] }
 0x57d   :  { %6324 = vmatpush1.bf16.msra.mxu0 %v6323_v38  ;;  %v6361_v38 = vpack.c.bf16 %v1548_v36, %v1544_v35  ;;  %v1620_v35 = vld [vmem:[#allocation12 + $0x4b8] sm:$0xff] }
 0x57e   :  { %6326 = vmatprep.subr.bf16.mxu0 %v6325_v5  ;;  %v1543_v5 = vld [vmem:[#allocation12 + $0x250] sm:$0xff] }
 0x57f   :  { %v6363_v43 = vpack.c.bf16 %v1547_v39, %v1543_v5  ;;  %v1619_v5 = vld [vmem:[#allocation12 + $0x4b0] sm:$0xff]  ;;  %v1624_v39 = vld [vmem:[#allocation12 + $0x4d8] sm:$0xff] }
 0x580   :  { %5139 = vmatmul.mubr.msk.f32.vlgmr.msra.gmra.mrb[4].mxu0 %vm532_vm3, %v7944_v48 }
 0x581   :  { %6328 = vmatpush1.bf16.msra.mxu0 %v6327_v44  ;;  %2301 = vmatprep.mubr.f32.mxu0 %v7539_v0  ;;  %v6365_v44 = vpack.c.bf16 %v1556_v42, %v1552_v40  ;;  %v1628_v40 = vld [vmem:[#allocation12 + $0x4f8] sm:$0xff] }
 0x582   :  { %6330 = vmatprep.subr.bf16.mxu0 %v6329_v45  ;;  %v1551_v45 = vld [vmem:[#allocation12 + $0x290] sm:$0xff] }
 0x583   :  { %v6367_v51 = vpack.c.bf16 %v1555_v46, %v1551_v45  ;;  %v2510_v45 = vld [vmem:[#allocation12 + $0xa08] sm:$0xff] }
 0x584   :  { %5140 = vmatmul.mubr.msk.f32.gmra.mrb[6].mxu0 %vm532_vm3, %v7949_v57 }
 0x585   :  { %6332 = vmatpush1.bf16.msra.mxu0 %v6331_v53  ;;  %2372 = vmatprep.mubr.f32.mxu0 %v7931_v52  ;;  %v1511_v52 = vld [vmem:[#allocation12 + $0x150] sm:$0xff]  ;;  %v6369_v53 = vpack.c.bf16 %v1564_v49, %v1560_v47  ;;  %v2509_v49 = vld [vmem:[#allocation12 + $0xa00] sm:$0xff] }
 0x586   :  { %6334 = vmatprep.subr.bf16.mxu0 %v6333_v32  ;;  %v6347_v17 = vpack.c.bf16 %v1515_v14, %v1511_v52  ;;  %v1559_v32 = vld [vmem:[#allocation12 + $0x2d0] sm:$0xff]  ;;  %v1592_v14 = vld [vmem:[#allocation12 + $0x3d8] sm:$0xff] }
 0x587   :  { %v6371_v59 = vpack.c.bf16 %v1563_v54, %v1559_v32  ;;  %v1587_v52 = vld [vmem:[#allocation12 + $0x3b0] sm:$0xff]  ;;  %v2522_v32 = vld [vmem:[#allocation12 + $0xa68] sm:$0xff] }
 0x588   :  { %v2463_v54 = vld [vmem:[#allocation3 + $0x8] sm:$0xfc] }
 0x589   :  { %6336 = vmatpush1.bf16.msra.mxu0 %v6335_v50  ;;  %v6373_v50 = vpack.c.bf16 %v1572_v58, %v1568_v56  ;;  %v2466_v56 = vld [vmem:[#allocation3 + $0x20] sm:$0x3] }
 0x58a   :  { %6338 = vmatprep.subr.bf16.mxu0 %v6337_v60  ;;  %v1567_v60 = vld [vmem:[#allocation12 + $0x310] sm:$0xff] }
 0x58b   :  { %v6375_v1 = vpack.c.bf16 %v1571_v61, %v1567_v60  ;;  %v2526_v60 = vld [vmem:[#allocation12 + $0xa88] sm:$0xff] }
 0x58c   :  { %v2530_v61 = vld [vmem:[#allocation12 + $0xaa8] sm:$0xff] }
 0x58d   :  { %6340 = vmatpush1.bf16.msra.mxu0 %v6339_v3  ;;  %v6377_v3 = vpack.c.bf16 %v1580_v41, %v1576_v62  ;;  %v2489_v62 = vrot.slane %v2463_v54, 2  ;;  %v2490_v41 = vrot.slane %v2466_v56, 2  ;;  %v2589_v54 = vld [vmem:[#allocation12 + $0xc80] sm:$0xff] }
 0x58e   :  { %6342 = vmatprep.subr.bf16.mxu0 %v6341_v4  ;;  %v1575_v4 = vld [vmem:[#allocation12 + $0x350] sm:$0xff]  ;;  %v2593_v56 = vld [vmem:[#allocation12 + $0xca0] sm:$0xff] }
 0x58f   :  { %v6379_v9 = vpack.c.bf16 %v1579_v6, %v1575_v4  ;;  %v2525_v4 = vld [vmem:[#allocation12 + $0xa80] sm:$0xff] }
 0x590   :  { %v2529_v6 = vld [vmem:[#allocation12 + $0xaa0] sm:$0xff] }
 0x591   :  { %6344 = vmatpush1.bf16.msra.mxu0 %v6343_v11  ;;  %v6381_v11 = vpack.c.bf16 %v1588_v8, %v1584_v7  ;;  %v2534_v7 = vld [vmem:[#allocation12 + $0xac8] sm:$0xff] }
 0x592   :  { %6346 = vmatprep.subr.bf16.mxu0 %v6345_v12  ;;  %v1583_v12 = vld [vmem:[#allocation12 + $0x390] sm:$0xff]  ;;  %v2538_v8 = vld [vmem:[#allocation12 + $0xae8] sm:$0xff] }
 0x593   :  { %v6383_v16 = vpack.c.bf16 %v1587_v52, %v1583_v12  ;;  %v2533_v12 = vld [vmem:[#allocation12 + $0xac0] sm:$0xff] }
 0x594   :  { %v2537_v52 = vld [vmem:[#allocation12 + $0xae0] sm:$0xff] }
 0x595   :  { %6348 = vmatpush1.bf16.msra.mxu0 %v6347_v17  ;;  %v6385_v17 = vpack.c.bf16 %v1596_v15, %v1592_v14  ;;  %v2542_v14 = vld [vmem:[#allocation12 + $0xb08] sm:$0xff] }
 0x596   :  { %6350 = vmatprep.subr.bf16.mxu0 %v6349_v18  ;;  %v1591_v18 = vld [vmem:[#allocation12 + $0x3d0] sm:$0xff]  ;;  %v2546_v15 = vld [vmem:[#allocation12 + $0xb28] sm:$0xff] }
 0x597   :  { %v6387_v23 = vpack.c.bf16 %v1595_v19, %v1591_v18  ;;  %v2541_v18 = vld [vmem:[#allocation12 + $0xb00] sm:$0xff] }
 0x598   :  { %v2545_v19 = vld [vmem:[#allocation12 + $0xb20] sm:$0xff] }
 0x599   :  { %6352 = vmatpush1.bf16.msra.mxu0 %v6351_v24  ;;  %v6389_v24 = vpack.c.bf16 %v1604_v21, %v1600_v20  ;;  %v2554_v20 = vld [vmem:[#allocation12 + $0xb68] sm:$0xff]  ;;  %v6423_v21 = vpack.c.bf16 %v2545_v19, %v2541_v18 }
 0x59a   :  { %6354 = vmatprep.subr.bf16.mxu0 %v6353_v26  ;;  %v1599_v26 = vld [vmem:[#allocation12 + $0x410] sm:$0xff] }
 0x59b   :  { %v6391_v55 = vpack.c.bf16 %v1603_v27, %v1599_v26  ;;  %v2553_v26 = vld [vmem:[#allocation12 + $0xb60] sm:$0xff]  ;;  %v2558_v27 = vld [vmem:[#allocation12 + $0xb88] sm:$0xff] }
 0x59d   :  { %6356 = vmatpush1.bf16.msra.mxu0 %v6355_v31  ;;  %v6393_v31 = vpack.c.bf16 %v1612_v29, %v1608_v28  ;;  %v2562_v28 = vld [vmem:[#allocation12 + $0xba8] sm:$0xff] }
 0x59e   :  { %6358 = vmatprep.subr.bf16.mxu0 %v6357_v63  ;;  %v1607_v63 = vld [vmem:[#allocation12 + $0x450] sm:$0xff] }
 0x59f   :  { %v6395_v36 = vpack.c.bf16 %v1611_v33, %v1607_v63  ;;  %v2561_v63 = vld [vmem:[#allocation12 + $0xba0] sm:$0xff]  ;;  %v2566_v33 = vld [vmem:[#allocation12 + $0xbc8] sm:$0xff] }
 0x5a1   :  { %6360 = vmatpush1.bf16.msra.mxu0 %v6359_v37  ;;  %v6397_v37 = vpack.c.bf16 %v1620_v35, %v1616_v34  ;;  %v2570_v34 = vld [vmem:[#allocation12 + $0xbe8] sm:$0xff] }
 0x5a2   :  { %6362 = vmatprep.subr.bf16.mxu0 %v6361_v38  ;;  %v1615_v38 = vld [vmem:[#allocation12 + $0x490] sm:$0xff] }
 0x5a3   :  { %v6399_v42 = vpack.c.bf16 %v1619_v5, %v1615_v38  ;;  %v2569_v38 = vld [vmem:[#allocation12 + $0xbe0] sm:$0xff]  ;;  %v2574_v5 = vld [vmem:[#allocation12 + $0xc08] sm:$0xff] }
 0x5a5   :  { %6364 = vmatpush1.bf16.msra.mxu0 %v6363_v43  ;;  %v6401_v43 = vpack.c.bf16 %v1628_v40, %v1624_v39  ;;  %v2578_v39 = vld [vmem:[#allocation12 + $0xc28] sm:$0xff] }
 0x5a6   :  { %6366 = vmatprep.subr.bf16.mxu0 %v6365_v44  ;;  %v1623_v44 = vld [vmem:[#allocation12 + $0x4d0] sm:$0xff] }
 0x5a9   :  { %6368 = vmatpush1.bf16.msra.mxu0 %v6367_v51  ;;  %v2513_v51 = vld [vmem:[#allocation12 + $0xa20] sm:$0xff] }
 0x5aa   :  { %6370 = vmatprep.subr.bf16.mxu0 %v6369_v53  ;;  %v2518_v53 = vld [vmem:[#allocation12 + $0xa48] sm:$0xff] }
 0x5ab   :  { %v6409_v58 = vpack.c.bf16 %v2522_v32, %v2518_v53  ;;  %v2594_v53 = vld [vmem:[#allocation12 + $0xca8] sm:$0xff] }
 0x5ad   :  { %6372 = vmatpush1.bf16.msra.mxu0 %v6371_v59  ;;  %v2517_v59 = vld [vmem:[#allocation12 + $0xa40] sm:$0xff] }
 0x5ae   :  { %6374 = vmatprep.subr.bf16.mxu0 %v6373_v50  ;;  %v2521_v50 = vld [vmem:[#allocation12 + $0xa60] sm:$0xff] }
 0x5b1   :  { %6376 = vmatpush1.bf16.msra.mxu0 %v6375_v1  ;;  %v6411_v1 = vpack.c.bf16 %v2521_v50, %v2517_v59  ;;  %v2602_v59 = vld [vmem:[#allocation12 + $0xce8] sm:$0xff]  ;;  %v2597_v50 = vld [vmem:[#allocation12 + $0xcc0] sm:$0xff] }
 0x5b2   :  { %6378 = vmatprep.subr.bf16.mxu0 %v6377_v3  ;;  %v6413_v3 = vpack.c.bf16 %v2530_v61, %v2526_v60  ;;  %v2601_v60 = vld [vmem:[#allocation12 + $0xce0] sm:$0xff] }
 0x5b3   :  { %v3108_v61 = vld [vmem:[#allocation15 + $0x280] sm:$0xff]  ;;  %v6451_v19 = vpack.c.bf16 %v2601_v60, %v2597_v50  ;;  %v2462_v60 = vld [vmem:[#allocation3] sm:$0xfc] }
 0x5b4   :  { %v2642_v50 = vld [vmem:[#allocation12 + $0xe28] sm:$0xff] }
 0x5b5   :  { %6380 = vmatpush1.bf16.msra.mxu0 %v6379_v9  ;;  %v7964_v9 = vsel %vm1141_vm11, %v2489_v62, %v2490_v41  ;;  %v3109_v62 = vld [vmem:[#allocation15 + $0x288] sm:$0xff]  ;;  %v3092_v41 = vld [vmem:[#allocation15 + $0x200] sm:$0xff] }
 0x5b6   :  { %6382 = vmatprep.subr.bf16.mxu0 %v6381_v11  ;;  %v6417_v11 = vpack.c.bf16 %v2538_v8, %v2534_v7  ;;  %v3111_v7 = vld [vmem:[#allocation15 + $0x298] sm:$0xff] }
 0x5b9   :  { %6384 = vmatpush1.bf16.msra.mxu0 %v6383_v16  ;;  %v6419_v16 = vpack.c.bf16 %v2537_v52, %v2533_v12  ;;  %v3094_v12 = vld [vmem:[#allocation15 + $0x210] sm:$0xff]  ;;  %v3095_v52 = vld [vmem:[#allocation15 + $0x218] sm:$0xff] }
 0x5ba   :  { %6386 = vmatprep.subr.bf16.mxu0 %v6385_v17  ;;  %v6421_v17 = vpack.c.bf16 %v2546_v15, %v2542_v14  ;;  %v3112_v14 = vld [vmem:[#allocation15 + $0x2a0] sm:$0xff]  ;;  %v6571_v18 = vpack.c.bf16 %v3095_v52, %v3094_v12 }
 0x5bb   :  { %v2606_v15 = vld [vmem:[#allocation12 + $0xd08] sm:$0xff] }
 0x5bd   :  { %6388 = vmatpush1.bf16.msra.mxu0 %v6387_v23 }
 0x5be   :  { %6390 = vmatprep.subr.bf16.mxu0 %v6389_v24  ;;  %v2549_v24 = vld [vmem:[#allocation12 + $0xb40] sm:$0xff] }
 0x5bf   :  { %v6427_v29 = vpack.c.bf16 %v2553_v26, %v2549_v24  ;;  %v2609_v26 = vld [vmem:[#allocation12 + $0xd20] sm:$0xff] }
 0x5c0   :  { %2373 = vmatmul.mubr.f32.vlgmr.msra.gmra.mrb[8].mxu0 %v7934_v22  ;;  %v1627_v22 = vld [vmem:[#allocation12 + $0x4f0] sm:$0xff] }
 0x5c1   :  { %2378 = vmatprep.mubr.f32.mxu0 %v7937_v25  ;;  %6392 = vmatpush1.bf16.msra.mxu0 %v6391_v55  ;;  %v2514_v25 = vld [vmem:[#allocation12 + $0xa28] sm:$0xff]  ;;  %v6403_v46 = vpack.c.bf16 %v1627_v22, %v1623_v44  ;;  %v6429_v55 = vpack.c.bf16 %v2562_v28, %v2558_v27  ;;  %v2577_v44 = vld [vmem:[#allocation12 + $0xc20] sm:$0xff]  ;;  %v3114_v27 = vld [vmem:[#allocation15 + $0x2b0] sm:$0xff] }
 0x5c2   :  { %6394 = vmatprep.subr.bf16.mxu0 %v6393_v31  ;;  %v6405_v47 = vpack.c.bf16 %v2514_v25, %v2510_v45  ;;  %v2557_v31 = vld [vmem:[#allocation12 + $0xb80] sm:$0xff]  ;;  %v2582_v22 = vld [vmem:[#allocation12 + $0xc48] sm:$0xff] }
 0x5c3   :  { %v6431_v35 = vpack.c.bf16 %v2561_v63, %v2557_v31  ;;  %v2586_v45 = vld [vmem:[#allocation12 + $0xc68] sm:$0xff]  ;;  %v3115_v28 = vld [vmem:[#allocation15 + $0x2b8] sm:$0xff] }
 0x5c4   :  { %2379 = vmatmul.mubr.f32.gmra.mrb[10].mxu0 %v7940_v30  ;;  %v6407_v30 = vpack.c.bf16 %v2513_v51, %v2509_v49  ;;  %v2585_v49 = vld [vmem:[#allocation12 + $0xc60] sm:$0xff]  ;;  %v2590_v51 = vld [vmem:[#allocation12 + $0xc88] sm:$0xff] }
 0x5c5   :  { %6396 = vmatpush1.bf16.msra.mxu0 %v6395_v36  ;;  %2449 = vmatprep.mubr.f32.mxu0 %v7539_v0  ;;  %v6433_v36 = vpack.c.bf16 %v2570_v34, %v2566_v33  ;;  %v2613_v33 = vld [vmem:[#allocation12 + $0xd40] sm:$0xff]  ;;  %v6577_v34 = vpack.c.bf16 %v3115_v28, %v3114_v27 }
 0x5c6   :  { %6398 = vmatprep.subr.bf16.mxu0 %v6397_v37  ;;  %v2565_v37 = vld [vmem:[#allocation12 + $0xbc0] sm:$0xff] }
 0x5c7   :  { %v6435_v40 = vpack.c.bf16 %v2569_v38, %v2565_v37  ;;  %v2617_v38 = vld [vmem:[#allocation12 + $0xd60] sm:$0xff] }
 0x5c9   :  { %6400 = vmatpush1.bf16.msra.mxu0 %v6399_v42  ;;  %v6437_v42 = vpack.c.bf16 %v2578_v39, %v2574_v5  ;;  %v3116_v5 = vld [vmem:[#allocation15 + $0x2c0] sm:$0xff]  ;;  %v3117_v39 = vld [vmem:[#allocation15 + $0x2c8] sm:$0xff] }
 0x5ca   :  { %6402 = vmatprep.subr.bf16.mxu0 %v6401_v43  ;;  %v2573_v43 = vld [vmem:[#allocation12 + $0xc00] sm:$0xff] }
 0x5cb   :  { %v6439_v25 = vpack.c.bf16 %v2577_v44, %v2573_v43  ;;  %v6459_v44 = vpack.c.bf16 %v2617_v38, %v2613_v33  ;;  %v2666_v33 = vld [vmem:[#allocation12 + $0xee8] sm:$0xff]  ;;  %v2512_v38 = vld [vmem:[#allocation12 + $0xa18] sm:$0xff] }
 0x5cd   :  { %6404 = vmatpush1.bf16.msra.mxu0 %v6403_v46  ;;  %v6441_v46 = vpack.c.bf16 %v2586_v45, %v2582_v22  ;;  %v6581_v22 = vpack.c.bf16 %v3117_v39, %v3116_v5  ;;  %v3100_v45 = vld [vmem:[#allocation15 + $0x240] sm:$0xff]  ;;  %v2516_v5 = vld [vmem:[#allocation12 + $0xa38] sm:$0xff] }
 0x5ce   :  { %6406 = vmatprep.subr.bf16.mxu0 %v6405_v47  ;;  %v2581_v47 = vld [vmem:[#allocation12 + $0xc40] sm:$0xff] }
 0x5cf   :  { %v6443_v32 = vpack.c.bf16 %v2585_v49, %v2581_v47  ;;  %v2621_v47 = vld [vmem:[#allocation12 + $0xd80] sm:$0xff] }
 0x5d0   :  { %5141 = vmatmul.mubr.msk.f32.vlgmr.msra.gmra.mrb[8].mxu0 %vm532_vm3, %v7944_v48  ;;  %v6415_v48 = vpack.c.bf16 %v2529_v6, %v2525_v4  ;;  %v3093_v4 = vld [vmem:[#allocation15 + $0x208] sm:$0xff]  ;;  %v3110_v6 = vld [vmem:[#allocation15 + $0x290] sm:$0xff]  ;;  %v2625_v49 = vld [vmem:[#allocation12 + $0xda0] sm:$0xff] }
 0x5d1   :  { %6408 = vmatpush1.bf16.msra.mxu0 %v6407_v30  ;;  %2455 = vmatprep.mubr.f32.mxu0 %v7539_v0  ;;  %v6445_v30 = vpack.c.bf16 %v2594_v53, %v2590_v51  ;;  %v2630_v51 = vld [vmem:[#allocation12 + $0xdc8] sm:$0xff]  ;;  %v2464_v39 = vld [vmem:[#allocation3 + $0x10] sm:$0xfc] }
 0x5d2   :  { %6410 = vmatprep.subr.bf16.mxu0 %v6409_v58  ;;  %v2598_v58 = vld [vmem:[#allocation12 + $0xcc8] sm:$0xff] }
 0x5d3   :  { %v6449_v8 = vpack.c.bf16 %v2602_v59, %v2598_v58  ;;  %v2634_v53 = vld [vmem:[#allocation12 + $0xde8] sm:$0xff]  ;;  %v2633_v58 = vld [vmem:[#allocation12 + $0xde0] sm:$0xff] }
 0x5d4   :  { %5142 = vmatmul.mubr.msk.f32.gmra.mrb[10].mxu0 %vm532_vm3, %v7949_v57  ;;  %v2550_v57 = vld [vmem:[#allocation12 + $0xb48] sm:$0xff] }
 0x5d5   :  { %6412 = vmatpush1.bf16.msra.mxu0 %v6411_v1  ;;  %2737 = vmatprep.mubr.f32.mxu0 %v7964_v9  ;;  %v6425_v23 = vpack.c.bf16 %v2554_v20, %v2550_v57  ;;  %v6447_v1 = vpack.c.bf16 %v2593_v56, %v2589_v54  ;;  %v2605_v57 = vld [vmem:[#allocation12 + $0xd00] sm:$0xff]  ;;  %v6465_v54 = vpack.c.bf16 %v2634_v53, %v2630_v51  ;;  %v2638_v59 = vld [vmem:[#allocation12 + $0xe08] sm:$0xff] }
 0x5d6   :  { %6414 = vmatprep.subr.bf16.mxu0 %v6413_v3  ;;  %v6565_v3 = vpack.c.bf16 %v3109_v62, %v3108_v61  ;;  %v6455_v63 = vpack.c.bf16 %v2609_v26, %v2605_v57  ;;  %v2629_v56 = vld [vmem:[#allocation12 + $0xdc0] sm:$0xff] }
 0x5d7   :  { %v2465_v61 = vld [vmem:[#allocation3 + $0x18] sm:$0x3]  ;;  %v6467_v62 = vpack.c.bf16 %v2633_v58, %v2629_v56 }
 0x5d8   :  { %6566 = vmatprep.subr.bf16.mxu1 %v6565_v3  ;;  %v6469_v3 = vpack.c.bf16 %v2642_v50, %v2638_v59  ;;  %v2473_v51 = vld [vmem:[#allocation3 + $0x58] sm:$0x3]  ;;  %v2528_v50 = vld [vmem:[#allocation12 + $0xa98] sm:$0xff] }
 0x5d9   :  { %6416 = vmatpush1.bf16.msra.mxu0 %v6415_v48  ;;  %v6567_v48 = vpack.c.bf16 %v3093_v4, %v3092_v41  ;;  %v2469_v41 = vld [vmem:[#allocation3 + $0x38] sm:$0xfc]  ;;  %v2502_v59 = vrot.slane %v2473_v51, 2  ;;  %v2592_v51 = vld [vmem:[#allocation12 + $0xc98] sm:$0xff] }
 0x5da   :  { %6418 = vmatprep.subr.bf16.mxu0 %v6417_v11  ;;  %v6569_v11 = vpack.c.bf16 %v3111_v7, %v3110_v6  ;;  %v2637_v4 = vld [vmem:[#allocation12 + $0xe00] sm:$0xff]  ;;  %v2486_v7 = vrot.slane %v2462_v60, 2  ;;  %v2498_v12 = vrot.slane %v2469_v41, 2  ;;  %v2532_v60 = vld [vmem:[#allocation12 + $0xab8] sm:$0xff]  ;;  %v2527_v41 = vld [vmem:[#allocation12 + $0xa90] sm:$0xff] }
 0x5db   :  { %6568 = vmatpush3.bf16.msra.mxu1 %v6567_v48  ;;  %v2641_v6 = vld [vmem:[#allocation12 + $0xe20] sm:$0xff]  ;;  %v2646_v48 = vld [vmem:[#allocation12 + $0xe48] sm:$0xff] }
 0x5dc   :  { %6570 = vmatprep.subr.bf16.mxu1 %v6569_v11  ;;  %v2650_v11 = vld [vmem:[#allocation12 + $0xe68] sm:$0xff] }
 0x5dd   :  { %6420 = vmatpush1.bf16.msra.mxu0 %v6419_v16  ;;  %v2610_v16 = vld [vmem:[#allocation12 + $0xd28] sm:$0xff] }
 0x5de   :  { %6422 = vmatprep.subr.bf16.mxu0 %v6421_v17  ;;  %v3113_v17 = vld [vmem:[#allocation15 + $0x2a8] sm:$0xff]  ;;  %v6453_v24 = vpack.c.bf16 %v2610_v16, %v2606_v15  ;;  %v2471_v15 = vld [vmem:[#allocation3 + $0x48] sm:$0x3]  ;;  %v6471_v16 = vpack.c.bf16 %v2641_v6, %v2637_v4  ;;  %v2536_v4 = vld [vmem:[#allocation12 + $0xad8] sm:$0xff] }
 0x5df   :  { %v6573_v20 = vpack.c.bf16 %v3113_v17, %v3112_v14  ;;  %6572 = vmatpush3.bf16.msra.mxu1 %v6571_v18  ;;  %v2468_v14 = vld [vmem:[#allocation3 + $0x30] sm:$0xfc]  ;;  %v6473_v17 = vpack.c.bf16 %v2650_v11, %v2646_v48  ;;  %v2535_v48 = vld [vmem:[#allocation12 + $0xad0] sm:$0xff] }
 0x5e0   :  { %v2645_v18 = vld [vmem:[#allocation12 + $0xe40] sm:$0xff]  ;;  %v2540_v6 = vld [vmem:[#allocation12 + $0xaf8] sm:$0xff]  ;;  %v2539_v11 = vld [vmem:[#allocation12 + $0xaf0] sm:$0xff] }
 0x5e1   :  { %6424 = vmatpush1.bf16.msra.mxu0 %v6423_v21  ;;  %v3096_v21 = vld [vmem:[#allocation15 + $0x220] sm:$0xff]  ;;  %6574 = vmatprep.subr.bf16.mxu1 %v6573_v20  ;;  %v2495_v20 = vrot.slane %v2468_v14, 2  ;;  %v6499_v14 = vpack.c.bf16 %v2539_v11, %v2535_v48  ;;  %v2611_v48 = vld [vmem:[#allocation12 + $0xd30] sm:$0xff]  ;;  %v2616_v11 = vld [vmem:[#allocation12 + $0xd58] sm:$0xff] }
 0x5e2   :  { %6426 = vmatprep.subr.bf16.mxu0 %v6425_v23  ;;  %v3097_v23 = vld [vmem:[#allocation15 + $0x228] sm:$0xff] }
 0x5e3   :  { %v6575_v31 = vpack.c.bf16 %v3097_v23, %v3096_v21  ;;  %v2496_v21 = vrot.slane %v2471_v15, 2  ;;  %v2654_v23 = vld [vmem:[#allocation12 + $0xe88] sm:$0xff] }
 0x5e5   :  { %6428 = vmatpush1.bf16.msra.mxu0 %v6427_v29  ;;  %v2614_v29 = vld [vmem:[#allocation12 + $0xd48] sm:$0xff]  ;;  %6576 = vmatpush3.bf16.msra.mxu1 %v6575_v31  ;;  %v7976_v31 = vsel %vm1141_vm11, %v2495_v20, %v2496_v21 }
 0x5e6   :  { %6430 = vmatprep.subr.bf16.mxu0 %v6429_v55  ;;  %v2618_v55 = vld [vmem:[#allocation12 + $0xd68] sm:$0xff]  ;;  %6578 = vmatprep.subr.bf16.mxu1 %v6577_v34 }
 0x5e7   :  { %v6457_v37 = vpack.c.bf16 %v2618_v55, %v2614_v29  ;;  %v2653_v29 = vld [vmem:[#allocation12 + $0xe80] sm:$0xff] }
 0x5e8   :  { %v2657_v55 = vld [vmem:[#allocation12 + $0xea0] sm:$0xff] }
 0x5e9   :  { %6432 = vmatpush1.bf16.msra.mxu0 %v6431_v35  ;;  %v3098_v35 = vld [vmem:[#allocation15 + $0x230] sm:$0xff]  ;;  %v6479_v34 = vpack.c.bf16 %v2657_v55, %v2653_v29 }
 0x5ea   :  { %6434 = vmatprep.subr.bf16.mxu0 %v6433_v36  ;;  %v3099_v36 = vld [vmem:[#allocation15 + $0x238] sm:$0xff]  ;;  %v2559_v55 = vld [vmem:[#allocation12 + $0xb90] sm:$0xff] }
 0x5eb   :  { %v6579_v43 = vpack.c.bf16 %v3099_v36, %v3098_v35  ;;  %v2661_v36 = vld [vmem:[#allocation12 + $0xec0] sm:$0xff] }
 0x5ed   :  { %6436 = vmatpush1.bf16.msra.mxu0 %v6435_v40  ;;  %v2622_v40 = vld [vmem:[#allocation12 + $0xd88] sm:$0xff]  ;;  %6580 = vmatpush3.bf16.msra.mxu1 %v6579_v43  ;;  %v6485_v43 = vpack.c.bf16 %v2516_v5, %v2512_v38  ;;  %v2571_v38 = vld [vmem:[#allocation12 + $0xbf0] sm:$0xff]  ;;  %v2576_v5 = vld [vmem:[#allocation12 + $0xc18] sm:$0xff] }
 0x5ee   :  { %6438 = vmatprep.subr.bf16.mxu0 %v6437_v42  ;;  %v2626_v42 = vld [vmem:[#allocation12 + $0xda8] sm:$0xff]  ;;  %6582 = vmatprep.subr.bf16.mxu1 %v6581_v22  ;;  %v2515_v22 = vld [vmem:[#allocation12 + $0xa30] sm:$0xff] }
 0x5f1   :  { %6440 = vmatpush1.bf16.msra.mxu0 %v6439_v25  ;;  %v3101_v25 = vld [vmem:[#allocation15 + $0x248] sm:$0xff] }
 0x5f2   :  { %6442 = vmatprep.subr.bf16.mxu0 %v6441_v46  ;;  %v6461_v46 = vpack.c.bf16 %v2626_v42, %v2622_v40  ;;  %v2467_v40 = vld [vmem:[#allocation3 + $0x28] sm:$0x3] }
 0x5f5   :  { %6444 = vmatpush1.bf16.msra.mxu0 %v6443_v32  ;;  %v6583_v32 = vpack.c.bf16 %v3101_v25, %v3100_v45  ;;  %v2492_v45 = vrot.slane %v2464_v39, 2  ;;  %v2493_v25 = vrot.slane %v2467_v40, 2  ;;  %v2580_v39 = vld [vmem:[#allocation12 + $0xc38] sm:$0xff] }
 0x5f6   :  { %6446 = vmatprep.subr.bf16.mxu0 %v6445_v30  ;;  %v6463_v30 = vpack.c.bf16 %v2625_v49, %v2621_v47  ;;  %v2524_v47 = vld [vmem:[#allocation12 + $0xa78] sm:$0xff]  ;;  %v2470_v49 = vld [vmem:[#allocation3 + $0x40] sm:$0xfc] }
 0x5f7   :  { %6584 = vmatpush3.bf16.msra.mxu1 %v6583_v32  ;;  %v7981_v56 = vsel %vm1141_vm11, %v2492_v45, %v2493_v25  ;;  %v2501_v58 = vrot.slane %v2470_v49, 2  ;;  %v2588_v45 = vld [vmem:[#allocation12 + $0xc78] sm:$0xff]  ;;  %v2587_v49 = vld [vmem:[#allocation12 + $0xc70] sm:$0xff] }
 0x5f9   :  { %6448 = vmatpush1.bf16.msra.mxu0 %v6447_v1  ;;  %v2472_v1 = vld [vmem:[#allocation3 + $0x50] sm:$0x3] }
 0x5fa   :  { %6450 = vmatprep.subr.bf16.mxu0 %v6449_v8  ;;  %v2487_v8 = vrot.slane %v2465_v61, 2  ;;  %v2499_v52 = vrot.slane %v2472_v1, 2  ;;  %v2531_v1 = vld [vmem:[#allocation12 + $0xab0] sm:$0xff] }
 0x5fc   :  { %v7968_v57 = vsel %vm1141_vm11, %v2486_v7, %v2487_v8  ;;  %v7972_v26 = vsel %vm1141_vm11, %v2498_v12, %v2499_v52  ;;  %v6495_v7 = vpack.c.bf16 %v2531_v1, %v2527_v41  ;;  %v6497_v8 = vpack.c.bf16 %v2540_v6, %v2536_v4  ;;  %v2544_v12 = vld [vmem:[#allocation12 + $0xb18] sm:$0xff]  ;;  %v2603_v41 = vld [vmem:[#allocation12 + $0xcf0] sm:$0xff] }
 0x5fd   :  { %6452 = vmatpush1.bf16.msra.mxu0 %v6451_v19  ;;  %v2649_v19 = vld [vmem:[#allocation12 + $0xe60] sm:$0xff]  ;;  %v2548_v52 = vld [vmem:[#allocation12 + $0xb38] sm:$0xff] }
 0x5fe   :  { %6454 = vmatprep.subr.bf16.mxu0 %v6453_v24  ;;  %v2658_v24 = vld [vmem:[#allocation12 + $0xea8] sm:$0xff]  ;;  %v6475_v27 = vpack.c.bf16 %v2649_v19, %v2645_v18  ;;  %v6501_v15 = vpack.c.bf16 %v2548_v52, %v2544_v12  ;;  %v2552_v18 = vld [vmem:[#allocation12 + $0xb58] sm:$0xff] }
 0x5ff   :  { %v6477_v28 = vpack.c.bf16 %v2658_v24, %v2654_v23  ;;  %v2556_v19 = vld [vmem:[#allocation12 + $0xb78] sm:$0xff]  ;;  %v2555_v23 = vld [vmem:[#allocation12 + $0xb70] sm:$0xff] }
 0x600   :  { %v6505_v21 = vpack.c.bf16 %v2556_v19, %v2552_v18  ;;  %v2560_v24 = vld [vmem:[#allocation12 + $0xb98] sm:$0xff] }
 0x601   :  { %6456 = vmatpush1.bf16.msra.mxu0 %v6455_v63  ;;  %v2662_v63 = vld [vmem:[#allocation12 + $0xec8] sm:$0xff]  ;;  %v2608_v1 = vld [vmem:[#allocation12 + $0xd18] sm:$0xff] }
 0x602   :  { %6458 = vmatprep.subr.bf16.mxu0 %v6457_v37  ;;  %v6481_v35 = vpack.c.bf16 %v2666_v33, %v2662_v63  ;;  %v2665_v37 = vld [vmem:[#allocation12 + $0xee0] sm:$0xff]  ;;  %v2563_v63 = vld [vmem:[#allocation12 + $0xbb0] sm:$0xff]  ;;  %v2568_v33 = vld [vmem:[#allocation12 + $0xbd8] sm:$0xff] }
 0x603   :  { %v6483_v42 = vpack.c.bf16 %v2665_v37, %v2661_v36  ;;  %v2567_v37 = vld [vmem:[#allocation12 + $0xbd0] sm:$0xff]  ;;  %v2612_v4 = vld [vmem:[#allocation12 + $0xd38] sm:$0xff] }
 0x604   :  { %v6515_v40 = vpack.c.bf16 %v2571_v38, %v2567_v37  ;;  %v2620_v12 = vld [vmem:[#allocation12 + $0xd78] sm:$0xff]  ;;  %v2643_v37 = vld [vmem:[#allocation12 + $0xe30] sm:$0xff] }
 0x605   :  { %6460 = vmatpush1.bf16.msra.mxu0 %v6459_v44  ;;  %v2511_v44 = vld [vmem:[#allocation12 + $0xa10] sm:$0xff]  ;;  %v2628_v18 = vld [vmem:[#allocation12 + $0xdb8] sm:$0xff] }
 0x606   :  { %6462 = vmatprep.subr.bf16.mxu0 %v6461_v46  ;;  %v2520_v46 = vld [vmem:[#allocation12 + $0xa58] sm:$0xff]  ;;  %v6487_v53 = vpack.c.bf16 %v2515_v22, %v2511_v44  ;;  %v2579_v44 = vld [vmem:[#allocation12 + $0xc30] sm:$0xff] }
 0x607   :  { %v6489_v32 = vpack.c.bf16 %v2524_v47, %v2520_v46  ;;  %v2584_v22 = vld [vmem:[#allocation12 + $0xc58] sm:$0xff]  ;;  %v2583_v47 = vld [vmem:[#allocation12 + $0xc50] sm:$0xff] }
 0x608   :  { %v6521_v46 = vpack.c.bf16 %v2588_v45, %v2584_v22  ;;  %v2648_v38 = vld [vmem:[#allocation12 + $0xe58] sm:$0xff] }
 0x609   :  { %6464 = vmatpush1.bf16.msra.mxu0 %v6463_v30  ;;  %v2519_v30 = vld [vmem:[#allocation12 + $0xa50] sm:$0xff]  ;;  %v2660_v22 = vld [vmem:[#allocation12 + $0xeb8] sm:$0xff] }
 0x60a   :  { %6466 = vmatprep.subr.bf16.mxu0 %v6465_v54  ;;  %v2523_v54 = vld [vmem:[#allocation12 + $0xa70] sm:$0xff] }
 0x60b   :  { %v6491_v61 = vpack.c.bf16 %v2523_v54, %v2519_v30  ;;  %v2591_v54 = vld [vmem:[#allocation12 + $0xc90] sm:$0xff] }
 0x60d   :  { %6468 = vmatpush1.bf16.msra.mxu0 %v6467_v62  ;;  %v6493_v62 = vpack.c.bf16 %v2532_v60, %v2528_v50  ;;  %v2604_v50 = vld [vmem:[#allocation12 + $0xcf8] sm:$0xff] }
 0x60e   :  { %6470 = vmatprep.subr.bf16.mxu0 %v6469_v3  ;;  %v7987_v3 = vsel %vm1141_vm11, %v2501_v58, %v2502_v59  ;;  %v2595_v58 = vld [vmem:[#allocation12 + $0xcb0] sm:$0xff]  ;;  %v2600_v59 = vld [vmem:[#allocation12 + $0xcd8] sm:$0xff] }
 0x60f   :  { %v6527_v60 = vpack.c.bf16 %v2595_v58, %v2591_v54  ;;  %v3119_v54 = vld [vmem:[#allocation15 + $0x2d8] sm:$0xff] }
 0x610   :  { %2738 = vmatmul.mubr.f32.vlgmr.msra.gmra.mrb[4].mxu0 %v7968_v57 }
 0x611   :  { %2743 = vmatprep.mubr.f32.mxu0 %v7972_v26  ;;  %6472 = vmatpush1.bf16.msra.mxu0 %v6471_v16  ;;  %v2543_v16 = vld [vmem:[#allocation12 + $0xb10] sm:$0xff] }
 0x612   :  { %6474 = vmatprep.subr.bf16.mxu0 %v6473_v17  ;;  %v2547_v17 = vld [vmem:[#allocation12 + $0xb30] sm:$0xff] }
 0x613   :  { %v6503_v20 = vpack.c.bf16 %v2547_v17, %v2543_v16  ;;  %v2619_v16 = vld [vmem:[#allocation12 + $0xd70] sm:$0xff]  ;;  %v2624_v17 = vld [vmem:[#allocation12 + $0xd98] sm:$0xff] }
 0x614   :  { %2744 = vmatmul.mubr.f32.gmra.mrb[6].mxu0 %v7976_v31 }
 0x615   :  { %6476 = vmatpush1.bf16.msra.mxu0 %v6475_v27  ;;  %2814 = vmatprep.mubr.f32.mxu0 %v7539_v0  ;;  %v2564_v27 = vld [vmem:[#allocation12 + $0xbb8] sm:$0xff] }
 0x616   :  { %6478 = vmatprep.subr.bf16.mxu0 %v6477_v28  ;;  %v6509_v29 = vpack.c.bf16 %v2564_v27, %v2560_v24  ;;  %v2636_v24 = vld [vmem:[#allocation12 + $0xdf8] sm:$0xff] }
 0x619   :  { %6480 = vmatpush1.bf16.msra.mxu0 %v6479_v34  ;;  %v2572_v34 = vld [vmem:[#allocation12 + $0xbf8] sm:$0xff] }
 0x61a   :  { %6482 = vmatprep.subr.bf16.mxu0 %v6481_v35  ;;  %v6511_v35 = vpack.c.bf16 %v2563_v63, %v2559_v55  ;;  %v6513_v36 = vpack.c.bf16 %v2572_v34, %v2568_v33  ;;  %v2635_v55 = vld [vmem:[#allocation12 + $0xdf0] sm:$0xff]  ;;  %v2640_v63 = vld [vmem:[#allocation12 + $0xe18] sm:$0xff] }
 0x61b   :  { %v2644_v33 = vld [vmem:[#allocation12 + $0xe38] sm:$0xff] }
 0x61d   :  { %6484 = vmatpush1.bf16.msra.mxu0 %v6483_v42  ;;  %v6517_v42 = vpack.c.bf16 %v2580_v39, %v2576_v5  ;;  %v2652_v5 = vld [vmem:[#allocation12 + $0xe78] sm:$0xff] }
 0x61e   :  { %6486 = vmatprep.subr.bf16.mxu0 %v6485_v43  ;;  %v2575_v43 = vld [vmem:[#allocation12 + $0xc10] sm:$0xff] }
 0x61f   :  { %v6519_v25 = vpack.c.bf16 %v2579_v44, %v2575_v43  ;;  %v2651_v43 = vld [vmem:[#allocation12 + $0xe70] sm:$0xff]  ;;  %v2656_v44 = vld [vmem:[#allocation12 + $0xe98] sm:$0xff] }
 0x620   :  { %5143 = vmatmul.mubr.msk.f32.vlgmr.msra.gmra.mrb[4].mxu0 %vm532_vm3, %v7981_v56 }
 0x621   :  { %6488 = vmatpush1.bf16.msra.mxu0 %v6487_v53  ;;  %2820 = vmatprep.mubr.f32.mxu0 %v7539_v0  ;;  %v2596_v53 = vld [vmem:[#allocation12 + $0xcb8] sm:$0xff] }
 0x622   :  { %6490 = vmatprep.subr.bf16.mxu0 %v6489_v32  ;;  %v6523_v32 = vpack.c.bf16 %v2587_v49, %v2583_v47  ;;  %v6525_v30 = vpack.c.bf16 %v2596_v53, %v2592_v51  ;;  %v2659_v47 = vld [vmem:[#allocation12 + $0xeb0] sm:$0xff]  ;;  %v2664_v49 = vld [vmem:[#allocation12 + $0xed8] sm:$0xff] }
 0x623   :  { %v2668_v51 = vld [vmem:[#allocation12 + $0xef8] sm:$0xff] }
 0x624   :  { %5144 = vmatmul.mubr.msk.f32.gmra.mrb[6].mxu0 %vm532_vm3, %v7987_v3 }
 0x625   :  { %6492 = vmatpush1.bf16.msra.mxu0 %v6491_v61  ;;  %2891 = vmatprep.mubr.f32.mxu0 %v7964_v9  ;;  %v2551_v9 = vld [vmem:[#allocation12 + $0xb50] sm:$0xff]  ;;  %v6529_v61 = vpack.c.bf16 %v2604_v50, %v2600_v59  ;;  %v3103_v50 = vld [vmem:[#allocation15 + $0x258] sm:$0xff] }
 0x626   :  { %6494 = vmatprep.subr.bf16.mxu0 %v6493_v62  ;;  %v6507_v28 = vpack.c.bf16 %v2555_v23, %v2551_v9  ;;  %v2599_v62 = vld [vmem:[#allocation12 + $0xcd0] sm:$0xff]  ;;  %v2632_v23 = vld [vmem:[#allocation12 + $0xdd8] sm:$0xff] }
 0x627   :  { %v6531_v6 = vpack.c.bf16 %v2603_v41, %v2599_v62  ;;  %v2627_v9 = vld [vmem:[#allocation12 + $0xdb0] sm:$0xff] }
 0x628   :  { %v3102_v59 = vld [vmem:[#allocation15 + $0x250] sm:$0xff]  ;;  %v3121_v62 = vld [vmem:[#allocation15 + $0x2e8] sm:$0xff] }
 0x629   :  { %6496 = vmatpush1.bf16.msra.mxu0 %v6495_v7  ;;  %v6533_v7 = vpack.c.bf16 %v2612_v4, %v2608_v1  ;;  %v3104_v1 = vld [vmem:[#allocation15 + $0x260] sm:$0xff]  ;;  %v3105_v4 = vld [vmem:[#allocation15 + $0x268] sm:$0xff] }
 0x62a   :  { %6498 = vmatprep.subr.bf16.mxu0 %v6497_v8  ;;  %v2607_v8 = vld [vmem:[#allocation12 + $0xd10] sm:$0xff] }
 0x62b   :  { %v6535_v52 = vpack.c.bf16 %v2611_v48, %v2607_v8  ;;  %v3106_v8 = vld [vmem:[#allocation15 + $0x270] sm:$0xff]  ;;  %v3107_v48 = vld [vmem:[#allocation15 + $0x278] sm:$0xff] }
 0x62d   :  { %6500 = vmatpush1.bf16.msra.mxu0 %v6499_v14  ;;  %v6537_v14 = vpack.c.bf16 %v2620_v12, %v2616_v11  ;;  %v6595_v11 = vpack.c.bf16 %v3107_v48, %v3106_v8  ;;  %v3140_v12 = vld [vmem:[#allocation15 + $0x380] sm:$0xff] }
 0x62e   :  { %6502 = vmatprep.subr.bf16.mxu0 %v6501_v15  ;;  %v2615_v15 = vld [vmem:[#allocation12 + $0xd50] sm:$0xff] }
 0x62f   :  { %v6539_v19 = vpack.c.bf16 %v2619_v16, %v2615_v15  ;;  %v3962_v15 = vld [vmem:[#allocation15 + $0x980] sm:$0xff]  ;;  %v3963_v16 = vld [vmem:[#allocation15 + $0x988] sm:$0xff] }
 0x631   :  { %6504 = vmatpush1.bf16.msra.mxu0 %v6503_v20  ;;  %v6541_v20 = vpack.c.bf16 %v2628_v18, %v2624_v17  ;;  %v6853_v17 = vpack.c.bf16 %v3963_v16, %v3962_v15  ;;  %v3946_v18 = vld [vmem:[#allocation15 + $0x900] sm:$0xff] }
 0x632   :  { %6506 = vmatprep.subr.bf16.mxu0 %v6505_v21  ;;  %v2623_v21 = vld [vmem:[#allocation12 + $0xd90] sm:$0xff]  ;;  %v3124_v16 = vld [vmem:[#allocation15 + $0x300] sm:$0xff] }
 0x633   :  { %v6543_v27 = vpack.c.bf16 %v2627_v9, %v2623_v21  ;;  %v3964_v21 = vld [vmem:[#allocation15 + $0x990] sm:$0xff]  ;;  %v3965_v9 = vld [vmem:[#allocation15 + $0x998] sm:$0xff] }
 0x635   :  { %6508 = vmatpush1.bf16.msra.mxu0 %v6507_v28  ;;  %v6545_v28 = vpack.c.bf16 %v2636_v24, %v2632_v23  ;;  %v3948_v23 = vld [vmem:[#allocation15 + $0x910] sm:$0xff]  ;;  %v6857_v24 = vpack.c.bf16 %v3965_v9, %v3964_v21  ;;  %v3143_v21 = vld [vmem:[#allocation15 + $0x398] sm:$0xff] }
 0x636   :  { %6510 = vmatprep.subr.bf16.mxu0 %v6509_v29  ;;  %v2631_v29 = vld [vmem:[#allocation12 + $0xdd0] sm:$0xff] }
 0x637   :  { %v6547_v34 = vpack.c.bf16 %v2635_v55, %v2631_v29  ;;  %v3966_v29 = vld [vmem:[#allocation15 + $0x9a0] sm:$0xff]  ;;  %v3967_v55 = vld [vmem:[#allocation15 + $0x9a8] sm:$0xff]  ;;  %v3126_v9 = vld [vmem:[#allocation15 + $0x310] sm:$0xff] }
 0x639   :  { %6512 = vmatpush1.bf16.msra.mxu0 %v6511_v35  ;;  %v6549_v35 = vpack.c.bf16 %v2644_v33, %v2640_v63  ;;  %v3950_v63 = vld [vmem:[#allocation15 + $0x920] sm:$0xff]  ;;  %v6861_v33 = vpack.c.bf16 %v3967_v55, %v3966_v29 }
 0x63a   :  { %6514 = vmatprep.subr.bf16.mxu0 %v6513_v36  ;;  %v2639_v36 = vld [vmem:[#allocation12 + $0xe10] sm:$0xff] }
 0x63b   :  { %v6551_v39 = vpack.c.bf16 %v2643_v37, %v2639_v36  ;;  %v3968_v36 = vld [vmem:[#allocation15 + $0x9b0] sm:$0xff]  ;;  %v3969_v37 = vld [vmem:[#allocation15 + $0x9b8] sm:$0xff] }
 0x63d   :  { %6516 = vmatpush1.bf16.msra.mxu0 %v6515_v40  ;;  %v6553_v40 = vpack.c.bf16 %v2652_v5, %v2648_v38  ;;  %v3952_v38 = vld [vmem:[#allocation15 + $0x930] sm:$0xff]  ;;  %v6865_v5 = vpack.c.bf16 %v3969_v37, %v3968_v36 }
 0x63e   :  { %6518 = vmatprep.subr.bf16.mxu0 %v6517_v42  ;;  %v2647_v42 = vld [vmem:[#allocation12 + $0xe50] sm:$0xff] }
 0x63f   :  { %v6555_v45 = vpack.c.bf16 %v2651_v43, %v2647_v42  ;;  %v3970_v42 = vld [vmem:[#allocation15 + $0x9c0] sm:$0xff]  ;;  %v3971_v43 = vld [vmem:[#allocation15 + $0x9c8] sm:$0xff] }
 0x641   :  { %6520 = vmatpush1.bf16.msra.mxu0 %v6519_v25  ;;  %v6557_v25 = vpack.c.bf16 %v2660_v22, %v2656_v44  ;;  %v3954_v44 = vld [vmem:[#allocation15 + $0x940] sm:$0xff]  ;;  %v6869_v22 = vpack.c.bf16 %v3971_v43, %v3970_v42  ;;  %v3145_v42 = vld [vmem:[#allocation15 + $0x3a8] sm:$0xff] }
 0x642   :  { %6522 = vmatprep.subr.bf16.mxu0 %v6521_v46  ;;  %v2655_v46 = vld [vmem:[#allocation12 + $0xe90] sm:$0xff] }
 0x643   :  { %v6559_v53 = vpack.c.bf16 %v2659_v47, %v2655_v46  ;;  %v3972_v46 = vld [vmem:[#allocation15 + $0x9d0] sm:$0xff]  ;;  %v3973_v47 = vld [vmem:[#allocation15 + $0x9d8] sm:$0xff] }
 0x645   :  { %6524 = vmatpush1.bf16.msra.mxu0 %v6523_v32  ;;  %v6561_v32 = vpack.c.bf16 %v2668_v51, %v2664_v49  ;;  %v3956_v49 = vld [vmem:[#allocation15 + $0x950] sm:$0xff]  ;;  %v6873_v51 = vpack.c.bf16 %v3973_v47, %v3972_v46 }
 0x646   :  { %6526 = vmatprep.subr.bf16.mxu0 %v6525_v30  ;;  %v2663_v30 = vld [vmem:[#allocation12 + $0xed0] sm:$0xff] }
 0x649   :  { %6528 = vmatpush1.bf16.msra.mxu0 %v6527_v60  ;;  %v6587_v60 = vpack.c.bf16 %v3103_v50, %v3102_v59  ;;  %v3976_v59 = vld [vmem:[#allocation15 + $0x9f0] sm:$0xff]  ;;  %v3977_v50 = vld [vmem:[#allocation15 + $0x9f8] sm:$0xff] }
 0x64a   :  { %6530 = vmatprep.subr.bf16.mxu0 %v6529_v61  ;;  %v3120_v61 = vld [vmem:[#allocation15 + $0x2e0] sm:$0xff] }
 0x64b   :  { %v6589_v41 = vpack.c.bf16 %v3121_v62, %v3120_v61  ;;  %v3961_v61 = vld [vmem:[#allocation15 + $0x978] sm:$0xff]  ;;  %v6881_v62 = vpack.c.bf16 %v3977_v50, %v3976_v59  ;;  %v3146_v59 = vld [vmem:[#allocation15 + $0x3b0] sm:$0xff] }
 0x64c   :  { %v3147_v50 = vld [vmem:[#allocation15 + $0x3b8] sm:$0xff] }
 0x64d   :  { %6532 = vmatpush1.bf16.msra.mxu0 %v6531_v6  ;;  %v3122_v6 = vld [vmem:[#allocation15 + $0x2f0] sm:$0xff] }
 0x64e   :  { %6534 = vmatprep.subr.bf16.mxu0 %v6533_v7  ;;  %v3123_v7 = vld [vmem:[#allocation15 + $0x2f8] sm:$0xff] }
 0x651   :  { %6536 = vmatpush1.bf16.msra.mxu0 %v6535_v52  ;;  %v3141_v52 = vld [vmem:[#allocation15 + $0x388] sm:$0xff] }
 0x652   :  { %6538 = vmatprep.subr.bf16.mxu0 %v6537_v14  ;;  %v6597_v14 = vpack.c.bf16 %v3141_v52, %v3140_v12 }
 0x655   :  { %6540 = vmatpush1.bf16.msra.mxu0 %v6539_v19  ;;  %v3947_v19 = vld [vmem:[#allocation15 + $0x908] sm:$0xff] }
 0x656   :  { %6542 = vmatprep.subr.bf16.mxu0 %v6541_v20  ;;  %v6855_v20 = vpack.c.bf16 %v3947_v19, %v3946_v18  ;;  %v3142_v18 = vld [vmem:[#allocation15 + $0x390] sm:$0xff] }
 0x657   :  { %v6601_v55 = vpack.c.bf16 %v3143_v21, %v3142_v18 }
 0x659   :  { %6544 = vmatpush1.bf16.msra.mxu0 %v6543_v27  ;;  %v3949_v27 = vld [vmem:[#allocation15 + $0x918] sm:$0xff] }
 0x65a   :  { %6546 = vmatprep.subr.bf16.mxu0 %v6545_v28  ;;  %v6859_v28 = vpack.c.bf16 %v3949_v27, %v3948_v23 }
 0x65d   :  { %6548 = vmatpush1.bf16.msra.mxu0 %v6547_v34  ;;  %v3951_v34 = vld [vmem:[#allocation15 + $0x928] sm:$0xff] }
 0x65e   :  { %6550 = vmatprep.subr.bf16.mxu0 %v6549_v35  ;;  %v6863_v35 = vpack.c.bf16 %v3951_v34, %v3950_v63 }
 0x660   :  { %2892 = vmatmul.mubr.f32.vlgmr.msra.gmra.mrb[8].mxu0 %v7968_v57  ;;  %v2667_v57 = vld [vmem:[#allocation12 + $0xef0] sm:$0xff] }
 0x661   :  { %2897 = vmatprep.mubr.f32.mxu0 %v7972_v26  ;;  %6552 = vmatpush1.bf16.msra.mxu0 %v6551_v39  ;;  %v6563_v26 = vpack.c.bf16 %v2667_v57, %v2663_v30  ;;  %v3953_v39 = vld [vmem:[#allocation15 + $0x938] sm:$0xff]  ;;  %v3974_v30 = vld [vmem:[#allocation15 + $0x9e0] sm:$0xff]  ;;  %v3975_v57 = vld [vmem:[#allocation15 + $0x9e8] sm:$0xff] }
 0x662   :  { %6554 = vmatprep.subr.bf16.mxu0 %v6553_v40  ;;  %v6867_v40 = vpack.c.bf16 %v3953_v39, %v3952_v38 }
 0x664   :  { %2898 = vmatmul.mubr.f32.gmra.mrb[10].mxu0 %v7976_v31  ;;  %v3118_v31 = vld [vmem:[#allocation15 + $0x2d0] sm:$0xff] }
 0x665   :  { %6556 = vmatpush1.bf16.msra.mxu0 %v6555_v45  ;;  %2968 = vmatprep.mubr.f32.mxu0 %v7539_v0  ;;  %v6585_v58 = vpack.c.bf16 %v3119_v54, %v3118_v31  ;;  %v3955_v45 = vld [vmem:[#allocation15 + $0x948] sm:$0xff]  ;;  %v6877_v31 = vpack.c.bf16 %v3975_v57, %v3974_v30 }
 0x666   :  { %6558 = vmatprep.subr.bf16.mxu0 %v6557_v25  ;;  %v6871_v25 = vpack.c.bf16 %v3955_v45, %v3954_v44  ;;  %v3959_v54 = vld [vmem:[#allocation15 + $0x968] sm:$0xff] }
 0x667   :  { %6586 = vmatprep.subr.bf16.mxu1 %v6585_v58 }
 0x668   :  { %6588 = vmatpush3.bf16.msra.mxu1 %v6587_v60  ;;  %v3960_v60 = vld [vmem:[#allocation15 + $0x970] sm:$0xff] }
 0x669   :  { %6560 = vmatpush1.bf16.msra.mxu0 %v6559_v53  ;;  %6590 = vmatprep.subr.bf16.mxu1 %v6589_v41  ;;  %v3957_v53 = vld [vmem:[#allocation15 + $0x958] sm:$0xff]  ;;  %v6883_v41 = vpack.c.bf16 %v3961_v61, %v3960_v60 }
 0x66a   :  { %6562 = vmatprep.subr.bf16.mxu0 %v6561_v32  ;;  %v6875_v32 = vpack.c.bf16 %v3957_v53, %v3956_v49 }
 0x66d   :  { %6564 = vmatpush1.bf16.msra.mxu0 %v6563_v26  ;;  %v3958_v26 = vld [vmem:[#allocation15 + $0x960] sm:$0xff] }
 0x66e   :  { %6854 = vmatprep.subr.bf16.mxu0 %v6853_v17  ;;  %v6879_v58 = vpack.c.bf16 %v3959_v54, %v3958_v26  ;;  %v3125_v17 = vld [vmem:[#allocation15 + $0x308] sm:$0xff]  ;;  %v3128_v26 = vld [vmem:[#allocation15 + $0x320] sm:$0xff] }
 0x66f   :  { %v6599_v27 = vpack.c.bf16 %v3125_v17, %v3124_v16  ;;  %v3148_v16 = vld [vmem:[#allocation15 + $0x3c0] sm:$0xff]  ;;  %v3149_v17 = vld [vmem:[#allocation15 + $0x3c8] sm:$0xff] }
 0x670   :  { %5145 = vmatmul.mubr.msk.f32.vlgmr.msra.gmra.mrb[8].mxu0 %vm532_vm3, %v7981_v56  ;;  %v6591_v56 = vpack.c.bf16 %v3105_v4, %v3104_v1  ;;  %v4184_v1 = vld [vmem:[#allocation15 + $0xb80] sm:$0xff]  ;;  %v4185_v4 = vld [vmem:[#allocation15 + $0xb88] sm:$0xff] }
 0x671   :  { %2974 = vmatprep.mubr.f32.mxu0 %v7539_v0  ;;  %6856 = vmatpush3.bf16.msra.mxu0 %v6855_v20 }
 0x672   :  { %6592 = vmatpush3.bf16.msra.mxu1 %v6591_v56  ;;  %6858 = vmatprep.subr.bf16.mxu0 %v6857_v24  ;;  %v8001_v56 = vld [vmem:[#allocation13] sm:$0xf] }
 0x673   :  { %v2998_v8 = vrot.slane %v8001_v56, %v7829_v13 }
 0x674   :  { %5146 = vmatmul.mubr.msk.f32.gmra.mrb[10].mxu0 %vm532_vm3, %v7987_v3  ;;  %v6593_v3 = vpack.c.bf16 %v3123_v7, %v3122_v6  ;;  %v6917_v6 = vpack.c.bf16 %v4185_v4, %v4184_v1  ;;  %v2994_v7 = vrot.slane %v8001_v56, %v7826_v10  ;;  %v3127_v10 = vld [vmem:[#allocation15 + $0x318] sm:$0xff] }
 0x675   :  { %6860 = vmatpush3.bf16.msra.mxu0 %v6859_v28  ;;  %v6603_v63 = vpack.c.bf16 %v3127_v10, %v3126_v9 }
 0x676   :  { %6594 = vmatprep.subr.bf16.mxu1 %v6593_v3  ;;  %6862 = vmatprep.subr.bf16.mxu0 %v6861_v33 }
 0x677   :  { %6596 = vmatpush3.bf16.msra.mxu1 %v6595_v11 }
 0x678   :  { %6598 = vmatprep.subr.bf16.mxu1 %v6597_v14 }
 0x679   :  { %6864 = vmatpush3.bf16.msra.mxu0 %v6863_v35 }
 0x67a   :  { %6866 = vmatprep.subr.bf16.mxu0 %v6865_v5 }
 0x67d   :  { %6868 = vmatpush3.bf16.msra.mxu0 %v6867_v40  ;;  %v3144_v40 = vld [vmem:[#allocation15 + $0x3a0] sm:$0xff] }
 0x67e   :  { %6870 = vmatprep.subr.bf16.mxu0 %v6869_v22  ;;  %v6605_v57 = vpack.c.bf16 %v3145_v42, %v3144_v40  ;;  %v3136_v40 = vld [vmem:[#allocation15 + $0x360] sm:$0xff]  ;;  %v3137_v42 = vld [vmem:[#allocation15 + $0x368] sm:$0xff] }
 0x681   :  { %6872 = vmatpush3.bf16.msra.mxu0 %v6871_v25 }
 0x682   :  { %6874 = vmatprep.subr.bf16.mxu0 %v6873_v51 }
 0x685   :  { %6876 = vmatpush3.bf16.msra.mxu0 %v6875_v32 }
 0x686   :  { %6878 = vmatprep.subr.bf16.mxu0 %v6877_v31  ;;  %v3129_v31 = vld [vmem:[#allocation15 + $0x328] sm:$0xff] }
 0x689   :  { %6880 = vmatpush3.bf16.msra.mxu0 %v6879_v58 }
 0x68a   :  { %6882 = vmatprep.subr.bf16.mxu0 %v6881_v62 }
 0x68d   :  { %6884 = vmatpush3.bf16.msra.mxu0 %v6883_v41 }
 0x68e   :  { %6918 = vmatprep.subr.bf16.mxu0 %v6917_v6  ;;  %v6607_v6 = vpack.c.bf16 %v3129_v31, %v3128_v26  ;;  %v3001_v31 = vsub.s32 2, %v7823_v2 }
 0x6f3   :  { %v2816_v48 = vpop.f32.mrb[4].mxu0 }
 0x6f4   :  { %v3011_v3 = vadd.f32 %v2994_v7, %v2816_v48  ;;  %v2818_v11 = vpop.f32.mrb[5].mxu0  ;;  %v6609_v48 = vpack.c.bf16 %v3147_v50, %v3146_v59  ;;  %v3005_v59 = vsub.s32 3, %v7823_v2  ;;  %v3002_v50 = vrot.slane %v8001_v56, %v3001_v31  ;;  %v8105_v2 = vld [vmem:[#allocation15 + $0x18] sm:$0xff] }
 0x6f5   :  { %v3012_v12 = vadd.f32 %v2998_v8, %v2818_v11  ;;  %v3131_v11 = vld [vmem:[#allocation15 + $0x338] sm:$0xff] }
 0x6f6   :  { %v8007_v52 = vmax.f32 %v3011_v3, 0.0  ;;  %v3130_v3 = vld [vmem:[#allocation15 + $0x330] sm:$0xff] }
 0x6f7   :  { %v8009_v14 = vmax.f32 %v3012_v12, 0.0  ;;  %v2822_v15 = vpop.f32.mrb[6].mxu0 }
 0x6f8   :  { %v3015_v19 = vadd.f32 %v2994_v7, %v2822_v15  ;;  %v2824_v20 = vpop.f32.mrb[7].mxu0  ;;  %v3164_v24 = vrot.slane %v8007_v52, 1  ;;  %v3534_v35 = vrot.slane %v8007_v52, 2  ;;  %v3756_v45 = vrot.slane %v8007_v52, 3 }
 0x6f9   :  { %v3016_v23 = vadd.f32 %v2998_v8, %v2824_v20  ;;  %v3167_v29 = vrot.slane %v8009_v14, 1  ;;  %v3537_v5 = vrot.slane %v8009_v14, 2  ;;  %v3759_v39 = vrot.slane %v8009_v14, 3 }
 0x6fa   :  { %v8011_v13 = vmax.f32 %v3015_v19, 0.0  ;;  %v3981_v53 = vrot.slane %v8009_v14, 4  ;;  %v3978_v32 = vrot.slane %v8007_v52, 4  ;;  %v4203_v62 = vrot.slane %v8009_v14, 5 }
 0x6fb   :  { %v8014_v28 = vmax.f32 %v3016_v23, 0.0  ;;  %v4200_v1 = vrot.slane %v8007_v52, 5  ;;  %v4425_v7 = vrot.slane %v8009_v14, 6  ;;  %v4422_v19 = vrot.slane %v8007_v52, 6 }
 0x6fc   :  { %v3166_v33 = vsel %vm3165_vm12, %v8011_v13, %v3164_v24  ;;  %v3317_v34 = vrot.slane %v8011_v13, 7  ;;  %v3535_v36 = vrot.slane %v8011_v13, 1  ;;  %v3757_v47 = vrot.slane %v8011_v13, 2 }
 0x6fd   :  { %v3168_v37 = vsel %vm3165_vm12, %v8014_v28, %v3167_v29  ;;  %v3319_v38 = vrot.slane %v8014_v28, 7  ;;  %v3538_v44 = vrot.slane %v8014_v28, 1  ;;  %v3760_v46 = vrot.slane %v8014_v28, 2 }
 0x6fe   :  { %3241 = vmatprep.mubr.f32.mxu1 %v3168_v37  ;;  %v8029_v43 = vsel %vm3165_vm12, %v3317_v34, %v8007_v52  ;;  %v8033_v22 = vsel %vm3165_vm12, %v3535_v36, %v3534_v35  ;;  %v3982_v49 = vrot.slane %v8014_v28, 3  ;;  %v3979_v30 = vrot.slane %v8011_v13, 3  ;;  %v3151_v34 = vld [vmem:[#allocation15 + $0x3d8] sm:$0xff]  ;;  %v3134_v35 = vld [vmem:[#allocation15 + $0x350] sm:$0xff]  ;;  %v3152_v37 = vld [vmem:[#allocation15 + $0x3e0] sm:$0xff] }
 0x6ff   :  { %3242 = vmatmul.mubr.f32.vlgmr.msra.gmra.mrb[8].mxu1 %v3166_v33  ;;  %v8038_v25 = vsel %vm3165_vm12, %v3319_v38, %v8009_v14  ;;  %v8044_v51 = vsel %vm3165_vm12, %v3538_v44, %v3537_v5  ;;  %v8050_v54 = vsel %vm3165_vm12, %v3760_v46, %v3759_v39  ;;  %v8053_v58 = vsel %vm3165_vm12, %v3757_v47, %v3756_v45  ;;  %v3135_v36 = vld [vmem:[#allocation15 + $0x358] sm:$0xff]  ;;  %v3153_v38 = vld [vmem:[#allocation15 + $0x3e8] sm:$0xff]  ;;  %v3154_v44 = vld [vmem:[#allocation15 + $0x3f0] sm:$0xff] }
 0x700   :  { %6600 = vmatpush3.bf16.msra.mxu1 %v6599_v27  ;;  %v8056_v60 = vsel %vm3165_vm12, %v3982_v49, %v3981_v53  ;;  %v8059_v61 = vsel %vm3165_vm12, %v3979_v30, %v3978_v32  ;;  %v4204_v41 = vrot.slane %v8014_v28, 4  ;;  %v4201_v4 = vrot.slane %v8011_v13, 4  ;;  %v3155_v45 = vld [vmem:[#allocation15 + $0x3f8] sm:$0xff]  ;;  %v3138_v49 = vld [vmem:[#allocation15 + $0x370] sm:$0xff]  ;;  %v3043_v32 = vld [vmem:[#allocation15 + $0x80] sm:$0xff] }
 0x701   :  { %6602 = vmatprep.subr.bf16.mxu1 %v6601_v55  ;;  %v4426_v8 = vrot.slane %v8014_v28, 5  ;;  %v4423_v20 = vrot.slane %v8011_v13, 5  ;;  %v4647_v21 = vrot.slane %v8009_v14, 7  ;;  %v4648_v9 = vrot.slane %v8014_v28, 6  ;;  %v3132_v55 = vld [vmem:[#allocation15 + $0x340] sm:$0xff]  ;;  %v3150_v28 = vld [vmem:[#allocation15 + $0x3d0] sm:$0xff] }
 0x702   :  { %v8068_v12 = vsel %vm3165_vm12, %v4204_v41, %v4203_v62  ;;  %v8071_v15 = vsel %vm3165_vm12, %v4201_v4, %v4200_v1  ;;  %v4644_v10 = vrot.slane %v8007_v52, 7  ;;  %v4645_v23 = vrot.slane %v8011_v13, 6  ;;  %v3139_v53 = vld [vmem:[#allocation15 + $0x378] sm:$0xff]  ;;  %v3044_v30 = vld [vmem:[#allocation15 + $0x88] sm:$0xff]  ;;  %v3027_v41 = vld [vmem:[#allocation15] sm:$0xff] }
 0x703   :  { %v8074_v18 = vsel %vm3165_vm12, %v4426_v8, %v4425_v7  ;;  %v6611_v24 = vpack.c.bf16 %v3131_v11, %v3130_v3  ;;  %v8083_v27 = vsel %vm3165_vm12, %v4423_v20, %v4422_v19  ;;  %v6613_v29 = vpack.c.bf16 %v3149_v17, %v3148_v16  ;;  %v3028_v1 = vld [vmem:[#allocation15 + $0x8] sm:$0xff]  ;;  %v8099_v8 = vld [vmem:[#allocation15 + $0x90] sm:$0xff]  ;;  %v8101_v11 = vld [vmem:[#allocation15 + $0x98] sm:$0xff] }
 0x704   :  { %6604 = vmatpush3.bf16.msra.mxu1 %v6603_v63  ;;  %v3133_v63 = vld [vmem:[#allocation15 + $0x348] sm:$0xff]  ;;  %v8086_v33 = vsel %vm3165_vm12, %v4648_v9, %v4647_v21  ;;  %v8089_v14 = vsel %vm3165_vm12, %v4645_v23, %v4644_v10  ;;  %v6617_v13 = vpack.c.bf16 %v3151_v34, %v3150_v28  ;;  %v6619_v5 = vpack.c.bf16 %v3135_v36, %v3134_v35  ;;  %v8103_v16 = vld [vmem:[#allocation15 + $0x10] sm:$0xff] }
 0x705   :  { %6606 = vmatprep.subr.bf16.mxu1 %v6605_v57  ;;  %v6615_v52 = vpack.c.bf16 %v3133_v63, %v3132_v55  ;;  %v6621_v39 = vpack.c.bf16 %v3153_v38, %v3152_v37  ;;  %v6623_v46 = vpack.c.bf16 %v3137_v42, %v3136_v40  ;;  %v6625_v47 = vpack.c.bf16 %v3155_v45, %v3154_v44  ;;  %v8097_v7 = vld [vmem:[#allocation15 + $0xb08] sm:$0xff]  ;;  %v8107_v19 = vld [vmem:[#allocation15 + $0xb90] sm:$0xff] }
 0x706   :  { %v6627_v57 = vpack.c.bf16 %v3139_v53, %v3138_v49  ;;  %v6629_v26 = vpack.c.bf16 %v3044_v30, %v3043_v32  ;;  %v3006_v62 = vrot.slane %v8001_v56, %v3005_v59  ;;  %v8109_v56 = vld [vmem:[#allocation15 + $0xb98] sm:$0xff]  ;;  %v6631_v21 = vpack.c.bf16 %v3028_v1, %v3027_v41 }
 0x708   :  { %6608 = vmatpush3.bf16.msra.mxu1 %v6607_v6  ;;  %v8095_v6 = vld [vmem:[#allocation15 + $0xb00] sm:$0xff] }
 0x709   :  { %6610 = vmatprep.subr.bf16.mxu1 %v6609_v48  ;;  %v6919_v23 = vpack.c.bf16 %v8097_v7, %v8095_v6 }
 0x70c   :  { %6612 = vmatpush3.bf16.msra.mxu1 %v6611_v24  ;;  %v6633_v24 = vpack.c.bf16 %v8101_v11, %v8099_v8  ;;  %v4171_v11 = vld [vmem:[#allocation15 + $0xb18] sm:$0xff] }
 0x70d   :  { %6614 = vmatprep.subr.bf16.mxu1 %v6613_v29  ;;  %v6635_v29 = vpack.c.bf16 %v8105_v2, %v8103_v16  ;;  %v4191_v16 = vld [vmem:[#allocation15 + $0xbb8] sm:$0xff]  ;;  %v3051_v2 = vld [vmem:[#allocation15 + $0xc0] sm:$0xff] }
 0x710   :  { %6616 = vmatpush3.bf16.msra.mxu1 %v6615_v52  ;;  %v6921_v52 = vpack.c.bf16 %v8109_v56, %v8107_v19 }
 0x711   :  { %6618 = vmatprep.subr.bf16.mxu1 %v6617_v13 }
 0x714   :  { %6620 = vmatpush3.bf16.msra.mxu1 %v6619_v5 }
 0x715   :  { %6622 = vmatprep.subr.bf16.mxu1 %v6621_v39 }
 0x718   :  { %6624 = vmatpush3.bf16.msra.mxu1 %v6623_v46 }
 0x719   :  { %6626 = vmatprep.subr.bf16.mxu1 %v6625_v47 }
 0x71c   :  { %6628 = vmatpush3.bf16.msra.mxu1 %v6627_v57 }
 0x71d   :  { %6630 = vmatprep.subr.bf16.mxu1 %v6629_v26 }
 0x743   :  { %v2970_v4 = vpop.f32.mrb[8].mxu0 }
 0x744   :  { %v3013_v48 = vadd.f32 %v3002_v50, %v2970_v4  ;;  %v2972_v3 = vpop.f32.mrb[9].mxu0 }
 0x745   :  { %v3014_v17 = vadd.f32 %v3006_v62, %v2972_v3  ;;  %v4170_v3 = vld [vmem:[#allocation15 + $0xb10] sm:$0xff] }
 0x746   :  { %v8111_v20 = vmax.f32 %v3013_v48, 0.0 }
 0x747   :  { %v8113_v9 = vmax.f32 %v3014_v17, 0.0  ;;  %v2976_v10 = vpop.f32.mrb[10].mxu0  ;;  %v3031_v17 = vld [vmem:[#allocation15 + $0x20] sm:$0xff] }
 0x748   :  { %v3017_v55 = vadd.f32 %v3002_v50, %v2976_v10  ;;  %v2978_v63 = vpop.f32.mrb[11].mxu0  ;;  %v3169_v28 = vrot.slane %v8111_v20, 1  ;;  %v3984_v34 = vrot.slane %v8111_v20, 4  ;;  %v4206_v37 = vrot.slane %v8111_v20, 5  ;;  %v3047_v50 = vld [vmem:[#allocation15 + $0xa0] sm:$0xff] }
 0x749   :  { %v3018_v13 = vadd.f32 %v3006_v62, %v2978_v63  ;;  %v3171_v35 = vrot.slane %v8113_v9, 1  ;;  %v3987_v36 = vrot.slane %v8113_v9, 4  ;;  %v4209_v5 = vrot.slane %v8113_v9, 5  ;;  %v3048_v62 = vld [vmem:[#allocation15 + $0xa8] sm:$0xff] }
 0x74a   :  { %v8128_v38 = vmax.f32 %v3017_v55, 0.0  ;;  %v4431_v39 = vrot.slane %v8113_v9, 6  ;;  %v4428_v40 = vrot.slane %v8111_v20, 6  ;;  %v4653_v44 = vrot.slane %v8113_v9, 7  ;;  %v3032_v63 = vld [vmem:[#allocation15 + $0x28] sm:$0xff] }
 0x74b   :  { %v8133_v42 = vmax.f32 %v3018_v13, 0.0  ;;  %v3543_v45 = vrot.slane %v8113_v9, 2  ;;  %v4650_v46 = vrot.slane %v8111_v20, 7  ;;  %v3765_v6 = vrot.slane %v8113_v9, 3 }
 0x74c   :  { %v3170_v47 = vsel %vm3165_vm12, %v8128_v38, %v3169_v28  ;;  %v3985_v49 = vrot.slane %v8128_v38, 3  ;;  %v4207_v53 = vrot.slane %v8128_v38, 4  ;;  %v3321_v32 = vrot.slane %v8128_v38, 7  ;;  %v4188_v28 = vld [vmem:[#allocation15 + $0xba0] sm:$0xff] }
 0x74d   :  { %v3172_v30 = vsel %vm3165_vm12, %v8133_v42, %v3171_v35  ;;  %v3988_v57 = vrot.slane %v8133_v42, 3  ;;  %v4210_v26 = vrot.slane %v8133_v42, 4  ;;  %v3323_v31 = vrot.slane %v8133_v42, 7 }
 0x74e   :  { %3311 = vmatprep.mubr.f32.mxu1 %v3172_v30  ;;  %v3986_v59 = vsel %vm3165_vm12, %v3985_v49, %v3984_v34  ;;  %v8150_v41 = vsel %vm3165_vm12, %v4207_v53, %v4206_v37  ;;  %v4432_v1 = vrot.slane %v8133_v42, 5  ;;  %v8155_v4 = vsel %vm3165_vm12, %v3321_v32, %v8111_v20  ;;  %v4189_v34 = vld [vmem:[#allocation15 + $0xba8] sm:$0xff]  ;;  %v3050_v53 = vld [vmem:[#allocation15 + $0xb8] sm:$0xff] }
 0x74f   :  { %3312 = vmatmul.mubr.f32.vlgmr.msra.gmra.mrb[10].mxu1 %v3170_v47  ;;  %v3989_v8 = vsel %vm3165_vm12, %v3988_v57, %v3987_v36  ;;  %v4211_v48 = vsel %vm3165_vm12, %v4210_v26, %v4209_v5  ;;  %v8161_v10 = vsel %vm3165_vm12, %v3323_v31, %v8113_v9  ;;  %v4429_v55 = vrot.slane %v8128_v38, 5  ;;  %v4172_v26 = vld [vmem:[#allocation15 + $0xb20] sm:$0xff] }
 0x750   :  { %6632 = vmatpush3.bf16.msra.mxu1 %v6631_v21  ;;  %3393 = vmatprep.mubr.f32.mxu1 %v8038_v25  ;;  %v8166_v13 = vsel %vm3165_vm12, %v4432_v1, %v4431_v39  ;;  %v4654_v35 = vrot.slane %v8133_v42, 6  ;;  %v3544_v36 = vrot.slane %v8133_v42, 1  ;;  %v4651_v37 = vrot.slane %v8128_v38, 6  ;;  %v3049_v39 = vld [vmem:[#allocation15 + $0xb0] sm:$0xff]  ;;  %v3035_v1 = vld [vmem:[#allocation15 + $0x40] sm:$0xff] }
 0x751   :  { %4128 = vmatprep.mubr.f32.mxu0 %v3989_v8  ;;  %6634 = vmatprep.subr.bf16.mxu1 %v6633_v24  ;;  %v6637_v5 = vpack.c.bf16 %v3048_v62, %v3047_v50  ;;  %v8172_v47 = vsel %vm3165_vm12, %v4429_v55, %v4428_v40  ;;  %v3540_v25 = vrot.slane %v8111_v20, 2  ;;  %v3541_v21 = vrot.slane %v8128_v38, 1  ;;  %v3034_v50 = vld [vmem:[#allocation15 + $0x38] sm:$0xff]  ;;  %v4190_v62 = vld [vmem:[#allocation15 + $0xbb0] sm:$0xff] }
 0x752   :  { %4129 = vmatmul.mubr.f32.vlgmr.msra.gmra.mrb[12].mxu0 %v3986_v59  ;;  %v6923_v49 = vpack.c.bf16 %v4171_v11, %v4170_v3  ;;  %v8177_v32 = vsel %vm3165_vm12, %v4654_v35, %v4653_v44  ;;  %v8180_v30 = vsel %vm3165_vm12, %v3544_v36, %v3543_v45  ;;  %v8183_v24 = vsel %vm3165_vm12, %v4651_v37, %v4650_v46  ;;  %v4173_v44 = vld [vmem:[#allocation15 + $0xb28] sm:$0xff]  ;;  %v3033_v45 = vld [vmem:[#allocation15 + $0x30] sm:$0xff]  ;;  %v4192_v3 = vld [vmem:[#allocation15 + $0xbc0] sm:$0xff] }
 0x753   :  { %6920 = vmatpush3.bf16.msra.mxu0 %v6919_v23  ;;  %4350 = vmatprep.mubr.f32.mxu0 %v4211_v48  ;;  %v6639_v40 = vpack.c.bf16 %v3032_v63, %v3031_v17  ;;  %v6925_v57 = vpack.c.bf16 %v4189_v34, %v4188_v28  ;;  %v8189_v31 = vsel %vm3165_vm12, %v3541_v21, %v3540_v25  ;;  %v3766_v7 = vrot.slane %v8133_v42, 2  ;;  %v4175_v42 = vld [vmem:[#allocation15 + $0xb38] sm:$0xff]  ;;  %v3036_v48 = vld [vmem:[#allocation15 + $0x48] sm:$0xff]  ;;  %v3053_v17 = vld [vmem:[#allocation15 + $0xd0] sm:$0xff] }
 0x754   :  { %6636 = vmatpush3.bf16.msra.mxu1 %v6635_v29  ;;  %6922 = vmatprep.subr.bf16.mxu0 %v6921_v52  ;;  %v3762_v23 = vrot.slane %v8111_v20, 3  ;;  %v3763_v46 = vrot.slane %v8128_v38, 2  ;;  %v6641_v59 = vpack.c.bf16 %v3050_v53, %v3049_v39  ;;  %v3052_v29 = vld [vmem:[#allocation15 + $0xc8] sm:$0xff]  ;;  %v6927_v9 = vpack.c.bf16 %v4173_v44, %v4172_v26  ;;  %v4174_v38 = vld [vmem:[#allocation15 + $0xb30] sm:$0xff]  ;;  %v3054_v55 = vld [vmem:[#allocation15 + $0xd8] sm:$0xff] }
 0x755   :  { %6638 = vmatprep.subr.bf16.mxu1 %v6637_v5  ;;  %v8202_v19 = vsel %vm3165_vm12, %v3766_v7, %v3765_v6  ;;  %v6643_v20 = vpack.c.bf16 %v3034_v50, %v3033_v45  ;;  %v6929_v52 = vpack.c.bf16 %v4191_v16, %v4190_v62  ;;  %v6645_v8 = vpack.c.bf16 %v3052_v29, %v3051_v2  ;;  %v4193_v11 = vld [vmem:[#allocation15 + $0xbc8] sm:$0xff]  ;;  %v4176_v35 = vld [vmem:[#allocation15 + $0xb40] sm:$0xff]  ;;  %v3037_v37 = vld [vmem:[#allocation15 + $0x50] sm:$0xff] }
 0x756   :  { %v8205_v56 = vsel %vm3165_vm12, %v3763_v46, %v3762_v23  ;;  %v6931_v63 = vpack.c.bf16 %v4175_v42, %v4174_v38  ;;  %v6647_v28 = vpack.c.bf16 %v3036_v48, %v3035_v1  ;;  %v6933_v34 = vpack.c.bf16 %v4193_v11, %v4192_v3  ;;  %v4177_v36 = vld [vmem:[#allocation15 + $0xb48] sm:$0xff]  ;;  %v3038_v25 = vld [vmem:[#allocation15 + $0x58] sm:$0xff]  ;;  %v4194_v21 = vld [vmem:[#allocation15 + $0xbd0] sm:$0xff] }
 0x757   :  { %6924 = vmatpush3.bf16.msra.mxu0 %v6923_v49  ;;  %v6649_v5 = vpack.c.bf16 %v3054_v55, %v3053_v17  ;;  %v4195_v49 = vld [vmem:[#allocation15 + $0xbd8] sm:$0xff]  ;;  %v3055_v39 = vld [vmem:[#allocation15 + $0xe0] sm:$0xff]  ;;  %v3056_v53 = vld [vmem:[#allocation15 + $0xe8] sm:$0xff] }
 0x758   :  { %6640 = vmatpush3.bf16.msra.mxu1 %v6639_v40  ;;  %6926 = vmatprep.subr.bf16.mxu0 %v6925_v57  ;;  %v6935_v40 = vpack.c.bf16 %v4177_v36, %v4176_v35  ;;  %v6651_v57 = vpack.c.bf16 %v3038_v25, %v3037_v37  ;;  %v6937_v26 = vpack.c.bf16 %v4195_v49, %v4194_v21  ;;  %v4178_v44 = vld [vmem:[#allocation15 + $0xb50] sm:$0xff]  ;;  %v4179_v45 = vld [vmem:[#allocation15 + $0xb58] sm:$0xff]  ;;  %v3039_v6 = vld [vmem:[#allocation15 + $0x60] sm:$0xff] }
 0x759   :  { %6642 = vmatprep.subr.bf16.mxu1 %v6641_v59  ;;  %v6653_v7 = vpack.c.bf16 %v3056_v53, %v3055_v39  ;;  %v3040_v23 = vld [vmem:[#allocation15 + $0x68] sm:$0xff]  ;;  %v4196_v46 = vld [vmem:[#allocation15 + $0xbe0] sm:$0xff]  ;;  %v3057_v50 = vld [vmem:[#allocation15 + $0xf0] sm:$0xff]  ;;  %v6939_v16 = vpack.c.bf16 %v4179_v45, %v4178_v44 }
 0x75a   :  { %v4197_v59 = vld [vmem:[#allocation15 + $0xbe8] sm:$0xff]  ;;  %v3058_v62 = vld [vmem:[#allocation15 + $0xf8] sm:$0xff]  ;;  %v6655_v2 = vpack.c.bf16 %v3040_v23, %v3039_v6  ;;  %v4198_v1 = vld [vmem:[#allocation15 + $0xbf0] sm:$0xff] }
 0x75b   :  { %6928 = vmatpush3.bf16.msra.mxu0 %v6927_v9  ;;  %v6941_v29 = vpack.c.bf16 %v4197_v59, %v4196_v46  ;;  %v4180_v9 = vld [vmem:[#allocation15 + $0xb60] sm:$0xff]  ;;  %v6657_v38 = vpack.c.bf16 %v3058_v62, %v3057_v50  ;;  %v3042_v42 = vld [vmem:[#allocation15 + $0x78] sm:$0xff]  ;;  %v3076_v3 = vld [vmem:[#allocation15 + $0x188] sm:$0xff] }
 0x75c   :  { %6644 = vmatpush3.bf16.msra.mxu1 %v6643_v20  ;;  %6930 = vmatprep.subr.bf16.mxu0 %v6929_v52  ;;  %v4181_v20 = vld [vmem:[#allocation15 + $0xb68] sm:$0xff]  ;;  %v3041_v52 = vld [vmem:[#allocation15 + $0x70] sm:$0xff]  ;;  %v3075_v48 = vld [vmem:[#allocation15 + $0x180] sm:$0xff] }
 0x75d   :  { %6646 = vmatprep.subr.bf16.mxu1 %v6645_v8  ;;  %v4199_v8 = vld [vmem:[#allocation15 + $0xbf8] sm:$0xff]  ;;  %v6943_v11 = vpack.c.bf16 %v4181_v20, %v4180_v9  ;;  %v6659_v17 = vpack.c.bf16 %v3042_v42, %v3041_v52  ;;  %v3059_v35 = vld [vmem:[#allocation15 + $0x100] sm:$0xff]  ;;  %v3060_v36 = vld [vmem:[#allocation15 + $0x108] sm:$0xff] }
 0x75e   :  { %v6945_v55 = vpack.c.bf16 %v4199_v8, %v4198_v1  ;;  %v4406_v37 = vld [vmem:[#allocation15 + $0xd80] sm:$0xff]  ;;  %v3077_v25 = vld [vmem:[#allocation15 + $0x190] sm:$0xff]  ;;  %v3078_v21 = vld [vmem:[#allocation15 + $0x198] sm:$0xff]  ;;  %v6663_v39 = vpack.c.bf16 %v3060_v36, %v3059_v35 }
 0x75f   :  { %6932 = vmatpush3.bf16.msra.mxu0 %v6931_v63  ;;  %v4182_v63 = vld [vmem:[#allocation15 + $0xb70] sm:$0xff]  ;;  %v4390_v53 = vld [vmem:[#allocation15 + $0xd00] sm:$0xff]  ;;  %v6665_v44 = vpack.c.bf16 %v3078_v21, %v3077_v25  ;;  %v3062_v45 = vld [vmem:[#allocation15 + $0x118] sm:$0xff] }
 0x760   :  { %6648 = vmatpush3.bf16.msra.mxu1 %v6647_v28  ;;  %6934 = vmatprep.subr.bf16.mxu0 %v6933_v34  ;;  %v4183_v28 = vld [vmem:[#allocation15 + $0xb78] sm:$0xff]  ;;  %v6661_v34 = vpack.c.bf16 %v3076_v3, %v3075_v48  ;;  %v4408_v6 = vld [vmem:[#allocation15 + $0xd90] sm:$0xff]  ;;  %v3079_v23 = vld [vmem:[#allocation15 + $0x1a0] sm:$0xff] }
 0x761   :  { %6650 = vmatprep.subr.bf16.mxu1 %v6649_v5  ;;  %v4407_v5 = vld [vmem:[#allocation15 + $0xd88] sm:$0xff]  ;;  %v6947_v49 = vpack.c.bf16 %v4183_v28, %v4182_v63  ;;  %v4410_v52 = vld [vmem:[#allocation15 + $0xda0] sm:$0xff]  ;;  %v3081_v42 = vld [vmem:[#allocation15 + $0x1b0] sm:$0xff] }
 0x762   :  { %v3080_v46 = vld [vmem:[#allocation15 + $0x1a8] sm:$0xff]  ;;  %v3082_v1 = vld [vmem:[#allocation15 + $0x1b8] sm:$0xff]  ;;  %v4394_v48 = vld [vmem:[#allocation15 + $0xd20] sm:$0xff] }
 0x763   :  { %6936 = vmatpush3.bf16.msra.mxu0 %v6935_v40  ;;  %v4391_v40 = vld [vmem:[#allocation15 + $0xd08] sm:$0xff]  ;;  %v6669_v9 = vpack.c.bf16 %v3080_v46, %v3079_v23  ;;  %v4412_v63 = vld [vmem:[#allocation15 + $0xdb0] sm:$0xff]  ;;  %v4413_v28 = vld [vmem:[#allocation15 + $0xdb8] sm:$0xff] }
 0x764   :  { %6652 = vmatpush3.bf16.msra.mxu1 %v6651_v57  ;;  %6938 = vmatprep.subr.bf16.mxu0 %v6937_v26  ;;  %v3061_v57 = vld [vmem:[#allocation15 + $0x110] sm:$0xff]  ;;  %v6981_v26 = vpack.c.bf16 %v4407_v5, %v4406_v37  ;;  %v6983_v59 = vpack.c.bf16 %v4391_v40, %v4390_v53  ;;  %v3064_v20 = vld [vmem:[#allocation15 + $0x128] sm:$0xff]  ;;  %v6993_v36 = vpack.c.bf16 %v4413_v28, %v4412_v63  ;;  %v4397_v5 = vld [vmem:[#allocation15 + $0xd38] sm:$0xff] }
 0x765   :  { %6654 = vmatprep.subr.bf16.mxu1 %v6653_v7  ;;  %v4409_v7 = vld [vmem:[#allocation15 + $0xd98] sm:$0xff]  ;;  %v6667_v50 = vpack.c.bf16 %v3062_v45, %v3061_v57  ;;  %v4395_v3 = vld [vmem:[#allocation15 + $0xd28] sm:$0xff]  ;;  %v4396_v37 = vld [vmem:[#allocation15 + $0xd30] sm:$0xff] }
 0x766   :  { %v6985_v62 = vpack.c.bf16 %v4409_v7, %v4408_v6  ;;  %v6991_v35 = vpack.c.bf16 %v4395_v3, %v4394_v48  ;;  %v3067_v25 = vld [vmem:[#allocation15 + $0x140] sm:$0xff]  ;;  %v4415_v53 = vld [vmem:[#allocation15 + $0xdc8] sm:$0xff]  ;;  %v3085_v40 = vld [vmem:[#allocation15 + $0x1d0] sm:$0xff] }
 0x767   :  { %6940 = vmatpush3.bf16.msra.mxu0 %v6939_v16  ;;  %v4392_v16 = vld [vmem:[#allocation15 + $0xd10] sm:$0xff]  ;;  %v3086_v57 = vld [vmem:[#allocation15 + $0x1d8] sm:$0xff]  ;;  %v4398_v6 = vld [vmem:[#allocation15 + $0xd40] sm:$0xff] }
 0x768   :  { %6656 = vmatpush3.bf16.msra.mxu1 %v6655_v2  ;;  %6942 = vmatprep.subr.bf16.mxu0 %v6941_v29  ;;  %v4393_v2 = vld [vmem:[#allocation15 + $0xd18] sm:$0xff]  ;;  %v3063_v29 = vld [vmem:[#allocation15 + $0x120] sm:$0xff]  ;;  %v4399_v7 = vld [vmem:[#allocation15 + $0xd48] sm:$0xff]  ;;  %v6681_v46 = vpack.c.bf16 %v3086_v57, %v3085_v40 }
 0x769   :  { %6658 = vmatprep.subr.bf16.mxu1 %v6657_v38  ;;  %v4411_v38 = vld [vmem:[#allocation15 + $0xda8] sm:$0xff]  ;;  %v3069_v23 = vld [vmem:[#allocation15 + $0x150] sm:$0xff]  ;;  %v3090_v3 = vld [vmem:[#allocation15 + $0x1f8] sm:$0xff] }
 0x76a   :  { %v6989_v8 = vpack.c.bf16 %v4411_v38, %v4410_v52  ;;  %v4400_v52 = vld [vmem:[#allocation15 + $0xd50] sm:$0xff]  ;;  %v4401_v38 = vld [vmem:[#allocation15 + $0xd58] sm:$0xff]  ;;  %v4402_v63 = vld [vmem:[#allocation15 + $0xd60] sm:$0xff] }
 0x76b   :  { %6944 = vmatpush3.bf16.msra.mxu0 %v6943_v11  ;;  %v3065_v11 = vld [vmem:[#allocation15 + $0x130] sm:$0xff]  ;;  %v4403_v28 = vld [vmem:[#allocation15 + $0xd68] sm:$0xff]  ;;  %v3470_v57 = vld [vmem:[#allocation15 + $0x400] sm:$0xff] }
 0x76c   :  { %6660 = vmatpush3.bf16.msra.mxu1 %v6659_v17  ;;  %6946 = vmatprep.subr.bf16.mxu0 %v6945_v55  ;;  %v6673_v17 = vpack.c.bf16 %v3082_v1, %v3081_v42  ;;  %v3066_v55 = vld [vmem:[#allocation15 + $0x138] sm:$0xff]  ;;  %v3071_v42 = vld [vmem:[#allocation15 + $0x160] sm:$0xff]  ;;  %v3089_v48 = vld [vmem:[#allocation15 + $0x1f0] sm:$0xff] }
 0x76d   :  { %6662 = vmatprep.subr.bf16.mxu1 %v6661_v34  ;;  %v3083_v34 = vld [vmem:[#allocation15 + $0x1c0] sm:$0xff] }
 0x76f   :  { %6948 = vmatpush3.bf16.msra.mxu0 %v6947_v49  ;;  %3394 = vmatmul.mubr.f32.vlgmr.msra.gmra.mrb[12].mxu1 %v8029_v43  ;;  %v6987_v43 = vpack.c.bf16 %v4393_v2, %v4392_v16  ;;  %v3068_v49 = vld [vmem:[#allocation15 + $0x148] sm:$0xff]  ;;  %v3087_v16 = vld [vmem:[#allocation15 + $0x1e0] sm:$0xff] }
 0x770   :  { %6664 = vmatpush3.bf16.msra.mxu1 %v6663_v39  ;;  %3463 = vmatprep.mubr.f32.mxu1 %v8161_v10  ;;  %v6671_v10 = vpack.c.bf16 %v3064_v20, %v3063_v29  ;;  %v4414_v39 = vld [vmem:[#allocation15 + $0xdc0] sm:$0xff]  ;;  %v3088_v2 = vld [vmem:[#allocation15 + $0x1e8] sm:$0xff]  ;;  %v6999_v29 = vpack.c.bf16 %v4399_v7, %v4398_v6  ;;  %v3488_v6 = vld [vmem:[#allocation15 + $0x490] sm:$0xff] }
 0x771   :  { %6982 = vmatprep.subr.bf16.mxu0 %v6981_v26  ;;  %6666 = vmatprep.subr.bf16.mxu1 %v6665_v44  ;;  %v6995_v26 = vpack.c.bf16 %v4397_v5, %v4396_v37  ;;  %v6679_v44 = vpack.c.bf16 %v3068_v49, %v3067_v25  ;;  %v6997_v45 = vpack.c.bf16 %v4415_v53, %v4414_v39  ;;  %v3486_v37 = vld [vmem:[#allocation15 + $0x480] sm:$0xff]  ;;  %v3487_v5 = vld [vmem:[#allocation15 + $0x488] sm:$0xff]  ;;  %v4404_v39 = vld [vmem:[#allocation15 + $0xd70] sm:$0xff] }
 0x772   :  { %4351 = vmatmul.mubr.f32.vlgmr.msra.gmra.mrb[14].mxu0 %v8150_v41  ;;  %v3084_v41 = vld [vmem:[#allocation15 + $0x1c8] sm:$0xff]  ;;  %v6685_v1 = vpack.c.bf16 %v3088_v2, %v3087_v16  ;;  %v7007_v25 = vpack.c.bf16 %v4403_v28, %v4402_v63  ;;  %v4405_v53 = vld [vmem:[#allocation15 + $0xd78] sm:$0xff]  ;;  %v6693_v40 = vpack.c.bf16 %v3487_v5, %v3486_v37  ;;  %v3492_v63 = vld [vmem:[#allocation15 + $0x4b0] sm:$0xff] }
 0x773   :  { %6984 = vmatpush3.bf16.msra.mxu0 %v6983_v59  ;;  %4572 = vmatprep.mubr.f32.mxu0 %v8166_v13  ;;  %v6675_v13 = vpack.c.bf16 %v3066_v55, %v3065_v11  ;;  %v6677_v21 = vpack.c.bf16 %v3084_v41, %v3083_v34  ;;  %v3070_v59 = vld [vmem:[#allocation15 + $0x158] sm:$0xff]  ;;  %v7003_v11 = vpack.c.bf16 %v4401_v38, %v4400_v52  ;;  %v3073_v34 = vld [vmem:[#allocation15 + $0x170] sm:$0xff]  ;;  %v3490_v52 = vld [vmem:[#allocation15 + $0x4a0] sm:$0xff] }
 0x774   :  { %6668 = vmatpush3.bf16.msra.mxu1 %v6667_v50  ;;  %6986 = vmatprep.subr.bf16.mxu0 %v6985_v62  ;;  %v4416_v50 = vld [vmem:[#allocation15 + $0xdd0] sm:$0xff]  ;;  %v4417_v62 = vld [vmem:[#allocation15 + $0xdd8] sm:$0xff]  ;;  %v6689_v41 = vpack.c.bf16 %v3090_v3, %v3089_v48  ;;  %v3491_v38 = vld [vmem:[#allocation15 + $0x4a8] sm:$0xff] }
 0x775   :  { %6670 = vmatprep.subr.bf16.mxu1 %v6669_v9  ;;  %v6683_v9 = vpack.c.bf16 %v3070_v59, %v3069_v23  ;;  %v7001_v20 = vpack.c.bf16 %v4417_v62, %v4416_v50  ;;  %v3489_v7 = vld [vmem:[#allocation15 + $0x498] sm:$0xff]  ;;  %v7011_v23 = vpack.c.bf16 %v4405_v53, %v4404_v39  ;;  %v4612_v59 = vld [vmem:[#allocation15 + $0xf00] sm:$0xff]  ;;  %v4613_v50 = vld [vmem:[#allocation15 + $0xf08] sm:$0xff]  ;;  %v6701_v3 = vpack.c.bf16 %v3491_v38, %v3490_v52 }
 0x776   :  { %v3472_v62 = vld [vmem:[#allocation15 + $0x410] sm:$0xff]  ;;  %v6697_v2 = vpack.c.bf16 %v3489_v7, %v3488_v6  ;;  %v3474_v48 = vld [vmem:[#allocation15 + $0x420] sm:$0xff]  ;;  %v3493_v28 = vld [vmem:[#allocation15 + $0x4b8] sm:$0xff] }
 0x777   :  { %6988 = vmatpush3.bf16.msra.mxu0 %v6987_v43  ;;  %v3072_v43 = vld [vmem:[#allocation15 + $0x168] sm:$0xff]  ;;  %v3477_v37 = vld [vmem:[#allocation15 + $0x438] sm:$0xff]  ;;  %v4634_v5 = vld [vmem:[#allocation15 + $0xfb0] sm:$0xff] }
 0x778   :  { %6672 = vmatpush3.bf16.msra.mxu1 %v6671_v10  ;;  %6990 = vmatprep.subr.bf16.mxu0 %v6989_v8  ;;  %v4418_v10 = vld [vmem:[#allocation15 + $0xde0] sm:$0xff]  ;;  %v4419_v8 = vld [vmem:[#allocation15 + $0xde8] sm:$0xff]  ;;  %v4618_v53 = vld [vmem:[#allocation15 + $0xf30] sm:$0xff] }
 0x779   :  { %6674 = vmatprep.subr.bf16.mxu1 %v6673_v17  ;;  %v6687_v17 = vpack.c.bf16 %v3072_v43, %v3071_v42  ;;  %v7005_v55 = vpack.c.bf16 %v4419_v8, %v4418_v10  ;;  %v7047_v42 = vpack.c.bf16 %v4613_v50, %v4612_v59  ;;  %v4614_v10 = vld [vmem:[#allocation15 + $0xf10] sm:$0xff]  ;;  %v4615_v8 = vld [vmem:[#allocation15 + $0xf18] sm:$0xff]  ;;  %v4637_v6 = vld [vmem:[#allocation15 + $0xfc8] sm:$0xff] }
 0x77a   :  { %v3496_v7 = vld [vmem:[#allocation15 + $0x4d0] sm:$0xff]  ;;  %v4639_v52 = vld [vmem:[#allocation15 + $0xfd8] sm:$0xff]  ;;  %v3498_v38 = vld [vmem:[#allocation15 + $0x4e0] sm:$0xff] }
 0x77b   :  { %6992 = vmatpush3.bf16.msra.mxu0 %v6991_v35  ;;  %v3074_v35 = vld [vmem:[#allocation15 + $0x178] sm:$0xff] }
 0x77c   :  { %6676 = vmatpush3.bf16.msra.mxu1 %v6675_v13  ;;  %6994 = vmatprep.subr.bf16.mxu0 %v6993_v36  ;;  %v4420_v13 = vld [vmem:[#allocation15 + $0xdf0] sm:$0xff]  ;;  %v4421_v36 = vld [vmem:[#allocation15 + $0xdf8] sm:$0xff] }
 0x77d   :  { %6678 = vmatprep.subr.bf16.mxu1 %v6677_v21  ;;  %v6691_v21 = vpack.c.bf16 %v3074_v35, %v3073_v34  ;;  %v7009_v49 = vpack.c.bf16 %v4421_v36, %v4420_v13  ;;  %v4617_v35 = vld [vmem:[#allocation15 + $0xf28] sm:$0xff]  ;;  %v3476_v13 = vld [vmem:[#allocation15 + $0x430] sm:$0xff]  ;;  %v6705_v36 = vpack.c.bf16 %v3493_v28, %v3492_v63 }
 0x77e   :  { %v4641_v63 = vld [vmem:[#allocation15 + $0xfe8] sm:$0xff]  ;;  %v3500_v28 = vld [vmem:[#allocation15 + $0x4f0] sm:$0xff] }
 0x77f   :  { %6996 = vmatpush3.bf16.msra.mxu0 %v6995_v26  ;;  %v3471_v26 = vld [vmem:[#allocation15 + $0x408] sm:$0xff] }
 0x780   :  { %6680 = vmatpush3.bf16.msra.mxu1 %v6679_v44  ;;  %6998 = vmatprep.subr.bf16.mxu0 %v6997_v45  ;;  %v4628_v44 = vld [vmem:[#allocation15 + $0xf80] sm:$0xff]  ;;  %v4629_v45 = vld [vmem:[#allocation15 + $0xf88] sm:$0xff] }
 0x781   :  { %6682 = vmatprep.subr.bf16.mxu1 %v6681_v46  ;;  %v6695_v46 = vpack.c.bf16 %v3471_v26, %v3470_v57  ;;  %v7045_v16 = vpack.c.bf16 %v4629_v45, %v4628_v44  ;;  %v3478_v57 = vld [vmem:[#allocation15 + $0x440] sm:$0xff]  ;;  %v3479_v44 = vld [vmem:[#allocation15 + $0x448] sm:$0xff] }
 0x782   :  { %v4636_v45 = vld [vmem:[#allocation15 + $0xfc0] sm:$0xff]  ;;  %v6711_v59 = vpack.c.bf16 %v3479_v44, %v3478_v57  ;;  %v4627_v57 = vld [vmem:[#allocation15 + $0xf78] sm:$0xff] }
 0x783   :  { %7000 = vmatpush3.bf16.msra.mxu0 %v6999_v29  ;;  %v3473_v29 = vld [vmem:[#allocation15 + $0x418] sm:$0xff]  ;;  %v7061_v50 = vpack.c.bf16 %v4637_v6, %v4636_v45  ;;  %v3502_v44 = vld [vmem:[#allocation15 + $0x500] sm:$0xff]  ;;  %v3503_v45 = vld [vmem:[#allocation15 + $0x508] sm:$0xff] }
 0x784   :  { %6684 = vmatpush3.bf16.msra.mxu1 %v6683_v9  ;;  %7002 = vmatprep.subr.bf16.mxu0 %v7001_v20  ;;  %v4630_v9 = vld [vmem:[#allocation15 + $0xf90] sm:$0xff]  ;;  %v4631_v20 = vld [vmem:[#allocation15 + $0xf98] sm:$0xff] }
 0x785   :  { %6686 = vmatprep.subr.bf16.mxu1 %v6685_v1  ;;  %v6699_v1 = vpack.c.bf16 %v3473_v29, %v3472_v62  ;;  %v7049_v43 = vpack.c.bf16 %v4631_v20, %v4630_v9  ;;  %v4620_v62 = vld [vmem:[#allocation15 + $0xf40] sm:$0xff]  ;;  %v3481_v9 = vld [vmem:[#allocation15 + $0x458] sm:$0xff]  ;;  %v4638_v20 = vld [vmem:[#allocation15 + $0xfd0] sm:$0xff] }
 0x786   :  { %v3520_v6 = vld [vmem:[#allocation15 + $0x590] sm:$0xff] }
 0x787   :  { %7004 = vmatpush3.bf16.msra.mxu0 %v7003_v11  ;;  %v3475_v11 = vld [vmem:[#allocation15 + $0x428] sm:$0xff] }
 0x788   :  { %6688 = vmatpush3.bf16.msra.mxu1 %v6687_v17  ;;  %7006 = vmatprep.subr.bf16.mxu0 %v7005_v55  ;;  %v4632_v17 = vld [vmem:[#allocation15 + $0xfa0] sm:$0xff]  ;;  %v4633_v55 = vld [vmem:[#allocation15 + $0xfa8] sm:$0xff] }
 0x789   :  { %6690 = vmatprep.subr.bf16.mxu1 %v6689_v41  ;;  %v7053_v34 = vpack.c.bf16 %v4633_v55, %v4632_v17  ;;  %v4616_v41 = vld [vmem:[#allocation15 + $0xf20] sm:$0xff]  ;;  %v3483_v17 = vld [vmem:[#allocation15 + $0x468] sm:$0xff] }
 0x78a   :  { %v4640_v55 = vld [vmem:[#allocation15 + $0xfe0] sm:$0xff] }
 0x78b   :  { %7008 = vmatpush3.bf16.msra.mxu0 %v7007_v25  ;;  %v4635_v25 = vld [vmem:[#allocation15 + $0xfb8] sm:$0xff] }
 0x78c   :  { %6692 = vmatpush3.bf16.msra.mxu1 %v6691_v21  ;;  %7010 = vmatprep.subr.bf16.mxu0 %v7009_v49  ;;  %v3494_v21 = vld [vmem:[#allocation15 + $0x4c0] sm:$0xff]  ;;  %v7055_v49 = vpack.c.bf16 %v4617_v35, %v4616_v41  ;;  %v7057_v39 = vpack.c.bf16 %v4635_v25, %v4634_v5  ;;  %v7069_v41 = vpack.c.bf16 %v4641_v63, %v4640_v55  ;;  %v3485_v5 = vld [vmem:[#allocation15 + $0x478] sm:$0xff]  ;;  %v4642_v25 = vld [vmem:[#allocation15 + $0xff0] sm:$0xff] }
 0x78d   :  { %6694 = vmatprep.subr.bf16.mxu1 %v6693_v40  ;;  %v4619_v40 = vld [vmem:[#allocation15 + $0xf38] sm:$0xff]  ;;  %v4624_v35 = vld [vmem:[#allocation15 + $0xf60] sm:$0xff]  ;;  %v3528_v55 = vld [vmem:[#allocation15 + $0x5d0] sm:$0xff] }
 0x78e   :  { %v3529_v63 = vld [vmem:[#allocation15 + $0x5d8] sm:$0xff] }
 0x78f   :  { %7012 = vmatpush3.bf16.msra.mxu0 %v7011_v23  ;;  %3464 = vmatmul.mubr.f32.vlgmr.msra.gmra.mrb[14].mxu1 %v8155_v4  ;;  %v7051_v4 = vpack.c.bf16 %v4615_v8, %v4614_v10  ;;  %v3497_v23 = vld [vmem:[#allocation15 + $0x4d8] sm:$0xff]  ;;  %v7065_v10 = vpack.c.bf16 %v4639_v52, %v4638_v20  ;;  %v4622_v8 = vld [vmem:[#allocation15 + $0xf50] sm:$0xff]  ;;  %v3506_v20 = vld [vmem:[#allocation15 + $0x520] sm:$0xff] }
 0x790   :  { %6696 = vmatpush3.bf16.msra.mxu1 %v6695_v46  ;;  %3614 = vmatprep.mubr.f32.mxu1 %v8044_v51  ;;  %v6703_v51 = vpack.c.bf16 %v3475_v11, %v3474_v48  ;;  %v7059_v46 = vpack.c.bf16 %v4619_v40, %v4618_v53  ;;  %v6713_v29 = vpack.c.bf16 %v3497_v23, %v3496_v7  ;;  %v4623_v48 = vld [vmem:[#allocation15 + $0xf58] sm:$0xff]  ;;  %v4626_v40 = vld [vmem:[#allocation15 + $0xf70] sm:$0xff]  ;;  %v3507_v52 = vld [vmem:[#allocation15 + $0x528] sm:$0xff] }
 0x791   :  { %7046 = vmatprep.subr.bf16.mxu0 %v7045_v16  ;;  %6698 = vmatprep.subr.bf16.mxu1 %v6697_v2  ;;  %v4621_v16 = vld [vmem:[#allocation15 + $0xf48] sm:$0xff]  ;;  %v3480_v2 = vld [vmem:[#allocation15 + $0x450] sm:$0xff]  ;;  %v3521_v7 = vld [vmem:[#allocation15 + $0x598] sm:$0xff]  ;;  %v7075_v23 = vpack.c.bf16 %v4627_v57, %v4626_v40 }
 0x792   :  { %4573 = vmatmul.mubr.f32.vlgmr.msra.gmra.mrb[16].mxu0 %v8172_v47  ;;  %v3495_v47 = vld [vmem:[#allocation15 + $0x4c8] sm:$0xff] }
 0x793   :  { %7048 = vmatpush3.bf16.msra.mxu0 %v7047_v42  ;;  %4794 = vmatprep.mubr.f32.mxu0 %v8177_v32  ;;  %v6707_v32 = vpack.c.bf16 %v3477_v37, %v3476_v13  ;;  %v6709_v26 = vpack.c.bf16 %v3495_v47, %v3494_v21  ;;  %v3499_v42 = vld [vmem:[#allocation15 + $0x4e8] sm:$0xff]  ;;  %v4643_v21 = vld [vmem:[#allocation15 + $0xff8] sm:$0xff]  ;;  %v3518_v47 = vld [vmem:[#allocation15 + $0x580] sm:$0xff] }
 0x794   :  { %6700 = vmatpush3.bf16.msra.mxu1 %v6699_v1  ;;  %7050 = vmatprep.subr.bf16.mxu0 %v7049_v43  ;;  %v7063_v1 = vpack.c.bf16 %v4621_v16, %v4620_v62  ;;  %v6715_v43 = vpack.c.bf16 %v3481_v9, %v3480_v2  ;;  %v6717_v11 = vpack.c.bf16 %v3499_v42, %v3498_v38  ;;  %v4625_v13 = vld [vmem:[#allocation15 + $0xf68] sm:$0xff]  ;;  %v3505_v62 = vld [vmem:[#allocation15 + $0x518] sm:$0xff]  ;;  %v3522_v16 = vld [vmem:[#allocation15 + $0x5a0] sm:$0xff] }
 0x795   :  { %6702 = vmatprep.subr.bf16.mxu1 %v6701_v3  ;;  %v3482_v3 = vld [vmem:[#allocation15 + $0x460] sm:$0xff]  ;;  %v7073_v53 = vpack.c.bf16 %v4643_v21, %v4642_v25  ;;  %v3523_v2 = vld [vmem:[#allocation15 + $0x5a8] sm:$0xff]  ;;  %v3524_v38 = vld [vmem:[#allocation15 + $0x5b0] sm:$0xff] }
 0x796   :  { %v6733_v9 = vpack.c.bf16 %v3523_v2, %v3522_v16  ;;  %v3525_v42 = vld [vmem:[#allocation15 + $0x5b8] sm:$0xff] }
 0x797   :  { %7052 = vmatpush3.bf16.msra.mxu0 %v7051_v4  ;;  %v3501_v4 = vld [vmem:[#allocation15 + $0x4f8] sm:$0xff] }
 0x798   :  { %6704 = vmatpush3.bf16.msra.mxu1 %v6703_v51  ;;  %7054 = vmatprep.subr.bf16.mxu0 %v7053_v34  ;;  %v7067_v51 = vpack.c.bf16 %v4623_v48, %v4622_v8  ;;  %v6719_v34 = vpack.c.bf16 %v3483_v17, %v3482_v3  ;;  %v6721_v37 = vpack.c.bf16 %v3501_v4, %v3500_v28  ;;  %v3509_v8 = vld [vmem:[#allocation15 + $0x538] sm:$0xff]  ;;  %v3526_v48 = vld [vmem:[#allocation15 + $0x5c0] sm:$0xff]  ;;  %v3511_v17 = vld [vmem:[#allocation15 + $0x548] sm:$0xff] }
 0x799   :  { %6706 = vmatprep.subr.bf16.mxu1 %v6705_v36  ;;  %v3484_v36 = vld [vmem:[#allocation15 + $0x470] sm:$0xff]  ;;  %v6745_v28 = vpack.c.bf16 %v3529_v63, %v3528_v55  ;;  %v3533_v25 = vld [vmem:[#allocation15 + $0x5f8] sm:$0xff] }
 0x79a   :  { %v3512_v4 = vld [vmem:[#allocation15 + $0x550] sm:$0xff]  ;;  %v3719_v55 = vld [vmem:[#allocation15 + $0x6d8] sm:$0xff] }
 0x79b   :  { %7056 = vmatpush3.bf16.msra.mxu0 %v7055_v49  ;;  %v3519_v49 = vld [vmem:[#allocation15 + $0x588] sm:$0xff] }
 0x79c   :  { %6708 = vmatpush3.bf16.msra.mxu1 %v6707_v32  ;;  %7058 = vmatprep.subr.bf16.mxu0 %v7057_v39  ;;  %v7071_v32 = vpack.c.bf16 %v4625_v13, %v4624_v35  ;;  %v6723_v39 = vpack.c.bf16 %v3485_v5, %v3484_v36  ;;  %v3514_v36 = vld [vmem:[#allocation15 + $0x560] sm:$0xff]  ;;  %v3532_v5 = vld [vmem:[#allocation15 + $0x5f0] sm:$0xff] }
 0x79d   :  { %6710 = vmatprep.subr.bf16.mxu1 %v6709_v26  ;;  %v6725_v26 = vpack.c.bf16 %v3519_v49, %v3518_v47  ;;  %v6753_v47 = vpack.c.bf16 %v3533_v25, %v3532_v5  ;;  %v3516_v49 = vld [vmem:[#allocation15 + $0x570] sm:$0xff]  ;;  %v3723_v5 = vld [vmem:[#allocation15 + $0x6f8] sm:$0xff] }
 0x79f   :  { %7060 = vmatpush3.bf16.msra.mxu0 %v7059_v46  ;;  %v6727_v46 = vpack.c.bf16 %v3503_v45, %v3502_v44  ;;  %v3693_v44 = vld [vmem:[#allocation15 + $0x608] sm:$0xff]  ;;  %v3710_v45 = vld [vmem:[#allocation15 + $0x690] sm:$0xff] }
 0x7a0   :  { %6712 = vmatpush3.bf16.msra.mxu1 %v6711_v59  ;;  %7062 = vmatprep.subr.bf16.mxu0 %v7061_v50  ;;  %v6729_v59 = vpack.c.bf16 %v3521_v7, %v3520_v6  ;;  %v3504_v50 = vld [vmem:[#allocation15 + $0x510] sm:$0xff]  ;;  %v3711_v6 = vld [vmem:[#allocation15 + $0x698] sm:$0xff] }
 0x7a1   :  { %6714 = vmatprep.subr.bf16.mxu1 %v6713_v29  ;;  %v6731_v29 = vpack.c.bf16 %v3505_v62, %v3504_v50  ;;  %v3712_v50 = vld [vmem:[#allocation15 + $0x6a0] sm:$0xff]  ;;  %v3713_v62 = vld [vmem:[#allocation15 + $0x6a8] sm:$0xff] }
 0x7a2   :  { %v6765_v2 = vpack.c.bf16 %v3713_v62, %v3712_v50  ;;  %v3745_v50 = vld [vmem:[#allocation15 + $0x7a8] sm:$0xff] }
 0x7a3   :  { %7064 = vmatpush3.bf16.msra.mxu0 %v7063_v1  ;;  %v6735_v1 = vpack.c.bf16 %v3507_v52, %v3506_v20  ;;  %v3714_v52 = vld [vmem:[#allocation15 + $0x6b0] sm:$0xff] }
 0x7a4   :  { %6716 = vmatpush3.bf16.msra.mxu1 %v6715_v43  ;;  %7066 = vmatprep.subr.bf16.mxu0 %v7065_v10  ;;  %v6737_v43 = vpack.c.bf16 %v3525_v42, %v3524_v38  ;;  %v3508_v10 = vld [vmem:[#allocation15 + $0x530] sm:$0xff]  ;;  %v3715_v38 = vld [vmem:[#allocation15 + $0x6b8] sm:$0xff] }
 0x7a5   :  { %6718 = vmatprep.subr.bf16.mxu1 %v6717_v11  ;;  %v6739_v3 = vpack.c.bf16 %v3509_v8, %v3508_v10  ;;  %v3510_v11 = vld [vmem:[#allocation15 + $0x540] sm:$0xff]  ;;  %v6769_v10 = vpack.c.bf16 %v3715_v38, %v3714_v52  ;;  %v3698_v8 = vld [vmem:[#allocation15 + $0x630] sm:$0xff] }
 0x7a7   :  { %7068 = vmatpush3.bf16.msra.mxu0 %v7067_v51  ;;  %v3513_v51 = vld [vmem:[#allocation15 + $0x558] sm:$0xff] }
 0x7a8   :  { %6720 = vmatpush3.bf16.msra.mxu1 %v6719_v34  ;;  %7070 = vmatprep.subr.bf16.mxu0 %v7069_v41  ;;  %v3530_v34 = vld [vmem:[#allocation15 + $0x5e0] sm:$0xff]  ;;  %v3531_v41 = vld [vmem:[#allocation15 + $0x5e8] sm:$0xff]  ;;  %v6747_v35 = vpack.c.bf16 %v3513_v51, %v3512_v4  ;;  %v3703_v4 = vld [vmem:[#allocation15 + $0x658] sm:$0xff] }
 0x7a9   :  { %6722 = vmatprep.subr.bf16.mxu1 %v6721_v37  ;;  %v6749_v13 = vpack.c.bf16 %v3531_v41, %v3530_v34  ;;  %v3515_v37 = vld [vmem:[#allocation15 + $0x568] sm:$0xff]  ;;  %v3720_v51 = vld [vmem:[#allocation15 + $0x6e0] sm:$0xff] }
 0x7aa   :  { %v6751_v21 = vpack.c.bf16 %v3515_v37, %v3514_v36  ;;  %v3721_v34 = vld [vmem:[#allocation15 + $0x6e8] sm:$0xff]  ;;  %v3722_v37 = vld [vmem:[#allocation15 + $0x6f0] sm:$0xff] }
 0x7ab   :  { %7072 = vmatpush3.bf16.msra.mxu0 %v7071_v32  ;;  %v3517_v32 = vld [vmem:[#allocation15 + $0x578] sm:$0xff]  ;;  %v3705_v36 = vld [vmem:[#allocation15 + $0x668] sm:$0xff] }
 0x7ac   :  { %6724 = vmatpush3.bf16.msra.mxu1 %v6723_v39  ;;  %7074 = vmatprep.subr.bf16.mxu0 %v7073_v53  ;;  %v3708_v39 = vld [vmem:[#allocation15 + $0x680] sm:$0xff]  ;;  %v3709_v53 = vld [vmem:[#allocation15 + $0x688] sm:$0xff]  ;;  %v6755_v40 = vpack.c.bf16 %v3517_v32, %v3516_v49  ;;  %v3707_v49 = vld [vmem:[#allocation15 + $0x678] sm:$0xff] }
 0x7ad   :  { %6726 = vmatprep.subr.bf16.mxu1 %v6725_v26  ;;  %v6757_v57 = vpack.c.bf16 %v3709_v53, %v3708_v39  ;;  %v3692_v26 = vld [vmem:[#allocation15 + $0x600] sm:$0xff]  ;;  %v3741_v39 = vld [vmem:[#allocation15 + $0x788] sm:$0xff] }
 0x7ae   :  { %v6759_v7 = vpack.c.bf16 %v3693_v44, %v3692_v26  ;;  %v3740_v32 = vld [vmem:[#allocation15 + $0x780] sm:$0xff]  ;;  %v3725_v26 = vld [vmem:[#allocation15 + $0x708] sm:$0xff]  ;;  %v3742_v44 = vld [vmem:[#allocation15 + $0x790] sm:$0xff] }
 0x7af   :  { %7076 = vmatpush3.bf16.msra.mxu0 %v7075_v23  ;;  %3615 = vmatmul.mubr.f32.vlgmr.msra.gmra.mrb[16].mxu1 %v8033_v22  ;;  %v3527_v22 = vld [vmem:[#allocation15 + $0x5c8] sm:$0xff]  ;;  %v6761_v23 = vpack.c.bf16 %v3711_v6, %v3710_v45  ;;  %v3743_v45 = vld [vmem:[#allocation15 + $0x798] sm:$0xff] }
 0x7b0   :  { %6728 = vmatpush3.bf16.msra.mxu1 %v6727_v46  ;;  %3684 = vmatprep.mubr.f32.mxu1 %v8180_v30  ;;  %v6741_v30 = vpack.c.bf16 %v3527_v22, %v3526_v48  ;;  %v3694_v46 = vld [vmem:[#allocation15 + $0x610] sm:$0xff]  ;;  %v3716_v48 = vld [vmem:[#allocation15 + $0x6c0] sm:$0xff]  ;;  %v3717_v22 = vld [vmem:[#allocation15 + $0x6c8] sm:$0xff] }
 0x7b1   :  { %6730 = vmatprep.subr.bf16.mxu1 %v6729_v59  ;;  %v3695_v59 = vld [vmem:[#allocation15 + $0x618] sm:$0xff] }
 0x7b2   :  { %4795 = vmatmul.mubr.f32.vlgmr.msra.gmra.mrb[18].mxu0 %v8183_v24  ;;  %v6743_v24 = vpack.c.bf16 %v3511_v17, %v3510_v11  ;;  %v6763_v16 = vpack.c.bf16 %v3695_v59, %v3694_v46  ;;  %v3701_v11 = vld [vmem:[#allocation15 + $0x648] sm:$0xff]  ;;  %v3718_v17 = vld [vmem:[#allocation15 + $0x6d0] sm:$0xff]  ;;  %v3727_v46 = vld [vmem:[#allocation15 + $0x718] sm:$0xff] }
 0x7b3   :  { %v3744_v59 = vld [vmem:[#allocation15 + $0x7a0] sm:$0xff]  ;;  %5799 = vmatprep.mubr.msk.f32.mxu0 %vm7542_vm13, %v7539_v0 }
 0x7b4   :  { %6732 = vmatpush3.bf16.msra.mxu1 %v6731_v29  ;;  %v3696_v29 = vld [vmem:[#allocation15 + $0x620] sm:$0xff] }
 0x7b5   :  { %6734 = vmatprep.subr.bf16.mxu1 %v6733_v9  ;;  %v3697_v9 = vld [vmem:[#allocation15 + $0x628] sm:$0xff] }
 0x7b8   :  { %6736 = vmatpush3.bf16.msra.mxu1 %v6735_v1 }
 0x7b9   :  { %6738 = vmatprep.subr.bf16.mxu1 %v6737_v43  ;;  %v6767_v43 = vpack.c.bf16 %v3697_v9, %v3696_v29  ;;  %v3729_v29 = vld [vmem:[#allocation15 + $0x728] sm:$0xff]  ;;  %v3746_v9 = vld [vmem:[#allocation15 + $0x7b0] sm:$0xff] }
 0x7bc   :  { %6740 = vmatpush3.bf16.msra.mxu1 %v6739_v3  ;;  %v6773_v3 = vpack.c.bf16 %v3717_v22, %v3716_v48  ;;  %v3733_v48 = vld [vmem:[#allocation15 + $0x748] sm:$0xff]  ;;  %v3750_v22 = vld [vmem:[#allocation15 + $0x7d0] sm:$0xff] }
 0x7bd   :  { %6742 = vmatprep.subr.bf16.mxu1 %v6741_v30  ;;  %v3700_v30 = vld [vmem:[#allocation15 + $0x640] sm:$0xff] }
 0x7be   :  { %v6775_v63 = vpack.c.bf16 %v3701_v11, %v3700_v30  ;;  %v3734_v11 = vld [vmem:[#allocation15 + $0x750] sm:$0xff] }
 0x7c0   :  { %6744 = vmatpush3.bf16.msra.mxu1 %v6743_v24  ;;  %v6777_v24 = vpack.c.bf16 %v3719_v55, %v3718_v17  ;;  %v3735_v17 = vld [vmem:[#allocation15 + $0x758] sm:$0xff]  ;;  %v3752_v55 = vld [vmem:[#allocation15 + $0x7e0] sm:$0xff] }
 0x7c1   :  { %6746 = vmatprep.subr.bf16.mxu1 %v6745_v28  ;;  %v3702_v28 = vld [vmem:[#allocation15 + $0x650] sm:$0xff] }
 0x7c2   :  { %v6779_v41 = vpack.c.bf16 %v3703_v4, %v3702_v28  ;;  %v3736_v4 = vld [vmem:[#allocation15 + $0x760] sm:$0xff] }
 0x7c4   :  { %6748 = vmatpush3.bf16.msra.mxu1 %v6747_v35  ;;  %v6781_v35 = vpack.c.bf16 %v3721_v34, %v3720_v51  ;;  %v3737_v51 = vld [vmem:[#allocation15 + $0x768] sm:$0xff]  ;;  %v3754_v34 = vld [vmem:[#allocation15 + $0x7f0] sm:$0xff] }
 0x7c5   :  { %6750 = vmatprep.subr.bf16.mxu1 %v6749_v13  ;;  %v3704_v13 = vld [vmem:[#allocation15 + $0x660] sm:$0xff] }
 0x7c6   :  { %v6783_v25 = vpack.c.bf16 %v3705_v36, %v3704_v13  ;;  %v3738_v36 = vld [vmem:[#allocation15 + $0x770] sm:$0xff] }
 0x7c8   :  { %6752 = vmatpush3.bf16.msra.mxu1 %v6751_v21  ;;  %v6785_v21 = vpack.c.bf16 %v3723_v5, %v3722_v37  ;;  %v3739_v37 = vld [vmem:[#allocation15 + $0x778] sm:$0xff]  ;;  %v3930_v5 = vld [vmem:[#allocation15 + $0x880] sm:$0xff] }
 0x7c9   :  { %6754 = vmatprep.subr.bf16.mxu1 %v6753_v47  ;;  %v3706_v47 = vld [vmem:[#allocation15 + $0x670] sm:$0xff] }
 0x7ca   :  { %v6787_v53 = vpack.c.bf16 %v3707_v49, %v3706_v47  ;;  %v3914_v49 = vld [vmem:[#allocation15 + $0x800] sm:$0xff] }
 0x7cc   :  { %6756 = vmatpush3.bf16.msra.mxu1 %v6755_v40  ;;  %v6789_v40 = vpack.c.bf16 %v3741_v39, %v3740_v32  ;;  %v3915_v32 = vld [vmem:[#allocation15 + $0x808] sm:$0xff]  ;;  %v3932_v39 = vld [vmem:[#allocation15 + $0x890] sm:$0xff] }
 0x7cd   :  { %6758 = vmatprep.subr.bf16.mxu1 %v6757_v57  ;;  %v3724_v57 = vld [vmem:[#allocation15 + $0x700] sm:$0xff] }
 0x7ce   :  { %v6791_v6 = vpack.c.bf16 %v3725_v26, %v3724_v57  ;;  %v3916_v26 = vld [vmem:[#allocation15 + $0x810] sm:$0xff] }
 0x7cf   :  { %3685 = vmatmul.mubr.f32.vlgmr.msra.gmra.mrb[18].mxu1 %v8189_v31  ;;  %v3699_v31 = vld [vmem:[#allocation15 + $0x638] sm:$0xff] }
 0x7d0   :  { %6760 = vmatpush3.bf16.msra.mxu1 %v6759_v7  ;;  %3836 = vmatprep.mubr.f32.mxu1 %v8050_v54  ;;  %v6771_v54 = vpack.c.bf16 %v3699_v31, %v3698_v8  ;;  %v6793_v7 = vpack.c.bf16 %v3743_v45, %v3742_v44  ;;  %v3749_v8 = vld [vmem:[#allocation15 + $0x7c8] sm:$0xff]  ;;  %v3917_v44 = vld [vmem:[#allocation15 + $0x818] sm:$0xff]  ;;  %v3934_v45 = vld [vmem:[#allocation15 + $0x8a0] sm:$0xff] }
 0x7d1   :  { %6762 = vmatprep.subr.bf16.mxu1 %v6761_v23  ;;  %v3726_v23 = vld [vmem:[#allocation15 + $0x710] sm:$0xff] }
 0x7d2   :  { %v5185_v20 = vpop.f32.mrb[8].mxu1  ;;  %v6795_v62 = vpack.c.bf16 %v3727_v46, %v3726_v23  ;;  %v3918_v46 = vld [vmem:[#allocation15 + $0x820] sm:$0xff] }
 0x7d3   :  { %v5186_v42 = vpop.f32.mrb[9].mxu1 }
 0x7d4   :  { %v8220_v1 = vadd.f32 %v5186_v42, %v5185_v20  ;;  %6764 = vmatpush3.bf16.msra.mxu1 %v6763_v16  ;;  %v6797_v16 = vpack.c.bf16 %v3745_v50, %v3744_v59  ;;  %v3747_v20 = vld [vmem:[#allocation15 + $0x7b8] sm:$0xff]  ;;  %v3730_v42 = vld [vmem:[#allocation15 + $0x730] sm:$0xff]  ;;  %v3919_v59 = vld [vmem:[#allocation15 + $0x828] sm:$0xff] }
 0x7d5   :  { %6766 = vmatprep.subr.bf16.mxu1 %v6765_v2  ;;  %v3728_v2 = vld [vmem:[#allocation15 + $0x720] sm:$0xff]  ;;  %v6801_v38 = vpack.c.bf16 %v3747_v20, %v3746_v9  ;;  %v3936_v50 = vld [vmem:[#allocation15 + $0x8b0] sm:$0xff]  ;;  %v3921_v9 = vld [vmem:[#allocation15 + $0x838] sm:$0xff] }
 0x7d6   :  { %v6799_v52 = vpack.c.bf16 %v3729_v29, %v3728_v2  ;;  %v3920_v29 = vld [vmem:[#allocation15 + $0x830] sm:$0xff]  ;;  %v3938_v20 = vld [vmem:[#allocation15 + $0x8c0] sm:$0xff] }
 0x7d8   :  { %6768 = vmatpush3.bf16.msra.mxu1 %v6767_v43  ;;  %v3731_v43 = vld [vmem:[#allocation15 + $0x738] sm:$0xff] }
 0x7d9   :  { %6770 = vmatprep.subr.bf16.mxu1 %v6769_v10  ;;  %v3748_v10 = vld [vmem:[#allocation15 + $0x7c0] sm:$0xff] }
 0x7da   :  { %v6805_v31 = vpack.c.bf16 %v3749_v8, %v3748_v10  ;;  %v3941_v10 = vld [vmem:[#allocation15 + $0x8d8] sm:$0xff] }
 0x7dc   :  { %6772 = vmatpush3.bf16.msra.mxu1 %v6771_v54  ;;  %v3751_v54 = vld [vmem:[#allocation15 + $0x7d8] sm:$0xff] }
 0x7dd   :  { %6774 = vmatprep.subr.bf16.mxu1 %v6773_v3  ;;  %v6809_v30 = vpack.c.bf16 %v3751_v54, %v3750_v22  ;;  %v3943_v22 = vld [vmem:[#allocation15 + $0x8e8] sm:$0xff] }
 0x7e0   :  { %6776 = vmatpush3.bf16.msra.mxu1 %v6775_v63  ;;  %v3753_v63 = vld [vmem:[#allocation15 + $0x7e8] sm:$0xff] }
 0x7e1   :  { %6778 = vmatprep.subr.bf16.mxu1 %v6777_v24  ;;  %v6811_v24 = vpack.c.bf16 %v3735_v17, %v3734_v11  ;;  %v6813_v28 = vpack.c.bf16 %v3753_v63, %v3752_v55  ;;  %v3927_v11 = vld [vmem:[#allocation15 + $0x868] sm:$0xff]  ;;  %v3944_v55 = vld [vmem:[#allocation15 + $0x8f0] sm:$0xff]  ;;  %v3945_v63 = vld [vmem:[#allocation15 + $0x8f8] sm:$0xff] }
 0x7e4   :  { %6780 = vmatpush3.bf16.msra.mxu1 %v6779_v41  ;;  %v3755_v41 = vld [vmem:[#allocation15 + $0x7f8] sm:$0xff] }
 0x7e5   :  { %6782 = vmatprep.subr.bf16.mxu1 %v6781_v35  ;;  %v6815_v35 = vpack.c.bf16 %v3737_v51, %v3736_v4  ;;  %v6817_v13 = vpack.c.bf16 %v3755_v41, %v3754_v34  ;;  %v6849_v34 = vpack.c.bf16 %v3945_v63, %v3944_v55  ;;  %v3928_v41 = vld [vmem:[#allocation15 + $0x870] sm:$0xff] }
 0x7e8   :  { %6784 = vmatpush3.bf16.msra.mxu1 %v6783_v25  ;;  %v3931_v25 = vld [vmem:[#allocation15 + $0x888] sm:$0xff] }
 0x7e9   :  { %6786 = vmatprep.subr.bf16.mxu1 %v6785_v21  ;;  %v6819_v21 = vpack.c.bf16 %v3739_v37, %v3738_v36  ;;  %v6821_v47 = vpack.c.bf16 %v3931_v25, %v3930_v5  ;;  %v4152_v37 = vld [vmem:[#allocation15 + $0xa80] sm:$0xff]  ;;  %v4153_v5 = vld [vmem:[#allocation15 + $0xa88] sm:$0xff] }
 0x7ec   :  { %6788 = vmatpush3.bf16.msra.mxu1 %v6787_v53  ;;  %v3933_v53 = vld [vmem:[#allocation15 + $0x898] sm:$0xff] }
 0x7ed   :  { %6790 = vmatprep.subr.bf16.mxu1 %v6789_v40  ;;  %v6823_v40 = vpack.c.bf16 %v3915_v32, %v3914_v49  ;;  %v6825_v57 = vpack.c.bf16 %v3933_v53, %v3932_v39  ;;  %v4136_v49 = vld [vmem:[#allocation15 + $0xa00] sm:$0xff]  ;;  %v4137_v32 = vld [vmem:[#allocation15 + $0xa08] sm:$0xff]  ;;  %v4154_v39 = vld [vmem:[#allocation15 + $0xa90] sm:$0xff] }
 0x7ee   :  { %v4155_v53 = vld [vmem:[#allocation15 + $0xa98] sm:$0xff] }
 0x7ef   :  { %3837 = vmatmul.mubr.f32.vlgmr.msra.gmra.mrb[20].mxu1 %v8053_v58  ;;  %v6803_v58 = vpack.c.bf16 %v3731_v43, %v3730_v42  ;;  %v3923_v42 = vld [vmem:[#allocation15 + $0x848] sm:$0xff]  ;;  %v3940_v43 = vld [vmem:[#allocation15 + $0x8d0] sm:$0xff] }
 0x7f0   :  { %6792 = vmatpush3.bf16.msra.mxu1 %v6791_v6  ;;  %3906 = vmatprep.mubr.f32.mxu1 %v8202_v19  ;;  %v3732_v19 = vld [vmem:[#allocation15 + $0x740] sm:$0xff]  ;;  %v3935_v6 = vld [vmem:[#allocation15 + $0x8a8] sm:$0xff] }
 0x7f1   :  { %6794 = vmatprep.subr.bf16.mxu1 %v6793_v7  ;;  %v6807_v3 = vpack.c.bf16 %v3733_v48, %v3732_v19  ;;  %v6827_v7 = vpack.c.bf16 %v3917_v44, %v3916_v26  ;;  %v6829_v23 = vpack.c.bf16 %v3935_v6, %v3934_v45  ;;  %v3925_v19 = vld [vmem:[#allocation15 + $0x858] sm:$0xff]  ;;  %v3942_v48 = vld [vmem:[#allocation15 + $0x8e0] sm:$0xff]  ;;  %v4138_v26 = vld [vmem:[#allocation15 + $0xa10] sm:$0xff] }
 0x7f2   :  { %v4156_v44 = vld [vmem:[#allocation15 + $0xaa0] sm:$0xff]  ;;  %v4157_v45 = vld [vmem:[#allocation15 + $0xaa8] sm:$0xff] }
 0x7f4   :  { %6796 = vmatpush3.bf16.msra.mxu1 %v6795_v62  ;;  %v3937_v62 = vld [vmem:[#allocation15 + $0x8b8] sm:$0xff] }
 0x7f5   :  { %6798 = vmatprep.subr.bf16.mxu1 %v6797_v16  ;;  %v6831_v16 = vpack.c.bf16 %v3919_v59, %v3918_v46  ;;  %v6833_v2 = vpack.c.bf16 %v3937_v62, %v3936_v50  ;;  %v4141_v46 = vld [vmem:[#allocation15 + $0xa28] sm:$0xff]  ;;  %v4158_v59 = vld [vmem:[#allocation15 + $0xab0] sm:$0xff]  ;;  %v4159_v50 = vld [vmem:[#allocation15 + $0xab8] sm:$0xff] }
 0x7f8   :  { %6800 = vmatpush3.bf16.msra.mxu1 %v6799_v52  ;;  %v3939_v52 = vld [vmem:[#allocation15 + $0x8c8] sm:$0xff] }
 0x7f9   :  { %6802 = vmatprep.subr.bf16.mxu1 %v6801_v38  ;;  %v6837_v38 = vpack.c.bf16 %v3939_v52, %v3938_v20  ;;  %v4161_v20 = vld [vmem:[#allocation15 + $0xac8] sm:$0xff] }
 0x7fc   :  { %6804 = vmatpush3.bf16.msra.mxu1 %v6803_v58  ;;  %v6841_v58 = vpack.c.bf16 %v3941_v10, %v3940_v43  ;;  %v4146_v10 = vld [vmem:[#allocation15 + $0xa50] sm:$0xff] }
 0x7fd   :  { %6806 = vmatprep.subr.bf16.mxu1 %v6805_v31  ;;  %v3924_v31 = vld [vmem:[#allocation15 + $0x850] sm:$0xff] }
 0x7fe   :  { %v6843_v54 = vpack.c.bf16 %v3925_v19, %v3924_v31  ;;  %v4165_v31 = vld [vmem:[#allocation15 + $0xae8] sm:$0xff] }
 0x800   :  { %6808 = vmatpush3.bf16.msra.mxu1 %v6807_v3  ;;  %v6845_v3 = vpack.c.bf16 %v3943_v22, %v3942_v48  ;;  %v4148_v22 = vld [vmem:[#allocation15 + $0xa60] sm:$0xff] }
 0x801   :  { %6810 = vmatprep.subr.bf16.mxu1 %v6809_v30  ;;  %v3926_v30 = vld [vmem:[#allocation15 + $0x860] sm:$0xff] }
 0x802   :  { %v6847_v4 = vpack.c.bf16 %v3927_v11, %v3926_v30  ;;  %v4166_v30 = vld [vmem:[#allocation15 + $0xaf0] sm:$0xff]  ;;  %v4167_v11 = vld [vmem:[#allocation15 + $0xaf8] sm:$0xff] }
 0x804   :  { %6812 = vmatpush3.bf16.msra.mxu1 %v6811_v24 }
 0x805   :  { %6814 = vmatprep.subr.bf16.mxu1 %v6813_v28 }
 0x808   :  { %6816 = vmatpush3.bf16.msra.mxu1 %v6815_v35  ;;  %v3929_v35 = vld [vmem:[#allocation15 + $0x878] sm:$0xff] }
 0x809   :  { %6818 = vmatprep.subr.bf16.mxu1 %v6817_v13 }
 0x80c   :  { %6820 = vmatpush3.bf16.msra.mxu1 %v6819_v21  ;;  %v6851_v21 = vpack.c.bf16 %v3929_v35, %v3928_v41  ;;  %v4374_v35 = vld [vmem:[#allocation15 + $0xc80] sm:$0xff] }
 0x80d   :  { %6822 = vmatprep.subr.bf16.mxu1 %v6821_v47  ;;  %v6885_v47 = vpack.c.bf16 %v4153_v5, %v4152_v37 }
 0x80f   :  { %3907 = vmatmul.mubr.f32.vlgmr.msra.gmra.mrb[22].mxu1 %v8205_v56  ;;  %v6835_v56 = vpack.c.bf16 %v3921_v9, %v3920_v29  ;;  %v4143_v29 = vld [vmem:[#allocation15 + $0xa38] sm:$0xff]  ;;  %v4160_v9 = vld [vmem:[#allocation15 + $0xac0] sm:$0xff] }
 0x810   :  { %6824 = vmatpush3.bf16.msra.mxu1 %v6823_v40  ;;  %4058 = vmatprep.mubr.f32.mxu1 %v8056_v60  ;;  %v3922_v60 = vld [vmem:[#allocation15 + $0x840] sm:$0xff]  ;;  %v6887_v40 = vpack.c.bf16 %v4137_v32, %v4136_v49  ;;  %v6901_v52 = vpack.c.bf16 %v4161_v20, %v4160_v9  ;;  %v4359_v49 = vld [vmem:[#allocation15 + $0xc08] sm:$0xff]  ;;  %v4376_v32 = vld [vmem:[#allocation15 + $0xc90] sm:$0xff] }
 0x811   :  { %6826 = vmatprep.subr.bf16.mxu1 %v6825_v57  ;;  %v6839_v8 = vpack.c.bf16 %v3923_v42, %v3922_v60  ;;  %v6889_v57 = vpack.c.bf16 %v4155_v53, %v4154_v39  ;;  %v4163_v60 = vld [vmem:[#allocation15 + $0xad8] sm:$0xff]  ;;  %v4367_v20 = vld [vmem:[#allocation15 + $0xc48] sm:$0xff] }
 0x812   :  { %v4377_v39 = vld [vmem:[#allocation15 + $0xc98] sm:$0xff] }
 0x814   :  { %6828 = vmatpush3.bf16.msra.mxu1 %v6827_v7  ;;  %v6893_v7 = vpack.c.bf16 %v4157_v45, %v4156_v44 }
 0x815   :  { %6830 = vmatprep.subr.bf16.mxu1 %v6829_v23  ;;  %v4140_v23 = vld [vmem:[#allocation15 + $0xa20] sm:$0xff] }
 0x816   :  { %v6895_v62 = vpack.c.bf16 %v4141_v46, %v4140_v23  ;;  %v4380_v23 = vld [vmem:[#allocation15 + $0xcb0] sm:$0xff]  ;;  %v4381_v46 = vld [vmem:[#allocation15 + $0xcb8] sm:$0xff] }
 0x818   :  { %6832 = vmatpush3.bf16.msra.mxu1 %v6831_v16  ;;  %v6897_v16 = vpack.c.bf16 %v4159_v50, %v4158_v59  ;;  %v6961_v50 = vpack.c.bf16 %v4381_v46, %v4380_v23  ;;  %v4586_v46 = vld [vmem:[#allocation15 + $0xe30] sm:$0xff] }
 0x819   :  { %6834 = vmatprep.subr.bf16.mxu1 %v6833_v2  ;;  %v4142_v2 = vld [vmem:[#allocation15 + $0xa30] sm:$0xff] }
 0x81c   :  { %6836 = vmatpush3.bf16.msra.mxu1 %v6835_v56  ;;  %v4145_v56 = vld [vmem:[#allocation15 + $0xa48] sm:$0xff] }
 0x81d   :  { %6838 = vmatprep.subr.bf16.mxu1 %v6837_v38  ;;  %v4162_v38 = vld [vmem:[#allocation15 + $0xad0] sm:$0xff] }
 0x81e   :  { %v6905_v43 = vpack.c.bf16 %v4163_v60, %v4162_v38  ;;  %v4368_v38 = vld [vmem:[#allocation15 + $0xc50] sm:$0xff]  ;;  %v4369_v60 = vld [vmem:[#allocation15 + $0xc58] sm:$0xff] }
 0x820   :  { %6840 = vmatpush3.bf16.msra.mxu1 %v6839_v8  ;;  %v4147_v8 = vld [vmem:[#allocation15 + $0xa58] sm:$0xff] }
 0x821   :  { %6842 = vmatprep.subr.bf16.mxu1 %v6841_v58  ;;  %v4164_v58 = vld [vmem:[#allocation15 + $0xae0] sm:$0xff]  ;;  %v6907_v19 = vpack.c.bf16 %v4147_v8, %v4146_v10  ;;  %v6971_v10 = vpack.c.bf16 %v4369_v60, %v4368_v38 }
 0x822   :  { %v5220_v17 = vpop.f32.mrb[10].mxu1  ;;  %v6909_v48 = vpack.c.bf16 %v4165_v31, %v4164_v58  ;;  %v4370_v58 = vld [vmem:[#allocation15 + $0xc60] sm:$0xff]  ;;  %v4371_v31 = vld [vmem:[#allocation15 + $0xc68] sm:$0xff] }
 0x823   :  { %v5221_v24 = vpop.f32.mrb[11].mxu1  ;;  %v4592_v60 = vld [vmem:[#allocation15 + $0xe60] sm:$0xff] }
 0x824   :  { %v5222_v28 = vadd.f32 %v5221_v24, %v5220_v17  ;;  %6844 = vmatpush3.bf16.msra.mxu1 %v6843_v54  ;;  %v4149_v54 = vld [vmem:[#allocation15 + $0xa68] sm:$0xff] }
 0x825   :  { %v5500_v51 = vpop.f32.mrb[12].mxu0  ;;  %6846 = vmatprep.subr.bf16.mxu1 %v6845_v3  ;;  %v6911_v63 = vpack.c.bf16 %v4149_v54, %v4148_v22  ;;  %v4389_v22 = vld [vmem:[#allocation15 + $0xcf8] sm:$0xff] }
 0x826   :  { %v8227_v13 = vadd.f32 %v5222_v28, %v8220_v1  ;;  %v5501_v36 = vpop.f32.mrb[13].mxu0  ;;  %v4139_v1 = vld [vmem:[#allocation15 + $0xa18] sm:$0xff]  ;;  %v6913_v28 = vpack.c.bf16 %v4167_v11, %v4166_v30  ;;  %v6975_v30 = vpack.c.bf16 %v4371_v31, %v4370_v58 }
 0x827   :  { %v8229_v25 = vadd.f32 %v5501_v36, %v5500_v51  ;;  %v6891_v6 = vpack.c.bf16 %v4139_v1, %v4138_v26  ;;  %v4151_v51 = vld [vmem:[#allocation15 + $0xa78] sm:$0xff]  ;;  %v4375_v36 = vld [vmem:[#allocation15 + $0xc88] sm:$0xff]  ;;  %v4378_v26 = vld [vmem:[#allocation15 + $0xca0] sm:$0xff] }
 0x828   :  { %6848 = vmatpush3.bf16.msra.mxu1 %v6847_v4  ;;  %v4150_v4 = vld [vmem:[#allocation15 + $0xa70] sm:$0xff]  ;;  %v4379_v1 = vld [vmem:[#allocation15 + $0xca8] sm:$0xff] }
 0x829   :  { %6850 = vmatprep.subr.bf16.mxu1 %v6849_v34  ;;  %v6915_v5 = vpack.c.bf16 %v4151_v51, %v4150_v4  ;;  %v6957_v45 = vpack.c.bf16 %v4379_v1, %v4378_v26  ;;  %v4596_v4 = vld [vmem:[#allocation15 + $0xe80] sm:$0xff]  ;;  %v4597_v51 = vld [vmem:[#allocation15 + $0xe88] sm:$0xff] }
 0x82a   :  { %v4584_v1 = vld [vmem:[#allocation15 + $0xe20] sm:$0xff] }
 0x82c   :  { %6852 = vmatpush3.bf16.msra.mxu1 %v6851_v21  ;;  %v6949_v21 = vpack.c.bf16 %v4375_v36, %v4374_v35  ;;  %v7013_v36 = vpack.c.bf16 %v4597_v51, %v4596_v4 }
 0x82d   :  { %6886 = vmatprep.subr.bf16.mxu1 %v6885_v47  ;;  %v4358_v47 = vld [vmem:[#allocation15 + $0xc00] sm:$0xff] }
 0x82e   :  { %v6951_v53 = vpack.c.bf16 %v4359_v49, %v4358_v47  ;;  %v4598_v47 = vld [vmem:[#allocation15 + $0xe90] sm:$0xff]  ;;  %v4599_v49 = vld [vmem:[#allocation15 + $0xe98] sm:$0xff] }
 0x82f   :  { %4059 = vmatmul.mubr.f32.vlgmr.msra.gmra.mrb[24].mxu1 %v8059_v61  ;;  %v6899_v61 = vpack.c.bf16 %v4143_v29, %v4142_v2  ;;  %v4382_v2 = vld [vmem:[#allocation15 + $0xcc0] sm:$0xff]  ;;  %v4383_v29 = vld [vmem:[#allocation15 + $0xcc8] sm:$0xff] }
 0x830   :  { %6888 = vmatpush3.bf16.msra.mxu1 %v6887_v40  ;;  %4280 = vmatprep.mubr.f32.mxu1 %v8068_v12  ;;  %v4144_v12 = vld [vmem:[#allocation15 + $0xa40] sm:$0xff]  ;;  %v6953_v40 = vpack.c.bf16 %v4377_v39, %v4376_v32  ;;  %v6965_v9 = vpack.c.bf16 %v4383_v29, %v4382_v2  ;;  %v7017_v39 = vpack.c.bf16 %v4599_v49, %v4598_v47  ;;  %v4589_v2 = vld [vmem:[#allocation15 + $0xe48] sm:$0xff]  ;;  %v4606_v29 = vld [vmem:[#allocation15 + $0xed0] sm:$0xff]  ;;  %v7541_v49 = vmov 0.0|0.0  }
 0x831   :  { %6890 = vmatprep.subr.bf16.mxu1 %v6889_v57  ;;  %v6903_v42 = vpack.c.bf16 %v4145_v56, %v4144_v12  ;;  %v4360_v57 = vld [vmem:[#allocation15 + $0xc10] sm:$0xff]  ;;  %7101 = vmatprep.subr.bf16.mxu0 %v7541_v49 }
 0x832   :  { %v4811_v47 = vld [vmem:[%s8372_s9 + $0x8] sm:$0xff] }
 0x834   :  { %6892 = vmatpush3.bf16.msra.mxu1 %v6891_v6  ;;  %v4362_v6 = vld [vmem:[#allocation15 + $0xc20] sm:$0xff] }
 0x835   :  { %6894 = vmatprep.subr.bf16.mxu1 %v6893_v7  ;;  %v4363_v7 = vld [vmem:[#allocation15 + $0xc28] sm:$0xff] }
 0x836   :  { %v6959_v59 = vpack.c.bf16 %v4363_v7, %v4362_v6  ;;  %v4603_v6 = vld [vmem:[#allocation15 + $0xeb8] sm:$0xff] }
 0x838   :  { %6896 = vmatpush3.bf16.msra.mxu1 %v6895_v62  ;;  %v4364_v62 = vld [vmem:[#allocation15 + $0xc30] sm:$0xff] }
 0x839   :  { %6898 = vmatprep.subr.bf16.mxu1 %v6897_v16  ;;  %v4365_v16 = vld [vmem:[#allocation15 + $0xc38] sm:$0xff] }
 0x83c   :  { %6900 = vmatpush3.bf16.msra.mxu1 %v6899_v61  ;;  %v4384_v61 = vld [vmem:[#allocation15 + $0xcd0] sm:$0xff] }
 0x83d   :  { %6902 = vmatprep.subr.bf16.mxu1 %v6901_v52  ;;  %v4385_v52 = vld [vmem:[#allocation15 + $0xcd8] sm:$0xff] }
 0x83e   :  { %v6969_v56 = vpack.c.bf16 %v4385_v52, %v4384_v61  ;;  %v4591_v61 = vld [vmem:[#allocation15 + $0xe58] sm:$0xff]  ;;  %v4608_v52 = vld [vmem:[#allocation15 + $0xee0] sm:$0xff] }
 0x840   :  { %6904 = vmatpush3.bf16.msra.mxu1 %v6903_v42  ;;  %v4386_v42 = vld [vmem:[#allocation15 + $0xce0] sm:$0xff] }
 0x841   :  { %6906 = vmatprep.subr.bf16.mxu1 %v6905_v43  ;;  %v4387_v43 = vld [vmem:[#allocation15 + $0xce8] sm:$0xff] }
 0x842   :  { %v5255_v3 = vpop.f32.mrb[12].mxu1  ;;  %v6973_v8 = vpack.c.bf16 %v4387_v43, %v4386_v42  ;;  %v4593_v42 = vld [vmem:[#allocation15 + $0xe68] sm:$0xff] }
 0x843   :  { %v5256_v17 = vpop.f32.mrb[13].mxu1 }
 0x844   :  { %v5257_v55 = vadd.f32 %v5256_v17, %v5255_v3  ;;  %6908 = vmatpush3.bf16.msra.mxu1 %v6907_v19 }
 0x845   :  { %v5570_v24 = vpop.f32.mrb[14].mxu0  ;;  %6910 = vmatprep.subr.bf16.mxu1 %v6909_v48  ;;  %v4388_v48 = vld [vmem:[#allocation15 + $0xcf0] sm:$0xff] }
 0x846   :  { %v8234_v34 = vadd.f32 %v5257_v55, %v8227_v13  ;;  %v5571_v41 = vpop.f32.mrb[15].mxu0  ;;  %v4361_v13 = vld [vmem:[#allocation15 + $0xc18] sm:$0xff]  ;;  %v6977_v17 = vpack.c.bf16 %v4389_v22, %v4388_v48  ;;  %v4372_v55 = vld [vmem:[#allocation15 + $0xc70] sm:$0xff] }
 0x847   :  { %v8236_v37 = vadd.f32 %v5571_v41, %v5570_v24  ;;  %v6955_v44 = vpack.c.bf16 %v4361_v13, %v4360_v57  ;;  %v4601_v57 = vld [vmem:[#allocation15 + $0xea8] sm:$0xff] }
 0x848   :  { %6912 = vmatpush3.bf16.msra.mxu1 %v6911_v63  ;;  %v4373_v63 = vld [vmem:[#allocation15 + $0xc78] sm:$0xff] }
 0x849   :  { %6914 = vmatprep.subr.bf16.mxu1 %v6913_v28  ;;  %v6979_v35 = vpack.c.bf16 %v4373_v63, %v4372_v55 }
 0x84c   :  { %6916 = vmatpush3.bf16.msra.mxu1 %v6915_v5  ;;  %v4580_v5 = vld [vmem:[#allocation15 + $0xe00] sm:$0xff] }
 0x84d   :  { %6950 = vmatprep.subr.bf16.mxu1 %v6949_v21  ;;  %v4581_v21 = vld [vmem:[#allocation15 + $0xe08] sm:$0xff] }
 0x84e   :  { %v7015_v32 = vpack.c.bf16 %v4581_v21, %v4580_v5  ;;  %v4810_v21 = vld [vmem:[%s8372_s9] sm:$0xff] }
 0x84f   :  { %4281 = vmatmul.mubr.f32.vlgmr.msra.gmra.mrb[26].mxu1 %v8071_v15  ;;  %v6963_v15 = vpack.c.bf16 %v4365_v16, %v4364_v62  ;;  %v4605_v62 = vld [vmem:[#allocation15 + $0xec8] sm:$0xff] }
 0x850   :  { %6952 = vmatpush3.bf16.msra.mxu1 %v6951_v53  ;;  %4502 = vmatprep.mubr.f32.mxu1 %v8074_v18  ;;  %v4366_v18 = vld [vmem:[#allocation15 + $0xc40] sm:$0xff]  ;;  %v4582_v53 = vld [vmem:[#allocation15 + $0xe10] sm:$0xff] }
 0x851   :  { %6954 = vmatprep.subr.bf16.mxu1 %v6953_v40  ;;  %v6967_v12 = vpack.c.bf16 %v4367_v20, %v4366_v18  ;;  %v4600_v40 = vld [vmem:[#allocation15 + $0xea0] sm:$0xff]  ;;  %v4590_v20 = vld [vmem:[#allocation15 + $0xe50] sm:$0xff] }
 0x852   :  { %v7021_v26 = vpack.c.bf16 %v4601_v57, %v4600_v40  ;;  %v4816_v57 = vld [vmem:[%s8372_s9 + $0x30] sm:$0xff] }
 0x854   :  { %6956 = vmatpush3.bf16.msra.mxu1 %v6955_v44  ;;  %v4585_v44 = vld [vmem:[#allocation15 + $0xe28] sm:$0xff] }
 0x855   :  { %6958 = vmatprep.subr.bf16.mxu1 %v6957_v45  ;;  %v4602_v45 = vld [vmem:[#allocation15 + $0xeb0] sm:$0xff]  ;;  %v7023_v7 = vpack.c.bf16 %v4585_v44, %v4584_v1  ;;  %v4818_v1 = vld [vmem:[%s8372_s9 + $0x40] sm:$0xff] }
 0x856   :  { %v7025_v23 = vpack.c.bf16 %v4603_v6, %v4602_v45  ;;  %v4819_v44 = vld [vmem:[%s8372_s9 + $0x48] sm:$0xff] }
 0x857   :  { %v7090_v45 = vpack.c.bf16 %v4819_v44, %v4818_v1  ;;  %v4997_v44 = vld [vmem:[%s8376_s13 + $0x20] sm:$0xff] }
 0x858   :  { %6960 = vmatpush3.bf16.msra.mxu1 %v6959_v59  ;;  %v4587_v59 = vld [vmem:[#allocation15 + $0xe38] sm:$0xff] }
 0x859   :  { %6962 = vmatprep.subr.bf16.mxu1 %v6961_v50  ;;  %v4604_v50 = vld [vmem:[#allocation15 + $0xec0] sm:$0xff] }
 0x85a   :  { %v7029_v16 = vpack.c.bf16 %v4605_v62, %v4604_v50  ;;  %v4820_v50 = vld [vmem:[%s8372_s9 + $0x50] sm:$0xff]  ;;  %v4821_v62 = vld [vmem:[%s8372_s9 + $0x58] sm:$0xff] }
 0x85c   :  { %6964 = vmatpush3.bf16.msra.mxu1 %v6963_v15  ;;  %v4607_v15 = vld [vmem:[#allocation15 + $0xed8] sm:$0xff] }
 0x85d   :  { %6966 = vmatprep.subr.bf16.mxu1 %v6965_v9  ;;  %v7033_v18 = vpack.c.bf16 %v4607_v15, %v4606_v29  ;;  %v4905_v29 = vld [vmem:[#allocation19 + $0x8] sm:$0xff]  ;;  %v4906_v15 = vld [vmem:[#allocation19 + $0x10] sm:$0xff] }
 0x860   :  { %6968 = vmatpush3.bf16.msra.mxu1 %v6967_v12  ;;  %v4609_v12 = vld [vmem:[#allocation15 + $0xee8] sm:$0xff] }
 0x861   :  { %6970 = vmatprep.subr.bf16.mxu1 %v6969_v56  ;;  %v7035_v56 = vpack.c.bf16 %v4591_v61, %v4590_v20  ;;  %v7037_v38 = vpack.c.bf16 %v4609_v12, %v4608_v52  ;;  %v4907_v20 = vld [vmem:[#allocation19 + $0x18] sm:$0xff] }
 0x862   :  { %v5290_v19 = vpop.f32.mrb[14].mxu1  ;;  %v4824_v61 = vld [vmem:[%s8372_s9 + $0x70] sm:$0xff]  ;;  %v4825_v52 = vld [vmem:[%s8372_s9 + $0x78] sm:$0xff]  ;;  %v7105_v12 = vpack.c.bf16 %v4907_v20, %v4906_v15 }
 0x863   :  { %v5291_v54 = vpop.f32.mrb[15].mxu1 }
 0x864   :  { %v5292_v3 = vadd.f32 %v5291_v54, %v5290_v19  ;;  %6972 = vmatpush3.bf16.msra.mxu1 %v6971_v10  ;;  %v4610_v10 = vld [vmem:[#allocation15 + $0xef0] sm:$0xff]  ;;  %v7039_v19 = vpack.c.bf16 %v4593_v42, %v4592_v60  ;;  %v7099_v60 = vpack.c.bf16 %v4825_v52, %v4824_v61 }
 0x865   :  { %v5640_v11 = vpop.f32.mrb[16].mxu0  ;;  %6974 = vmatprep.subr.bf16.mxu1 %v6973_v8  ;;  %v4611_v8 = vld [vmem:[#allocation15 + $0xef8] sm:$0xff]  ;;  %v4594_v54 = vld [vmem:[#allocation15 + $0xe70] sm:$0xff] }
 0x866   :  { %v8241_v24 = vadd.f32 %v5292_v3, %v8234_v34  ;;  %v5641_v28 = vpop.f32.mrb[17].mxu0  ;;  %v4583_v34 = vld [vmem:[#allocation15 + $0xe18] sm:$0xff]  ;;  %v7041_v22 = vpack.c.bf16 %v4611_v8, %v4610_v10 }
 0x867   :  { %v8243_v41 = vadd.f32 %v5641_v28, %v5640_v11  ;;  %v7019_v13 = vpack.c.bf16 %v4583_v34, %v4582_v53  ;;  %v4595_v3 = vld [vmem:[#allocation15 + $0xe78] sm:$0xff]  ;;  %v4814_v53 = vld [vmem:[%s8372_s9 + $0x20] sm:$0xff]  ;;  %v4815_v34 = vld [vmem:[%s8372_s9 + $0x28] sm:$0xff] }
 0x868   :  { %6976 = vmatpush3.bf16.msra.mxu1 %v6975_v30  ;;  %v7084_v40 = vpack.c.bf16 %v4815_v34, %v4814_v53 }
 0x869   :  { %6978 = vmatprep.subr.bf16.mxu1 %v6977_v17  ;;  %v7043_v17 = vpack.c.bf16 %v4595_v3, %v4594_v54 }
 0x86c   :  { %6980 = vmatpush3.bf16.msra.mxu1 %v6979_v35 }
 0x86d   :  { %7014 = vmatprep.subr.bf16.mxu1 %v7013_v36 }
 0x86f   :  { %4503 = vmatmul.mubr.f32.vlgmr.msra.gmra.mrb[28].mxu1 %v8083_v27  ;;  %v7027_v27 = vpack.c.bf16 %v4587_v59, %v4586_v46 }
 0x870   :  { %7016 = vmatpush3.bf16.msra.mxu1 %v7015_v32  ;;  %4724 = vmatprep.mubr.f32.mxu1 %v8086_v33  ;;  %v4588_v33 = vld [vmem:[#allocation15 + $0xe40] sm:$0xff]  ;;  %v7078_v32 = vpack.c.bf16 %v4811_v47, %v4810_v21 }
 0x871   :  { %7018 = vmatprep.subr.bf16.mxu1 %v7017_v39  ;;  %v7031_v9 = vpack.c.bf16 %v4589_v2, %v4588_v33  ;;  %v4823_v33 = vld [vmem:[%s8372_s9 + $0x68] sm:$0xff]  ;;  %v4904_v2 = vld [vmem:[#allocation19] sm:$0xff] }
 0x874   :  { %7020 = vmatpush3.bf16.msra.mxu1 %v7019_v13  ;;  %v4817_v13 = vld [vmem:[%s8372_s9 + $0x38] sm:$0xff] }
 0x875   :  { %7022 = vmatprep.subr.bf16.mxu1 %v7021_v26  ;;  %v7087_v26 = vpack.c.bf16 %v4817_v13, %v4816_v57  ;;  %v4995_v13 = vld [vmem:[%s8376_s13 + $0x10] sm:$0xff] }
 0x878   :  { %7024 = vmatpush3.bf16.msra.mxu1 %v7023_v7 }
 0x879   :  { %7026 = vmatprep.subr.bf16.mxu1 %v7025_v23 }
 0x87c   :  { %7028 = vmatpush3.bf16.msra.mxu1 %v7027_v27  ;;  %v4822_v27 = vld [vmem:[%s8372_s9 + $0x60] sm:$0xff] }
 0x87d   :  { %7030 = vmatprep.subr.bf16.mxu1 %v7029_v16  ;;  %v7093_v16 = vpack.c.bf16 %v4821_v62, %v4820_v50 }
 0x880   :  { %7032 = vmatpush3.bf16.msra.mxu1 %v7031_v9  ;;  %v7096_v9 = vpack.c.bf16 %v4823_v33, %v4822_v27 }
 0x881   :  { %7034 = vmatprep.subr.bf16.mxu1 %v7033_v18  ;;  %v7102_v18 = vpack.c.bf16 %v4905_v29, %v4904_v2 }
 0x882   :  { %v5325_v43 = vpop.f32.mrb[16].mxu1 }
 0x883   :  { %v5326_v58 = vpop.f32.mrb[17].mxu1  ;;  %7103 = vmatpush3.bf16.msra.mxu0 %v7102_v18 }
 0x884   :  { %v5327_v31 = vadd.f32 %v5326_v58, %v5325_v43  ;;  %7036 = vmatpush3.bf16.msra.mxu1 %v7035_v56  ;;  %7104 = vmatprep.subr.bf16.mxu0 %v7541_v49  ;;  %v4908_v56 = vld [vmem:[#allocation19 + $0x20] sm:$0xff] }
 0x885   :  { %v5710_v48 = vpop.f32.mrb[18].mxu0  ;;  %7038 = vmatprep.subr.bf16.mxu1 %v7037_v38  ;;  %v4909_v38 = vld [vmem:[#allocation19 + $0x28] sm:$0xff] }
 0x886   :  { %v5711_v30 = vpop.f32.mrb[19].mxu0  ;;  %v7108_v42 = vpack.c.bf16 %v4909_v38, %v4908_v56 }
 0x887   :  { %v8247_v11 = vadd.f32 %v5711_v30, %v5710_v48  ;;  %7106 = vmatpush3.bf16.msra.mxu0 %v7105_v12 }
 0x888   :  { %7040 = vmatpush3.bf16.msra.mxu1 %v7039_v19  ;;  %7107 = vmatprep.subr.bf16.mxu0 %v7541_v49 }
 0x889   :  { %7042 = vmatprep.subr.bf16.mxu1 %v7041_v22 }
 0x88b   :  { %7109 = vmatpush3.bf16.msra.mxu0 %v7108_v42 }
 0x88c   :  { %7044 = vmatpush3.bf16.msra.mxu1 %v7043_v17  ;;  %7110 = vmatprep.subr.bf16.mxu0 %v7541_v49 }
 0x88d   :  { %7077 = vmatprep.subr.bf16.mxu1 %v7541_v49 }
 0x88f   :  { %4725 = vmatmul.mubr.f32.vlgmr.msra.gmra.mrb[30].mxu1 %v8089_v14  ;;  %v4812_v14 = vld [vmem:[%s8372_s9 + $0x10] sm:$0xff] }
 0x890   :  { %7079 = vmatpush3.bf16.msra.mxu1 %v7078_v32  ;;  %5780 = vmatprep.mubr.msk.f32.mxu1 %vm7542_vm13, %v7539_v0  ;;  %v4911_v32 = vld [vmem:[#allocation19 + $0x38] sm:$0xff] }
 0x891   :  { %7080 = vmatprep.subr.bf16.mxu1 %v7541_v49 }
 0x8a2   :  { %v5360_v55 = vpop.f32.mrb[18].mxu1 }
 0x8a3   :  { %v5361_v63 = vpop.f32.mrb[19].mxu1 }
 0x8a4   :  { %v5362_v28 = vadd.f32 %v5361_v63, %v5360_v55 }
 0x8a6   :  { %v3687_v4 = vadd.f32 %v5362_v28, %v5327_v31 }
 0x8a8   :  { %v3690_v51 = vadd.f32 %v3687_v4, %v8241_v24  ;;  %v4813_v24 = vld [vmem:[%s8372_s9 + $0x18] sm:$0xff] }
 0x8a9   :  { %v7081_v39 = vpack.c.bf16 %v4813_v24, %v4812_v14  ;;  %v4910_v14 = vld [vmem:[#allocation19 + $0x30] sm:$0xff]  ;;  %v5148_v24 = vld [vmem:[#allocation18] ss:$0 sm:$0xff] }
 0x8ab   :  { %7082 = vmatpush3.bf16.msra.mxu1 %v7081_v39 }
 0x8ac   :  { %7083 = vmatprep.subr.bf16.mxu1 %v7541_v49 }
 0x8af   :  { %7085 = vmatpush3.bf16.msra.mxu1 %v7084_v40 }
 0x8b0   :  { %7086 = vmatprep.subr.bf16.mxu1 %v7541_v49 }
 0x8b3   :  { %7088 = vmatpush3.bf16.msra.mxu1 %v7087_v26  ;;  %v4996_v26 = vld [vmem:[%s8376_s13 + $0x18] sm:$0xff] }
 0x8b4   :  { %7089 = vmatprep.subr.bf16.mxu1 %v7541_v49  ;;  %v7117_v1 = vpack.c.bf16 %v4996_v26, %v4995_v13 }
 0x8b7   :  { %7091 = vmatpush3.bf16.msra.mxu1 %v7090_v45  ;;  %v4998_v45 = vld [vmem:[%s8376_s13 + $0x28] sm:$0xff] }
 0x8b8   :  { %7092 = vmatprep.subr.bf16.mxu1 %v7541_v49 }
 0x8bb   :  { %7094 = vmatpush3.bf16.msra.mxu1 %v7093_v16  ;;  %v7543_v16 = vmov 0  }
 0x8bc   :  { %7095 = vmatprep.subr.bf16.mxu1 %v7541_v49  ;;  %7218 = vset.pattern.permute.xlu0 %v7543_v16 }
 0x8bf   :  { %7097 = vmatpush3.bf16.msra.mxu1 %v7096_v9 }
 0x8c0   :  { %7098 = vmatprep.subr.bf16.mxu1 %v7541_v49 }
 0x8c2   :  { %v5395_v35 = vpop.f32.mrb[20].mxu1 }
 0x8c3   :  { %v5396_v36 = vpop.f32.mrb[21].mxu1  ;;  %7100 = vmatpush3.bf16.msra.mxu1 %v7099_v60 }
 0x8c4   :  { %v5397_v5 = vadd.f32 %v5396_v36, %v5395_v35 }
 0x8e2   :  { %v5430_v6 = vpop.f32.mrb[22].mxu1 }
 0x8e3   :  { %v5431_v7 = vpop.f32.mrb[23].mxu1 }
 0x8e4   :  { %v5432_v23 = vadd.f32 %v5431_v7, %v5430_v6  ;;  %v7120_v6 = vpack.c.bf16 %v4998_v45, %v4997_v44  ;;  %v5000_v7 = vld [vmem:[%s8376_s13 + $0x38] sm:$0xff] }
 0x8e6   :  { %v3909_v46 = vadd.f32 %v5432_v23, %v5397_v5  ;;  %v5147_v5 = vld [vmem:[#allocation16] ss:$0 sm:$0xff] }
 0x8e8   :  { %v3912_v59 = vadd.f32 %v3909_v46, %v3690_v51  ;;  %v5149_v46 = vld [vmem:[#allocation21] ss:$0 sm:$0xff] }
 0x902   :  { %v5465_v43 = vpop.f32.mrb[24].mxu1 }
 0x903   :  { %v5466_v10 = vpop.f32.mrb[25].mxu1 }
 0x904   :  { %v5467_v8 = vadd.f32 %v5466_v10, %v5465_v43 }
 0x906   :  { %v4131_v58 = vadd.f32 %v8229_v25, %v5467_v8 }
 0x908   :  { %v4134_v31 = vadd.f32 %v4131_v58, %v3912_v59 }
 0x922   :  { %v5535_v19 = vpop.f32.mrb[26].mxu1 }
 0x923   :  { %v5536_v48 = vpop.f32.mrb[27].mxu1 }
 0x924   :  { %v5537_v22 = vadd.f32 %v5536_v48, %v5535_v19 }
 0x926   :  { %v4353_v54 = vadd.f32 %v8236_v37, %v5537_v22  ;;  %v7111_v37 = vpack.c.bf16 %v4911_v32, %v4910_v14 }
 0x928   :  { %v4356_v3 = vadd.f32 %v4353_v54, %v4134_v31  ;;  %7112 = vmatpush3.bf16.msra.mxu0 %v7111_v37 }
 0x929   :  { %7113 = vmatprep.subr.bf16.mxu0 %v7541_v49 }
 0x942   :  { %v5605_v30 = vpop.f32.mrb[28].mxu1 }
 0x943   :  { %v5606_v17 = vpop.f32.mrb[29].mxu1 }
 0x944   :  { %v5607_v55 = vadd.f32 %v5606_v17, %v5605_v30 }
 0x946   :  { %v4575_v63 = vadd.f32 %v8243_v41, %v5607_v55  ;;  %v4993_v41 = vld [vmem:[%s8376_s13] sm:$0xff] }
 0x948   :  { %v4578_v28 = vadd.f32 %v4575_v63, %v4356_v3 }
 0x962   :  { %v5675_v4 = vpop.f32.mrb[30].mxu1 }
 0x963   :  { %v5676_v51 = vpop.f32.mrb[31].mxu1 }
 0x964   :  { %v5677_v35 = vadd.f32 %v5676_v51, %v5675_v4 }
 0x966   :  { %v4797_v36 = vadd.f32 %v8247_v11, %v5677_v35  ;;  %v4994_v11 = vld [vmem:[%s8376_s13 + $0x8] sm:$0xff] }
 0x967   :  { %v7114_v40 = vpack.c.bf16 %v4994_v11, %v4993_v41 }
 0x968   :  { %v4800_v25 = vadd.f32 %v4797_v36, %v4578_v28 }
 0x96a   :  { %v4808_v21 = vadd.f32 %v5147_v5, %v4800_v25 }
 0x96c   :  { %v4809_v47 = vmax.f32 %v4808_v21, 0.0 }
 0x96e   :  { %5781 = vmatmul.mubr.f32.vlgmr.msra.gmra.mrb[32].mxu1 %v4809_v47 }
 0xa41   :  { %v4899_v39 = vpop.f32.mrb[32].mxu1 }
 0xa42   :  { %v4900_v53 = vadd.f32 %v5148_v24, %v4899_v39  ;;  %v5782_v34 = vpop.f32.mrb[33].mxu1 }
 0xa44   :  { %v4903_v57 = vmax.f32 %v4900_v53, 0.0 }
 0xa46   :  { %5800 = vmatmul.mubr.msk.f32.vlgmr.msra.gmra.mrb[20].mxu0 %vm532_vm3, %v4903_v57 }
 0xa47   :  { %7115 = vmatpush3.bf16.msra.mxu0 %v7114_v40  ;;  %5818 = vmatprep.mubr.msk.f32.mxu0 %vm7542_vm13, %v7539_v0  ;;  %v4999_v0 = vld [vmem:[%s8376_s13 + $0x30] sm:$0xff]  ;;  %s7545_s13 = smov [#allocation24]  }
 0xa48   :  { %7116 = vmatprep.subr.bf16.mxu0 %v7541_v49  ;;  %v7123_v23 = vpack.c.bf16 %v5000_v7, %v4999_v0  ;;  %s5108_s30 = sshll.u32 %s7545_s13, 4  ;;  %s5109_s30 = int_to_ptr.vmem [resolvable:$true] %s5108_s30 }
 0xa49   :  { %s7483_s12 = scalar_lea.vmem %s5109_s30, 32  ;;  %p7488_p13 = scmp.lt.s32.totalorder %s5109_s30, %s5109_s30 }
 0xa4a   :  { %p7484_p12 = scmp.ne.s32.totalorder %s5109_s30, %s7483_s12  ;;  %p7489_p0 = scmp.lt.s32.totalorder %s7483_s12, %s7483_s12 }
 0xa4b   :  { %7118 = vmatpush3.bf16.msra.mxu0 %v7117_v1 }
 0xa4c   :  { %7119 = vmatprep.subr.bf16.mxu0 %v7541_v49  ;;  %p7490_p1 = por %p7489_p0, %p7488_p13 }
 0xa4e   :  { %p7491_p2 = pnand %p7490_p1, %p7484_p12 }
 0xa4f   :  { %7121 = vmatpush3.bf16.msra.mxu0 %v7120_v6 }
 0xa50   :  { %7122 = vmatprep.subr.bf16.mxu0 %v7541_v49  ;;  %v5151_v49 = vld [vmem:[#allocation22] ss:$0 sm:$0xff] }
 0xa53   :  { %7124 = vmatpush3.bf16.msra.mxu0 %v7123_v23 }
 0xb19   :  { %v4988_v59 = vpop.f32.mrb[20].mxu0 }
 0xb1a   :  { %v4989_v50 = vadd.f32 %v5149_v46, %v4988_v59  ;;  %v5801_v62 = vpop.f32.mrb[21].mxu0 }
 0xb1c   :  { %v4992_v27 = vmax.f32 %v4989_v50, 0.0 }
 0xb1e   :  { %5819 = vmatmul.mubr.msk.f32.vlgmr.msra.gmra.mrb[22].mxu0 %vm532_vm3, %v4992_v27 }
 0xbf1   :  { %v5077_v33 = vpop.f32.mrb[22].mxu0 }
 0xbf2   :  { %v5078_v2 = vadd.f32 %v5151_v49, %v5077_v33  ;;  %v5820_v29 = vpop.f32.mrb[23].mxu0 }
 0xbf4   :  { %5087 = vrot.lane.b32.xlu0 %v5078_v2, %s7544_s7 }
 0xbf8   :  { %5083 = vperm.xlu0 %7218, %v5078_v2  }
 0xc66   :  { %v5088_v15 = vpop.permute.xlu0 %5087 }
 0xc67   :  { %v5091_v9 = vsel %vm5090_vm14, %v5088_v15, 0.0 }
 0xc68   :  { %5092 = vadd.xlane.f32.xlu1 %v5091_v9 }
 0xc77   :  { %v5084_v18 = vpop.permute.xlu0 %5083 }
 0xc78   :  { %v5086_v61 = vadd.f32 %v5084_v18, %v5078_v2 }
 0xcf5   :  { %v5093_v20 = vpop.xlane.xlu1 %5092 }
 0xcf6   :  { %v5095_v52 = vmul.f32 0.16666667, %v5093_v20 }
 0xcf8   :  { %v5096_v12 = vsub.f32 %v5086_v61, %v5095_v52 }
 0xcfa   :  { %5098 = vrot.lane.b32.xlu0 %v5096_v12, %s7544_s7 }
 0xd6c   :  { %v5099_v56 = vpop.permute.xlu0 %5098 }
 0xd6d   :  { %5101 = vst.msk [vmem:[#allocation24] sm:$0x3] %vm5090_vm14, %v5099_v56 }
 0xd6e   :  { %7494 = shalt.err (!%p7491_p2)
}
 0xd6f   :  { %s7495_s22 = scalar_lea.hbm %s8378_s15, 32 }
 0xd70   :  { %p7496_p3 = scmp.ne.s32.totalorder %s8378_s15, %s7495_s22  ;;  %p7499_p4 = scmp.lt.u32.totalorder %s7495_s22, %s8378_s15 }
 0xd72   :  { %p7501_p5 = pnand %p7499_p4, %p7496_p3 }
 0xd74   :  { %7504 = shalt.err (!%p7501_p5)
}
 0xd75   :  { %5111 = dma.vmem_to_hbm [thread:$0]  %s5109_s30, 32, %s8378_s15, [#allocation6]  }
 0xd76   :  { %7519 = dma.done.wait [#allocation6], 32  }
 0xd77   :  { %7520 = vsyncadd [#allocation6], 4294967264 }
 0xd78   :  { %5115 = vsyncpa [#allocation5], 1 }
 0xd79   :  { %5116 = vsyncpa [#allocation8], 1 }
 0xd7a   :  { %5117 = vsyncpa [#allocation11], 1 }
 0xd7b   :  { %5118 = vsyncpa [#allocation14], 1 }
 0xd7c   :  { %5119 = vsyncpa [#allocation17], 1 }
 0xd7d   :  { %5120 = vsyncpa [#allocation20], 1 }
 0xd7e   :  { %5121 = vsyncpa [#allocation23], 1 }
 0xd7f   :  { %5122 = vsyncpa [#allocation6], 1 }

</bundles_post_ra>
